<compile_context>
chip_gen: v7x
topology: tpu7x:2x2x1
jax: 0.10.0
libtpu: 0.0.40
codegen_flags: <defaults>
</compile_context>

<pallas_src>
import functools

import jax
import jax.numpy as jnp
import numpy as np
from jax.experimental import pallas as pl
from jax.experimental.pallas import tpu as pltpu

# flat-key packing for sparse voxel coordinates: coords must lie in [-512, 510]
_KEY_OFF = 512
_KEY_SPAN = 1024
_LANE = 128


def _round_up(x, m):
    return ((x + m - 1) // m) * m


# --------------------------------------------------------------------------
# Kernel 1: ResnetBlockFC over the sparse point features (row-tiled grid).
# Output columns are zero-padded to a multiple of 128 -> lane-dense store.
# --------------------------------------------------------------------------
def _resnet_block_kernel(x_ref, w0_ref, b0_ref, w1_ref, b1_ref, ws_ref, out_ref):
    x = x_ref[...]
    net = jnp.dot(jnp.maximum(x, 0.0), w0_ref[...],
                  preferred_element_type=jnp.float32) + b0_ref[...]
    dx = jnp.dot(jnp.maximum(net, 0.0), w1_ref[...],
                 preferred_element_type=jnp.float32) + b1_ref[...]
    out_ref[...] = jnp.dot(x, ws_ref[...],
                           preferred_element_type=jnp.float32) + dx


def point_resnet(x, p, *, tm=512):
    """x: (M, C_in) -> (M, round_up(h, 128)) via ResnetBlockFC (padded cols = 0)."""
    M, c_in = x.shape
    h = p["w1"].shape[1]
    hp = _round_up(h, _LANE)
    w1 = jnp.pad(p["w1"], ((0, 0), (0, hp - h)))
    b1 = jnp.pad(p["b1"], ((0, 0), (0, hp - h)))
    ws = jnp.pad(p["ws"], ((0, 0), (0, hp - h)))
    m_pad = _round_up(M, tm)
    xp = jnp.pad(x, ((0, m_pad - M), (0, 0)))
    out = pl.pallas_call(
        _resnet_block_kernel,
        out_shape=jax.ShapeDtypeStruct((m_pad, hp), jnp.float32),
        grid=(m_pad // tm,),
        in_specs=[pl.BlockSpec((tm, c_in), lambda i: (i, 0)),
                  pl.BlockSpec(p["w0"].shape, lambda i: (0, 0)),
                  pl.BlockSpec(p["b0"].shape, lambda i: (0, 0)),
                  pl.BlockSpec(w1.shape, lambda i: (0, 0)),
                  pl.BlockSpec(b1.shape, lambda i: (0, 0)),
                  pl.BlockSpec(ws.shape, lambda i: (0, 0))],
        out_specs=pl.BlockSpec((tm, hp), lambda i: (i, 0)),
        compiler_params=pltpu.CompilerParams(
            dimension_semantics=("parallel",)),
    )(xp, p["w0"], p["b0"], w1, b1, ws)
    return out[:M]


# --------------------------------------------------------------------------
# Kernel 2: fused per-(batch, N-tile) forward:
#   dense trilinear sample -> dense ResNet -> sparse interpolation -> out_mlp
#   -> positional residual.
# --------------------------------------------------------------------------
def _fused_kernel(xyz_ref, pos_ref, g2_ref, yx_ref, zcol_ref, s_ref,
                  keys_ref, pf_ref,
                  dw0_ref, db0_ref, dw1_ref, db1_ref, dws_ref,
                  ow0v_ref, ow0s_ref, ob0_ref, ow1_ref, ob1_ref,
                  owsv_ref, owss_ref, out_ref, *,
                  D, H, W, C, min_coord, max_coord, quantization_size):
    coords = xyz_ref[0]                                    # (tn, 3) f32

    # ---------------- dense trilinear sample (grid_sample, align_corners=False,
    # padding='border'); separable (y,x) weights contracted on the MXU, the z
    # axis recombined with one full-width multiply + a tiny block-sum matmul.
    t = (coords - min_coord) / (max_coord - min_coord) * 2.0 - 1.0

    def unnorm(v, size):
        return jnp.clip(((v + 1.0) * size - 1.0) * 0.5, 0.0, size - 1.0)

    # torch passes coords permuted [2,1,0]: col 0 -> D, col 1 -> H, col 2 -> W
    zc = unnorm(t[:, 0:1], float(D))
    yc = unnorm(t[:, 1:2], float(H))
    xc = unnorm(t[:, 2:3], float(W))
    z0 = jnp.floor(zc); fz = zc - z0; z0i = z0.astype(jnp.int32)
    y0 = jnp.floor(yc); fy = yc - y0; y0i = y0.astype(jnp.int32)
    x0 = jnp.floor(xc); fx = xc - x0; x0i = x0.astype(jnp.int32)

    jy = yx_ref[0:1, :]                                    # (1, H*W), hoisted
    jx = yx_ref[1:2, :]
    wy = jnp.where(jy == y0i, 1.0 - fy, 0.0) + jnp.where(jy == y0i + 1, fy, 0.0)
    wx = jnp.where(jx == x0i, 1.0 - fx, 0.0) + jnp.where(jx == x0i + 1, fx, 0.0)
    wyx = (wy * wx).astype(jnp.bfloat16)                   # (tn, H*W)

    # contract y/x on the MXU: g2 rows are (y*W+x), cols are (z*C+c)  [bf16]
    a = jnp.dot(wyx, g2_ref[0], preferred_element_type=jnp.float32)   # (tn, D*C)

    zcol = zcol_ref[0:1, :]                                # (1, D*C), hoisted
    wz = jnp.where(zcol == z0i, 1.0 - fz, 0.0) + jnp.where(zcol == z0i + 1, fz, 0.0)
    dense_inter = jnp.dot(a * wz, s_ref[...],
                          preferred_element_type=jnp.float32)          # (tn, C)

    # ---------------- dense ResnetBlockFC -----------------------------------
    dnet = jnp.dot(jnp.maximum(dense_inter, 0.0), dw0_ref[...],
                   preferred_element_type=jnp.float32) + db0_ref[...]
    ddx = jnp.dot(jnp.maximum(dnet, 0.0), dw1_ref[...],
                  preferred_element_type=jnp.float32) + db1_ref[...]
    vol = jnp.dot(dense_inter, dws_ref[...],
                  preferred_element_type=jnp.float32) + ddx            # (tn, h)

    # ---------------- sparse trilinear interpolation (per-batch flat keys) --
    # TODO(synk): stands in for the injected MinkowskiEngine sparse_interpolator
    # (trilinear over the sparse voxel set; missing voxels contribute 0).
    p = coords / quantization_size
    p0 = jnp.floor(p)
    fr = p - p0
    p0i = p0.astype(jnp.int32)
    lo, hi = -_KEY_OFF, _KEY_OFF - 2
    px = p0i[:, 0:1]; py = p0i[:, 1:2]; pz = p0i[:, 2:3]
    in_rng = ((px >= lo) & (px <= hi) & (py >= lo) & (py <= hi)
              & (pz >= lo) & (pz <= hi))                               # (tn, 1)
    kbase = (((px + _KEY_OFF) * _KEY_SPAN + (py + _KEY_OFF)) * _KEY_SPAN
             + (pz + _KEY_OFF))
    kbase = jnp.where(in_rng, kbase, -(1 << 30))           # alias guard
    frx = fr[:, 0:1]; fry = fr[:, 1:2]; frz = fr[:, 2:3]
    keys = keys_ref[0]                                     # (1, M_per) int32

    wmat = jnp.zeros((coords.shape[0], keys.shape[1]), jnp.float32)
    for dx_ in (0, 1):
        wa = frx if dx_ else 1.0 - frx
        for dy_ in (0, 1):
            wb = wa * (fry if dy_ else 1.0 - fry)
            for dz_ in (0, 1):
                w = wb * (frz if dz_ else 1.0 - frz)                   # (tn, 1)
                kq = kbase + (dx_ * _KEY_SPAN * _KEY_SPAN
                              + dy_ * _KEY_SPAN + dz_)
                wmat = jnp.where(kq == keys, wmat + w, wmat)           # select-acc
    surf = jnp.dot(wmat.astype(jnp.bfloat16), pf_ref[0],
                   preferred_element_type=jnp.float32)                 # (tn, hp)

    # ---------------- out_mlp (rows split vol|surf, cols pre-padded) + resid.
    onet = (jnp.dot(jnp.maximum(vol, 0.0), ow0v_ref[...],
                    preferred_element_type=jnp.float32)
            + jnp.dot(jnp.maximum(surf, 0.0), ow0s_ref[...],
                      preferred_element_type=jnp.float32)
            + ob0_ref[...])
    odx = jnp.dot(jnp.maximum(onet, 0.0), ow1_ref[...],
                  preferred_element_type=jnp.float32) + ob1_ref[...]
    oxs = (jnp.dot(vol, owsv_ref[...], preferred_element_type=jnp.float32)
           + jnp.dot(surf, owss_ref[...], preferred_element_type=jnp.float32))
    # padded weight columns 0..2 and h.. are zero => cols 0..2 equal pos_enc,
    # cols 3..h-1 equal pos_enc + out_mlp(features), cols >= h are zero.
    out_ref[0] = pos_ref[0] + oxs + odx


# --------------------------------------------------------------------------
# FeatureInterpolator.forward
# --------------------------------------------------------------------------
def feature_interpolator_forward(params, points_pos_enc, xyz, sparse_coordinates,
                                 dense_features, multi_res_feats, batch_size,
                                 stage, *, min_coord, max_coord,
                                 quantization_size, hidden_dim,
                                 max_points_per_batch=None):
    B, N, _ = points_pos_enc.shape
    _, C, D, H, W = dense_features.shape
    h = hidden_dim
    hp = _round_up(h, _LANE)
    HW, DC = H * W, D * C
    assert B == batch_size

    # ---- kernel 1: sparse point features (shared across batch), lane-dense
    pf_full = point_resnet(multi_res_feats, params["point"][stage])   # (M, hp) f32
    M_total = multi_res_feats.shape[0]

    # ---- per-batch partition of the sparse voxels (drops the in-kernel batch
    #      mask and shrinks the (N, M) compare/matmul plane by a factor of B).
    mp = max_points_per_batch if max_points_per_batch is not None else -(-M_total // B)
    mp = _round_up(mp, _LANE)
    sc = sparse_coordinates.astype(jnp.int32)
    bids = sc[:, 0]
    cxyz = sc[:, 1:4]
    in_range = jnp.all((cxyz >= -_KEY_OFF) & (cxyz <= _KEY_OFF - 2), axis=1)
    skeys = (((cxyz[:, 0] + _KEY_OFF) * _KEY_SPAN + (cxyz[:, 1] + _KEY_OFF))
             * _KEY_SPAN + (cxyz[:, 2] + _KEY_OFF))
    skeys = jnp.where(in_range, skeys, -1)       # alias guard: never matches
    one_hot = (bids[:, None] == jnp.arange(B, dtype=jnp.int32)[None, :]).astype(jnp.int32)
    rank = jnp.take_along_axis(jnp.cumsum(one_hot, axis=0),
                               bids[:, None], axis=1)[:, 0] - 1
    dest = jnp.where(rank < mp, bids * mp + rank, B * mp)   # OOB index -> dropped
    keys_part = (jnp.full((B * mp,), -1, jnp.int32)
                 .at[dest].set(skeys, mode="drop").reshape(B, 1, mp))
    pf_part = (jnp.zeros((B * mp, hp), jnp.bfloat16)
               .at[dest].set(pf_full.astype(jnp.bfloat16), mode="drop")
               .reshape(B, mp, hp))
    # TODO(synk): rows beyond max_points_per_batch per batch are dropped; pass
    # an explicit bound for ragged batches.

    # ---- dense grid, (y*W+x)-major rows, (z*C+c)-major cols, bf16 for the MXU
    g2 = (jnp.transpose(dense_features, (0, 3, 4, 2, 1))
          .reshape(B, HW, DC).astype(jnp.bfloat16))
    # TODO(synk): for grids >= ~32^3 chunk the H*W contraction (or gather the
    # <=4 rows per point) instead of keeping the full g2 slab resident (v7x VMEM).

    # ---- hoisted index rows + block-sum matrix
    col_hw = jnp.arange(HW, dtype=jnp.int32)
    yx_rows = jnp.stack([col_hw // W, col_hw % W], axis=0)            # (2, HW)
    col_dc = jnp.arange(DC, dtype=jnp.int32)
    zcol_row = (col_dc // C).reshape(1, DC)                           # (1, DC)
    ssum = (col_dc[:, None] % C
            == jnp.arange(C, dtype=jnp.int32)[None, :]).astype(jnp.float32)  # (DC, C)

    # ---- out_mlp weights: split by input rows (vol | surf); surf rows padded
    #      to hp; output cols padded as [3 zeros | h-3 | zeros to hp]
    om = params["out_mlp"]
    hm = om["w1"].shape[1]                        # hidden_dim - 3
    ow0v = om["w0"][:h]                                              # (h,  hm)
    ow0s = jnp.pad(om["w0"][h:], ((0, hp - h), (0, 0)))              # (hp, hm)
    ob0 = om["b0"]                                                   # (1,  hm)
    ow1 = jnp.pad(om["w1"], ((0, 0), (3, hp - 3 - hm)))              # (hm, hp)
    ob1 = jnp.pad(om["b1"], ((0, 0), (3, hp - 3 - hm)))              # (1,  hp)
    owsv = jnp.pad(om["ws"][:h], ((0, 0), (3, hp - 3 - hm)))         # (h,  hp)
    owss = jnp.pad(om["ws"][h:], ((0, hp - h), (3, hp - 3 - hm)))    # (hp, hp)
    dp = params["dense"][stage]

    # ---- N-tiled grid; pad N and pos_enc lanes (output sliced back outside)
    tn = min(256, _round_up(N, 8))
    n_pad = _round_up(N, tn)
    xyz_p = jnp.pad(xyz, ((0, 0), (0, n_pad - N), (0, 0)))
    pos_p = jnp.pad(points_pos_enc, ((0, 0), (0, n_pad - N), (0, hp - h)))

    kernel = functools.partial(
        _fused_kernel, D=D, H=H, W=W, C=C,
        min_coord=float(min_coord), max_coord=float(max_coord),
        quantization_size=float(quantization_size))

    def shared(shape):
        return pl.BlockSpec(shape, lambda b, n: (0,) * len(shape))

    # explicit VMEM budget: double-buffered blocks + in-kernel working set
    blk_bytes = (tn * 3 * 4 + 2 * tn * hp * 4                  # xyz, pos, out
                 + HW * DC * 2 + 2 * HW * 4 + DC * 4 + DC * C * 4
                 + mp * 4 + mp * hp * 2)
    weight_bytes = sum(int(np.prod(a.shape)) * 4 for a in
                       (dp["w0"], dp["b0"], dp["w1"], dp["b1"], dp["ws"],
                        ow0v, ow0s, ob0, ow1, ob1, owsv, owss))
    work_bytes = tn * (3 * HW + 2 * DC + 2 * mp + 4 * hp) * 4
    vmem_limit = int(min(112 << 20,
                         max(32 << 20,
                             2 * (blk_bytes + weight_bytes) + work_bytes + (8 << 20))))

    out = pl.pallas_call(
        kernel,
        out_shape=jax.ShapeDtypeStruct((B, n_pad, hp), jnp.float32),
        grid=(B, n_pad // tn),
        in_specs=[pl.BlockSpec((1, tn, 3), lambda b, n: (b, n, 0)),
                  pl.BlockSpec((1, tn, hp), lambda b, n: (b, n, 0)),
                  pl.BlockSpec((1, HW, DC), lambda b, n: (b, 0, 0)),
                  shared(yx_rows.shape),
                  shared(zcol_row.shape),
                  shared(ssum.shape),
                  pl.BlockSpec((1, 1, mp), lambda b, n: (b, 0, 0)),
                  pl.BlockSpec((1, mp, hp), lambda b, n: (b, 0, 0)),
                  shared(dp["w0"].shape), shared(dp["b0"].shape),
                  shared(dp["w1"].shape), shared(dp["b1"].shape),
                  shared(dp["ws"].shape),
                  shared(ow0v.shape), shared(ow0s.shape), shared(ob0.shape),
                  shared(ow1.shape), shared(ob1.shape),
                  shared(owsv.shape), shared(owss.shape)],
        out_specs=pl.BlockSpec((1, tn, hp), lambda b, n: (b, n, 0)),
        compiler_params=pltpu.CompilerParams(
            dimension_semantics=("parallel", "parallel"),
            vmem_limit_bytes=vmem_limit),
    )(xyz_p, pos_p, g2, yx_rows, zcol_row, ssum, keys_part, pf_part,
      dp["w0"], dp["b0"], dp["w1"], dp["b1"], dp["ws"],
      ow0v, ow0s, ob0, ow1, ob1, owsv, owss)
    return out[:, :N, :h]


# --------------------------------------------------------------------------
# Parameter init (deterministic, synthetic).  ResnetBlockFC(size_in, size_out)
# -> fc_0: in->h, fc_1: h->out, shortcut: in->out (no bias), h=min(in,out).
# --------------------------------------------------------------------------
def init_resnet_params(key, size_in, size_out):
    size_h = min(size_in, size_out)
    k0, k1, k2, k3, k4 = jax.random.split(key, 5)
    p = {
        "w0": jax.random.normal(k0, (size_in, size_h), jnp.float32) / np.sqrt(size_in),
        "b0": jax.random.normal(k1, (1, size_h), jnp.float32) * 0.01,
        "w1": jax.random.normal(k2, (size_h, size_out), jnp.float32) / np.sqrt(size_h),
        "b1": jax.random.normal(k3, (1, size_out), jnp.float32) * 0.01,
    }
    if size_in == size_out:
        p["ws"] = jnp.eye(size_in, dtype=jnp.float32)
    else:
        p["ws"] = (jax.random.normal(k4, (size_in, size_out), jnp.float32)
                   / np.sqrt(size_in))
    return p


# --------------------------------------------------------------------------
# Pure-JAX reference (gather-based, f32) used only to validate the kernels.
# --------------------------------------------------------------------------
def reference_forward(params, pos_enc, xyz, sparse_coords, dense_features,
                      multi_res_feats, batch_size, stage, *, min_coord,
                      max_coord, quantization_size, hidden_dim):
    def resblock(x, p):
        net = jnp.maximum(x, 0.0) @ p["w0"] + p["b0"]
        dx = jnp.maximum(net, 0.0) @ p["w1"] + p["b1"]
        return x @ p["ws"] + dx

    B, N, _ = xyz.shape
    _, C, D, H, W = dense_features.shape

    def dense_sample_one(coords, grid):          # coords (N,3), grid (C,D,H,W)
        t = (coords - min_coord) / (max_coord - min_coord) * 2.0 - 1.0

        def unnorm(v, size):
            return jnp.clip(((v + 1.0) * size - 1.0) * 0.5, 0.0, size - 1.0)

        zc = unnorm(t[:, 0], D); yc = unnorm(t[:, 1], H); xc = unnorm(t[:, 2], W)
        z0 = jnp.floor(zc); y0 = jnp.floor(yc); x0 = jnp.floor(xc)
        fz, fy, fx = zc - z0, yc - y0, xc - x0
        out = jnp.zeros((coords.shape[0], C), jnp.float32)
        for dz in (0, 1):
            for dy in (0, 1):
                for dx_ in (0, 1):
                    zi = jnp.clip(z0 + dz, 0, D - 1).astype(jnp.int32)
                    yi = jnp.clip(y0 + dy, 0, H - 1).astype(jnp.int32)
                    xi = jnp.clip(x0 + dx_, 0, W - 1).astype(jnp.int32)
                    w = ((fz if dz else 1 - fz) * (fy if dy else 1 - fy)
                         * (fx if dx_ else 1 - fx))
                    out = out + w[:, None] * grid[:, zi, yi, xi].T
        return out

    dense_inter = jnp.stack([dense_sample_one(xyz[b], dense_features[b])
                             for b in range(B)])
    vol = resblock(dense_inter.reshape(B * N, C),
                   params["dense"][stage]).reshape(B, N, hidden_dim)

    point_feats = resblock(multi_res_feats, params["point"][stage])
    sc = sparse_coords.astype(jnp.int32)
    surf_list = []
    for b in range(B):
        p = xyz[b] / quantization_size
        p0 = jnp.floor(p); fr = p - p0; p0i = p0.astype(jnp.int32)
        acc = jnp.zeros((N, hidden_dim), jnp.float32)
        for dx_ in (0, 1):
            for dy in (0, 1):
                for dz in (0, 1):
                    corner = p0i + jnp.array([dx_, dy, dz], jnp.int32)
                    w = ((fr[:, 0] if dx_ else 1 - fr[:, 0]) *
                         (fr[:, 1] if dy else 1 - fr[:, 1]) *
                         (fr[:, 2] if dz else 1 - fr[:, 2]))
                    match = ((corner[:, None, 0] == sc[None, :, 1]) &
                             (corner[:, None, 1] == sc[None, :, 2]) &
                             (corner[:, None, 2] == sc[None, :, 3]) &
                             (sc[None, :, 0] == b)).astype(jnp.float32)
                    acc = acc + (w[:, None] * match) @ point_feats
        surf_list.append(acc)
    surf = jnp.stack(surf_list)

    feats = jnp.concatenate([vol, surf], -1).reshape(B * N, 2 * hidden_dim)
    pts_feats = resblock(feats, params["out_mlp"]).reshape(B, N, hidden_dim - 3)
    return jnp.concatenate([jnp.zeros((B, N, 3), jnp.float32), pts_feats],
                           -1) + pos_enc


# --------------------------------------------------------------------------
if __name__ == "__main__":
    key = jax.random.PRNGKey(0)

    # module config
    B, N = 2, 64
    hidden_dim = 32
    unet_shapes = [16]
    sparse_shapes = [24]
    stage = 0
    D = H = W = 8
    M_per = 128
    M_total = B * M_per
    min_coord, max_coord = -0.5, 0.5
    quantization_size = 0.05

    ks = jax.random.split(key, 8)
    params = {
        "dense": [init_resnet_params(ks[0], unet_shapes[0], hidden_dim)],
        "point": [init_resnet_params(ks[1], sparse_shapes[0], hidden_dim)],
        "out_mlp": init_resnet_params(ks[2], 2 * hidden_dim, hidden_dim - 3),
    }

    points_pos_enc = jax.random.normal(ks[3], (B, N, hidden_dim), jnp.float32)
    xyz = jax.random.uniform(ks[4], (B, N, 3), jnp.float32,
                             minval=-0.45, maxval=0.45)
    dense_features = jax.random.normal(ks[5], (B, unet_shapes[0], D, H, W),
                                       jnp.float32)
    multi_res_feats = jax.random.normal(ks[6], (M_total, sparse_shapes[0]),
                                        jnp.float32)
    sparse_xyz = jax.random.randint(ks[7], (M_total, 3), -10, 11, jnp.int32)
    batch_col = jnp.repeat(jnp.arange(B, dtype=jnp.int32), M_per)[:, None]
    sparse_coordinates = jnp.concatenate([batch_col, sparse_xyz], axis=1)  # (M, 4)

    fwd = jax.jit(
        functools.partial(feature_interpolator_forward,
                          min_coord=min_coord, max_coord=max_coord,
                          quantization_size=quantization_size,
                          hidden_dim=hidden_dim),
        static_argnums=(6, 7))

    out = fwd(params, points_pos_enc, xyz, sparse_coordinates, dense_features,
              multi_res_feats, B, stage)
    out = jax.block_until_ready(out)

    assert out.shape == (B, N, hidden_dim), out.shape
    assert bool(jnp.all(jnp.isfinite(out)))

    ref = reference_forward(params, points_pos_enc, xyz, sparse_coordinates,
                            dense_features, multi_res_feats, B, stage,
                            min_coord=min_coord, max_coord=max_coord,
                            quantization_size=quantization_size,
                            hidden_dim=hidden_dim)
    # tolerance accounts for the bf16 MXU operands (grid / point features)
    np.testing.assert_allclose(np.asarray(out), np.asarray(ref),
                               rtol=5e-2, atol=1e-1)

    print("KERNEL_OK")
</pallas_src>

<mosaic_0001>
module attributes {stable_mosaic.version = 11 : i64} {
  func.func @_resnet_block_kernel(%arg0: i32, %arg1: memref<512x24xf32, #tpu.memory_space<vmem>>, %arg2: memref<24x24xf32, #tpu.memory_space<vmem>>, %arg3: memref<1x24xf32, #tpu.memory_space<vmem>>, %arg4: memref<24x128xf32, #tpu.memory_space<vmem>>, %arg5: memref<1x128xf32, #tpu.memory_space<vmem>>, %arg6: memref<24x128xf32, #tpu.memory_space<vmem>>, %arg7: memref<512x128xf32, #tpu.memory_space<vmem>>) attributes {dimension_semantics = [#tpu.dimension_semantics<parallel>], iteration_bounds = array<i64: 1>, scalar_prefetch = 0 : i64, scratch_operands = 0 : i64, tpu.core_type = #tpu.core_type<tc>, window_params = [{transform_indices = @transform_0, window_bounds = array<i64: 512, 24>}, {pipeline_mode = #tpu.pipeline_mode<synchronous>, transform_indices = @transform_1, window_bounds = array<i64: 24, 24>}, {pipeline_mode = #tpu.pipeline_mode<synchronous>, transform_indices = @transform_2, window_bounds = array<i64: 1, 24>}, {pipeline_mode = #tpu.pipeline_mode<synchronous>, transform_indices = @transform_3, window_bounds = array<i64: 24, 128>}, {pipeline_mode = #tpu.pipeline_mode<synchronous>, transform_indices = @transform_4, window_bounds = array<i64: 1, 128>}, {pipeline_mode = #tpu.pipeline_mode<synchronous>, transform_indices = @transform_5, window_bounds = array<i64: 24, 128>}, {transform_indices = @transform_6, window_bounds = array<i64: 512, 128>}]} {
    %c0 = arith.constant 0 : index
    %c0_0 = arith.constant 0 : index
    %0 = vector.load %arg1[%c0, %c0_0] : memref<512x24xf32, #tpu.memory_space<vmem>>, vector<512x24xf32>
    %cst = arith.constant 0.000000e+00 : f32
    %1 = vector.broadcast %cst : f32 to vector<512x24xf32>
    %2 = arith.maximumf %0, %1 : vector<512x24xf32>
    %c0_1 = arith.constant 0 : index
    %c0_2 = arith.constant 0 : index
    %3 = vector.load %arg2[%c0_1, %c0_2] : memref<24x24xf32, #tpu.memory_space<vmem>>, vector<24x24xf32>
    %cst_3 = arith.constant dense<0.000000e+00> : vector<512x24xf32>
    %4 = tpu.matmul %2, %3, %cst_3 {dimension_numbers = #tpu.dot_dimension_numbers<[1], [0], [0], [1], [0, 0, 1, 1], [], []>} : vector<512x24xf32>, vector<24x24xf32>, vector<512x24xf32> -> vector<512x24xf32>
    %c0_4 = arith.constant 0 : index
    %c0_5 = arith.constant 0 : index
    %5 = vector.load %arg3[%c0_4, %c0_5] : memref<1x24xf32, #tpu.memory_space<vmem>>, vector<1x24xf32>
    %6 = vector.broadcast %5 : vector<1x24xf32> to vector<512x24xf32>
    %7 = arith.addf %4, %6 : vector<512x24xf32>
    %cst_6 = arith.constant 0.000000e+00 : f32
    %8 = vector.broadcast %cst_6 : f32 to vector<512x24xf32>
    %9 = arith.maximumf %7, %8 : vector<512x24xf32>
    %c0_7 = arith.constant 0 : index
    %c0_8 = arith.constant 0 : index
    %10 = vector.load %arg4[%c0_7, %c0_8] : memref<24x128xf32, #tpu.memory_space<vmem>>, vector<24x128xf32>
    %cst_9 = arith.constant dense<0.000000e+00> : vector<512x128xf32>
    %11 = tpu.matmul %9, %10, %cst_9 {dimension_numbers = #tpu.dot_dimension_numbers<[1], [0], [0], [1], [0, 0, 1, 1], [], []>} : vector<512x24xf32>, vector<24x128xf32>, vector<512x128xf32> -> vector<512x128xf32>
    %c0_10 = arith.constant 0 : index
    %c0_11 = arith.constant 0 : index
    %12 = vector.load %arg5[%c0_10, %c0_11] : memref<1x128xf32, #tpu.memory_space<vmem>>, vector<1x128xf32>
    %13 = vector.broadcast %12 : vector<1x128xf32> to vector<512x128xf32>
    %14 = arith.addf %11, %13 : vector<512x128xf32>
    %c0_12 = arith.constant 0 : index
    %c0_13 = arith.constant 0 : index
    %15 = vector.load %arg6[%c0_12, %c0_13] : memref<24x128xf32, #tpu.memory_space<vmem>>, vector<24x128xf32>
    %cst_14 = arith.constant dense<0.000000e+00> : vector<512x128xf32>
    %16 = tpu.matmul %0, %15, %cst_14 {dimension_numbers = #tpu.dot_dimension_numbers<[1], [0], [0], [1], [0, 0, 1, 1], [], []>} : vector<512x24xf32>, vector<24x128xf32>, vector<512x128xf32> -> vector<512x128xf32>
    %17 = arith.addf %16, %14 : vector<512x128xf32>
    %c0_15 = arith.constant 0 : index
    %c0_16 = arith.constant 0 : index
    %18 = vector.load %arg7[%c0_15, %c0_16] : memref<512x128xf32, #tpu.memory_space<vmem>>, vector<512x128xf32>
    tpu.vector_store %arg7[%c0_15, %c0_16], %17 {strides = array<i32>} : memref<512x128xf32, #tpu.memory_space<vmem>>, vector<512x128xf32>,
    return
  }
  func.func @transform_0(%arg0: i32) -> (i32, i32) {
    %c0_i32 = arith.constant 0 : i32
    %c0_i32_0 = arith.constant 0 : i32
    return %arg0, %c0_i32 : i32, i32
  }
  func.func @transform_1(%arg0: i32) -> (i32, i32) {
    %c0_i32 = arith.constant 0 : i32
    %c0_i32_0 = arith.constant 0 : i32
    %c0_i32_1 = arith.constant 0 : i32
    return %c0_i32, %c0_i32_0 : i32, i32
  }
  func.func @transform_2(%arg0: i32) -> (i32, i32) {
    %c0_i32 = arith.constant 0 : i32
    %c0_i32_0 = arith.constant 0 : i32
    %c0_i32_1 = arith.constant 0 : i32
    return %c0_i32, %c0_i32_0 : i32, i32
  }
  func.func @transform_3(%arg0: i32) -> (i32, i32) {
    %c0_i32 = arith.constant 0 : i32
    %c0_i32_0 = arith.constant 0 : i32
    %c0_i32_1 = arith.constant 0 : i32
    return %c0_i32, %c0_i32_0 : i32, i32
  }
  func.func @transform_4(%arg0: i32) -> (i32, i32) {
    %c0_i32 = arith.constant 0 : i32
    %c0_i32_0 = arith.constant 0 : i32
    %c0_i32_1 = arith.constant 0 : i32
    return %c0_i32, %c0_i32_0 : i32, i32
  }
  func.func @transform_5(%arg0: i32) -> (i32, i32) {
    %c0_i32 = arith.constant 0 : i32
    %c0_i32_0 = arith.constant 0 : i32
    %c0_i32_1 = arith.constant 0 : i32
    return %c0_i32, %c0_i32_0 : i32, i32
  }
  func.func @transform_6(%arg0: i32) -> (i32, i32) {
    %c0_i32 = arith.constant 0 : i32
    %c0_i32_0 = arith.constant 0 : i32
    return %arg0, %c0_i32 : i32, i32
  }
}

module attributes {stable_mosaic.version = 11 : i64} {
  func.func @_fused_kernel(%arg0: i32, %arg1: i32, %arg2: memref<1x64x3xf32, #tpu.memory_space<vmem>>, %arg3: memref<1x64x128xf32, #tpu.memory_space<vmem>>, %arg4: memref<1x64x128xbf16, #tpu.memory_space<vmem>>, %arg5: memref<2x64xi32, #tpu.memory_space<vmem>>, %arg6: memref<1x128xi32, #tpu.memory_space<vmem>>, %arg7: memref<128x16xf32, #tpu.memory_space<vmem>>, %arg8: memref<1x1x128xi32, #tpu.memory_space<vmem>>, %arg9: memref<1x128x128xbf16, #tpu.memory_space<vmem>>, %arg10: memref<16x16xf32, #tpu.memory_space<vmem>>, %arg11: memref<1x16xf32, #tpu.memory_space<vmem>>, %arg12: memref<16x32xf32, #tpu.memory_space<vmem>>, %arg13: memref<1x32xf32, #tpu.memory_space<vmem>>, %arg14: memref<16x32xf32, #tpu.memory_space<vmem>>, %arg15: memref<32x29xf32, #tpu.memory_space<vmem>>, %arg16: memref<128x29xf32, #tpu.memory_space<vmem>>, %arg17: memref<1x29xf32, #tpu.memory_space<vmem>>, %arg18: memref<29x128xf32, #tpu.memory_space<vmem>>, %arg19: memref<1x128xf32, #tpu.memory_space<vmem>>, %arg20: memref<32x128xf32, #tpu.memory_space<vmem>>, %arg21: memref<128x128xf32, #tpu.memory_space<vmem>>, %arg22: memref<1x64x128xf32, #tpu.memory_space<vmem>>) attributes {dimension_semantics = [#tpu.dimension_semantics<parallel>, #tpu.dimension_semantics<parallel>], iteration_bounds = array<i64: 2, 1>, scalar_prefetch = 0 : i64, scratch_operands = 0 : i64, tpu.core_type = #tpu.core_type<tc>, window_params = [{transform_indices = @transform_0, window_bounds = array<i64: 1, 64, 3>}, {transform_indices = @transform_1, window_bounds = array<i64: 1, 64, 128>}, {transform_indices = @transform_2, window_bounds = array<i64: 1, 64, 128>}, {pipeline_mode = #tpu.pipeline_mode<synchronous>, transform_indices = @transform_3, window_bounds = array<i64: 2, 64>}, {pipeline_mode = #tpu.pipeline_mode<synchronous>, transform_indices = @transform_4, window_bounds = array<i64: 1, 128>}, {pipeline_mode = #tpu.pipeline_mode<synchronous>, transform_indices = @transform_5, window_bounds = array<i64: 128, 16>}, {transform_indices = @transform_6, window_bounds = array<i64: 1, 1, 128>}, {transform_indices = @transform_7, window_bounds = array<i64: 1, 128, 128>}, {pipeline_mode = #tpu.pipeline_mode<synchronous>, transform_indices = @transform_8, window_bounds = array<i64: 16, 16>}, {pipeline_mode = #tpu.pipeline_mode<synchronous>, transform_indices = @transform_9, window_bounds = array<i64: 1, 16>}, {pipeline_mode = #tpu.pipeline_mode<synchronous>, transform_indices = @transform_10, window_bounds = array<i64: 16, 32>}, {pipeline_mode = #tpu.pipeline_mode<synchronous>, transform_indices = @transform_11, window_bounds = array<i64: 1, 32>}, {pipeline_mode = #tpu.pipeline_mode<synchronous>, transform_indices = @transform_12, window_bounds = array<i64: 16, 32>}, {pipeline_mode = #tpu.pipeline_mode<synchronous>, transform_indices = @transform_13, window_bounds = array<i64: 32, 29>}, {pipeline_mode = #tpu.pipeline_mode<synchronous>, transform_indices = @transform_14, window_bounds = array<i64: 128, 29>}, {pipeline_mode = #tpu.pipeline_mode<synchronous>, transform_indices = @transform_15, window_bounds = array<i64: 1, 29>}, {pipeline_mode = #tpu.pipeline_mode<synchronous>, transform_indices = @transform_16, window_bounds = array<i64: 29, 128>}, {pipeline_mode = #tpu.pipeline_mode<synchronous>, transform_indices = @transform_17, window_bounds = array<i64: 1, 128>}, {pipeline_mode = #tpu.pipeline_mode<synchronous>, transform_indices = @transform_18, window_bounds = array<i64: 32, 128>}, {pipeline_mode = #tpu.pipeline_mode<synchronous>, transform_indices = @transform_19, window_bounds = array<i64: 128, 128>}, {transform_indices = @transform_20, window_bounds = array<i64: 1, 64, 128>}]} {
    %c0 = arith.constant 0 : index
    %c0_0 = arith.constant 0 : index
    %c0_1 = arith.constant 0 : index
    %0 = vector.load %arg2[%c0, %c0_0, %c0_1] : memref<1x64x3xf32, #tpu.memory_space<vmem>>, vector<1x64x3xf32>
    %1 = vector.shape_cast %0 : vector<1x64x3xf32> to vector<64x3xf32>
    %cst = arith.constant -5.000000e-01 : f32
    %2 = vector.broadcast %cst : f32 to vector<64x3xf32>
    %3 = arith.subf %1, %2 : vector<64x3xf32>
    %cst_2 = arith.constant 1.000000e+00 : f32
    %4 = vector.broadcast %cst_2 : f32 to vector<64x3xf32>
    %5 = arith.divf %3, %4 : vector<64x3xf32>
    %cst_3 = arith.constant 2.000000e+00 : f32
    %6 = vector.broadcast %cst_3 : f32 to vector<64x3xf32>
    %7 = arith.mulf %5, %6 : vector<64x3xf32>
    %cst_4 = arith.constant 1.000000e+00 : f32
    %8 = vector.broadcast %cst_4 : f32 to vector<64x3xf32>
    %9 = arith.subf %7, %8 : vector<64x3xf32>
    %10 = vector.extract_strided_slice %9 {offsets = [0, 0], sizes = [64, 1], strides = [1, 1]} : vector<64x3xf32> to vector<64x1xf32>
    %cst_5 = arith.constant 1.000000e+00 : f32
    %11 = vector.broadcast %cst_5 : f32 to vector<64x1xf32>
    %12 = arith.addf %10, %11 : vector<64x1xf32>
    %cst_6 = arith.constant 8.000000e+00 : f32
    %13 = vector.broadcast %cst_6 : f32 to vector<64x1xf32>
    %14 = arith.mulf %12, %13 : vector<64x1xf32>
    %cst_7 = arith.constant 1.000000e+00 : f32
    %15 = vector.broadcast %cst_7 : f32 to vector<64x1xf32>
    %16 = arith.subf %14, %15 : vector<64x1xf32>
    %cst_8 = arith.constant 5.000000e-01 : f32
    %17 = vector.broadcast %cst_8 : f32 to vector<64x1xf32>
    %18 = arith.mulf %16, %17 : vector<64x1xf32>
    %cst_9 = arith.constant 0.000000e+00 : f32
    %cst_10 = arith.constant 7.000000e+00 : f32
    %19 = vector.broadcast %cst_9 : f32 to vector<64x1xf32>
    %20 = arith.maximumf %19, %18 : vector<64x1xf32>
    %21 = vector.broadcast %cst_10 : f32 to vector<64x1xf32>
    %22 = arith.minimumf %21, %20 : vector<64x1xf32>
    %23 = vector.extract_strided_slice %9 {offsets = [0, 1], sizes = [64, 1], strides = [1, 1]} : vector<64x3xf32> to vector<64x1xf32>
    %cst_11 = arith.constant 1.000000e+00 : f32
    %24 = vector.broadcast %cst_11 : f32 to vector<64x1xf32>
    %25 = arith.addf %23, %24 : vector<64x1xf32>
    %cst_12 = arith.constant 8.000000e+00 : f32
    %26 = vector.broadcast %cst_12 : f32 to vector<64x1xf32>
    %27 = arith.mulf %25, %26 : vector<64x1xf32>
    %cst_13 = arith.constant 1.000000e+00 : f32
    %28 = vector.broadcast %cst_13 : f32 to vector<64x1xf32>
    %29 = arith.subf %27, %28 : vector<64x1xf32>
    %cst_14 = arith.constant 5.000000e-01 : f32
    %30 = vector.broadcast %cst_14 : f32 to vector<64x1xf32>
    %31 = arith.mulf %29, %30 : vector<64x1xf32>
    %cst_15 = arith.constant 0.000000e+00 : f32
    %cst_16 = arith.constant 7.000000e+00 : f32
    %32 = vector.broadcast %cst_15 : f32 to vector<64x1xf32>
    %33 = arith.maximumf %32, %31 : vector<64x1xf32>
    %34 = vector.broadcast %cst_16 : f32 to vector<64x1xf32>
    %35 = arith.minimumf %34, %33 : vector<64x1xf32>
    %36 = vector.extract_strided_slice %9 {offsets = [0, 2], sizes = [64, 1], strides = [1, 1]} : vector<64x3xf32> to vector<64x1xf32>
    %cst_17 = arith.constant 1.000000e+00 : f32
    %37 = vector.broadcast %cst_17 : f32 to vector<64x1xf32>
    %38 = arith.addf %36, %37 : vector<64x1xf32>
    %cst_18 = arith.constant 8.000000e+00 : f32
    %39 = vector.broadcast %cst_18 : f32 to vector<64x1xf32>
    %40 = arith.mulf %38, %39 : vector<64x1xf32>
    %cst_19 = arith.constant 1.000000e+00 : f32
    %41 = vector.broadcast %cst_19 : f32 to vector<64x1xf32>
    %42 = arith.subf %40, %41 : vector<64x1xf32>
    %cst_20 = arith.constant 5.000000e-01 : f32
    %43 = vector.broadcast %cst_20 : f32 to vector<64x1xf32>
    %44 = arith.mulf %42, %43 : vector<64x1xf32>
    %cst_21 = arith.constant 0.000000e+00 : f32
    %cst_22 = arith.constant 7.000000e+00 : f32
    %45 = vector.broadcast %cst_21 : f32 to vector<64x1xf32>
    %46 = arith.maximumf %45, %44 : vector<64x1xf32>
    %47 = vector.broadcast %cst_22 : f32 to vector<64x1xf32>
    %48 = arith.minimumf %47, %46 : vector<64x1xf32>
    %49 = math.floor %22 : vector<64x1xf32>
    %50 = arith.subf %22, %49 : vector<64x1xf32>
    %51 = arith.fptosi %49 : vector<64x1xf32> to vector<64x1xi32>
    %52 = math.floor %35 : vector<64x1xf32>
    %53 = arith.subf %35, %52 : vector<64x1xf32>
    %54 = arith.fptosi %52 : vector<64x1xf32> to vector<64x1xi32>
    %55 = math.floor %48 : vector<64x1xf32>
    %56 = arith.subf %48, %55 : vector<64x1xf32>
    %57 = arith.fptosi %55 : vector<64x1xf32> to vector<64x1xi32>
    %c0_23 = arith.constant 0 : index
    %c0_24 = arith.constant 0 : index
    %58 = vector.load %arg5[%c0_23, %c0_24] : memref<2x64xi32, #tpu.memory_space<vmem>>, vector<1x64xi32>
    %c1 = arith.constant 1 : index
    %c0_25 = arith.constant 0 : index
    %59 = vector.load %arg5[%c1, %c0_25] : memref<2x64xi32, #tpu.memory_space<vmem>>, vector<1x64xi32>
    %60 = vector.broadcast %58 : vector<1x64xi32> to vector<64x64xi32>
    %61 = vector.broadcast %54 : vector<64x1xi32> to vector<64x64xi32>
    %62 = arith.cmpi eq, %60, %61 : vector<64x64xi32>
    %cst_26 = arith.constant 1.000000e+00 : f32
    %63 = vector.broadcast %cst_26 : f32 to vector<64x1xf32>
    %64 = arith.subf %63, %53 : vector<64x1xf32>
    %cst_27 = arith.constant 0.000000e+00 : f32
    %65 = vector.shape_cast %64 : vector<64x1xf32> to vector<64x1xf32>
    %66 = vector.broadcast %65 : vector<64x1xf32> to vector<64x64xf32>
    %67 = vector.broadcast %cst_27 : f32 to vector<64x64xf32>
    %68 = arith.select %62, %66, %67 : vector<64x64xi1>, vector<64x64xf32>
    %c1_i32 = arith.constant 1 : i32
    %69 = vector.broadcast %c1_i32 : i32 to vector<64x1xi32>
    %70 = arith.addi %54, %69 : vector<64x1xi32>
    %71 = vector.broadcast %58 : vector<1x64xi32> to vector<64x64xi32>
    %72 = vector.broadcast %70 : vector<64x1xi32> to vector<64x64xi32>
    %73 = arith.cmpi eq, %71, %72 : vector<64x64xi32>
    %cst_28 = arith.constant 0.000000e+00 : f32
    %74 = vector.shape_cast %53 : vector<64x1xf32> to vector<64x1xf32>
    %75 = vector.broadcast %74 : vector<64x1xf32> to vector<64x64xf32>
    %76 = vector.broadcast %cst_28 : f32 to vector<64x64xf32>
    %77 = arith.select %73, %75, %76 : vector<64x64xi1>, vector<64x64xf32>
    %78 = arith.addf %68, %77 : vector<64x64xf32>
    %79 = vector.broadcast %59 : vector<1x64xi32> to vector<64x64xi32>
    %80 = vector.broadcast %57 : vector<64x1xi32> to vector<64x64xi32>
    %81 = arith.cmpi eq, %79, %80 : vector<64x64xi32>
    %cst_29 = arith.constant 1.000000e+00 : f32
    %82 = vector.broadcast %cst_29 : f32 to vector<64x1xf32>
    %83 = arith.subf %82, %56 : vector<64x1xf32>
    %cst_30 = arith.constant 0.000000e+00 : f32
    %84 = vector.shape_cast %83 : vector<64x1xf32> to vector<64x1xf32>
    %85 = vector.broadcast %84 : vector<64x1xf32> to vector<64x64xf32>
    %86 = vector.broadcast %cst_30 : f32 to vector<64x64xf32>
    %87 = arith.select %81, %85, %86 : vector<64x64xi1>, vector<64x64xf32>
    %c1_i32_31 = arith.constant 1 : i32
    %88 = vector.broadcast %c1_i32_31 : i32 to vector<64x1xi32>
    %89 = arith.addi %57, %88 : vector<64x1xi32>
    %90 = vector.broadcast %59 : vector<1x64xi32> to vector<64x64xi32>
    %91 = vector.broadcast %89 : vector<64x1xi32> to vector<64x64xi32>
    %92 = arith.cmpi eq, %90, %91 : vector<64x64xi32>
    %cst_32 = arith.constant 0.000000e+00 : f32
    %93 = vector.shape_cast %56 : vector<64x1xf32> to vector<64x1xf32>
    %94 = vector.broadcast %93 : vector<64x1xf32> to vector<64x64xf32>
    %95 = vector.broadcast %cst_32 : f32 to vector<64x64xf32>
    %96 = arith.select %92, %94, %95 : vector<64x64xi1>, vector<64x64xf32>
    %97 = arith.addf %87, %96 : vector<64x64xf32>
    %98 = arith.mulf %78, %97 : vector<64x64xf32>
    %99 = arith.truncf %98 : vector<64x64xf32> to vector<64x64xbf16>
    %c0_33 = arith.constant 0 : index
    %c0_34 = arith.constant 0 : index
    %c0_35 = arith.constant 0 : index
    %100 = vector.load %arg4[%c0_33, %c0_34, %c0_35] : memref<1x64x128xbf16, #tpu.memory_space<vmem>>, vector<1x64x128xbf16>
    %101 = vector.shape_cast %100 : vector<1x64x128xbf16> to vector<64x128xbf16>
    %cst_36 = arith.constant dense<0.000000e+00> : vector<64x128xf32>
    %102 = tpu.matmul %99, %101, %cst_36 {dimension_numbers = #tpu.dot_dimension_numbers<[1], [0], [0], [1], [0, 0, 1, 1], [], []>} : vector<64x64xbf16>, vector<64x128xbf16>, vector<64x128xf32> -> vector<64x128xf32>
    %c0_37 = arith.constant 0 : index
    %c0_38 = arith.constant 0 : index
    %103 = vector.load %arg6[%c0_37, %c0_38] : memref<1x128xi32, #tpu.memory_space<vmem>>, vector<1x128xi32>
    %104 = vector.broadcast %103 : vector<1x128xi32> to vector<64x128xi32>
    %105 = vector.broadcast %51 : vector<64x1xi32> to vector<64x128xi32>
    %106 = arith.cmpi eq, %104, %105 : vector<64x128xi32>
    %cst_39 = arith.constant 1.000000e+00 : f32
    %107 = vector.broadcast %cst_39 : f32 to vector<64x1xf32>
    %108 = arith.subf %107, %50 : vector<64x1xf32>
    %cst_40 = arith.constant 0.000000e+00 : f32
    %109 = vector.shape_cast %108 : vector<64x1xf32> to vector<64x1xf32>
    %110 = vector.broadcast %109 : vector<64x1xf32> to vector<64x128xf32>
    %111 = vector.broadcast %cst_40 : f32 to vector<64x128xf32>
    %112 = arith.select %106, %110, %111 : vector<64x128xi1>, vector<64x128xf32>
    %c1_i32_41 = arith.constant 1 : i32
    %113 = vector.broadcast %c1_i32_41 : i32 to vector<64x1xi32>
    %114 = arith.addi %51, %113 : vector<64x1xi32>
    %115 = vector.broadcast %103 : vector<1x128xi32> to vector<64x128xi32>
    %116 = vector.broadcast %114 : vector<64x1xi32> to vector<64x128xi32>
    %117 = arith.cmpi eq, %115, %116 : vector<64x128xi32>
    %cst_42 = arith.constant 0.000000e+00 : f32
    %118 = vector.shape_cast %50 : vector<64x1xf32> to vector<64x1xf32>
    %119 = vector.broadcast %118 : vector<64x1xf32> to vector<64x128xf32>
    %120 = vector.broadcast %cst_42 : f32 to vector<64x128xf32>
    %121 = arith.select %117, %119, %120 : vector<64x128xi1>, vector<64x128xf32>
    %122 = arith.addf %112, %121 : vector<64x128xf32>
    %123 = arith.mulf %102, %122 : vector<64x128xf32>
    %c0_43 = arith.constant 0 : index
    %c0_44 = arith.constant 0 : index
    %124 = vector.load %arg7[%c0_43, %c0_44] : memref<128x16xf32, #tpu.memory_space<vmem>>, vector<128x16xf32>
    %cst_45 = arith.constant dense<0.000000e+00> : vector<64x16xf32>
    %125 = tpu.matmul %123, %124, %cst_45 {dimension_numbers = #tpu.dot_dimension_numbers<[1], [0], [0], [1], [0, 0, 1, 1], [], []>} : vector<64x128xf32>, vector<128x16xf32>, vector<64x16xf32> -> vector<64x16xf32>
    %cst_46 = arith.constant 0.000000e+00 : f32
    %126 = vector.broadcast %cst_46 : f32 to vector<64x16xf32>
    %127 = arith.maximumf %125, %126 : vector<64x16xf32>
    %c0_47 = arith.constant 0 : index
    %c0_48 = arith.constant 0 : index
    %128 = vector.load %arg10[%c0_47, %c0_48] : memref<16x16xf32, #tpu.memory_space<vmem>>, vector<16x16xf32>
    %cst_49 = arith.constant dense<0.000000e+00> : vector<64x16xf32>
    %129 = tpu.matmul %127, %128, %cst_49 {dimension_numbers = #tpu.dot_dimension_numbers<[1], [0], [0], [1], [0, 0, 1, 1], [], []>} : vector<64x16xf32>, vector<16x16xf32>, vector<64x16xf32> -> vector<64x16xf32>
    %c0_50 = arith.constant 0 : index
    %c0_51 = arith.constant 0 : index
    %130 = vector.load %arg11[%c0_50, %c0_51] : memref<1x16xf32, #tpu.memory_space<vmem>>, vector<1x16xf32>
    %131 = vector.broadcast %130 : vector<1x16xf32> to vector<64x16xf32>
    %132 = arith.addf %129, %131 : vector<64x16xf32>
    %cst_52 = arith.constant 0.000000e+00 : f32
    %133 = vector.broadcast %cst_52 : f32 to vector<64x16xf32>
    %134 = arith.maximumf %132, %133 : vector<64x16xf32>
    %c0_53 = arith.constant 0 : index
    %c0_54 = arith.constant 0 : index
    %135 = vector.load %arg12[%c0_53, %c0_54] : memref<16x32xf32, #tpu.memory_space<vmem>>, vector<16x32xf32>
    %cst_55 = arith.constant dense<0.000000e+00> : vector<64x32xf32>
    %136 = tpu.matmul %134, %135, %cst_55 {dimension_numbers = #tpu.dot_dimension_numbers<[1], [0], [0], [1], [0, 0, 1, 1], [], []>} : vector<64x16xf32>, vector<16x32xf32>, vector<64x32xf32> -> vector<64x32xf32>
    %c0_56 = arith.constant 0 : index
    %c0_57 = arith.constant 0 : index
    %137 = vector.load %arg13[%c0_56, %c0_57] : memref<1x32xf32, #tpu.memory_space<vmem>>, vector<1x32xf32>
    %138 = vector.broadcast %137 : vector<1x32xf32> to vector<64x32xf32>
    %139 = arith.addf %136, %138 : vector<64x32xf32>
    %c0_58 = arith.constant 0 : index
    %c0_59 = arith.constant 0 : index
    %140 = vector.load %arg14[%c0_58, %c0_59] : memref<16x32xf32, #tpu.memory_space<vmem>>, vector<16x32xf32>
    %cst_60 = arith.constant dense<0.000000e+00> : vector<64x32xf32>
    %141 = tpu.matmul %125, %140, %cst_60 {dimension_numbers = #tpu.dot_dimension_numbers<[1], [0], [0], [1], [0, 0, 1, 1], [], []>} : vector<64x16xf32>, vector<16x32xf32>, vector<64x32xf32> -> vector<64x32xf32>
    %142 = arith.addf %141, %139 : vector<64x32xf32>
    %cst_61 = arith.constant 5.000000e-02 : f32
    %143 = vector.broadcast %cst_61 : f32 to vector<64x3xf32>
    %144 = arith.divf %1, %143 : vector<64x3xf32>
    %145 = math.floor %144 : vector<64x3xf32>
    %146 = arith.subf %144, %145 : vector<64x3xf32>
    %147 = arith.fptosi %145 : vector<64x3xf32> to vector<64x3xi32>
    %148 = vector.extract_strided_slice %147 {offsets = [0, 0], sizes = [64, 1], strides = [1, 1]} : vector<64x3xi32> to vector<64x1xi32>
    %149 = vector.extract_strided_slice %147 {offsets = [0, 1], sizes = [64, 1], strides = [1, 1]} : vector<64x3xi32> to vector<64x1xi32>
    %150 = vector.extract_strided_slice %147 {offsets = [0, 2], sizes = [64, 1], strides = [1, 1]} : vector<64x3xi32> to vector<64x1xi32>
    %c-512_i32 = arith.constant -512 : i32
    %151 = vector.broadcast %c-512_i32 : i32 to vector<64x1xi32>
    %152 = arith.cmpi sge, %148, %151 : vector<64x1xi32>
    %c510_i32 = arith.constant 510 : i32
    %153 = vector.broadcast %c510_i32 : i32 to vector<64x1xi32>
    %154 = arith.cmpi sle, %148, %153 : vector<64x1xi32>
    %155 = arith.andi %152, %154 : vector<64x1xi1>
    %c-512_i32_62 = arith.constant -512 : i32
    %156 = vector.broadcast %c-512_i32_62 : i32 to vector<64x1xi32>
    %157 = arith.cmpi sge, %149, %156 : vector<64x1xi32>
    %158 = arith.andi %155, %157 : vector<64x1xi1>
    %c510_i32_63 = arith.constant 510 : i32
    %159 = vector.broadcast %c510_i32_63 : i32 to vector<64x1xi32>
    %160 = arith.cmpi sle, %149, %159 : vector<64x1xi32>
    %161 = arith.andi %158, %160 : vector<64x1xi1>
    %c-512_i32_64 = arith.constant -512 : i32
    %162 = vector.broadcast %c-512_i32_64 : i32 to vector<64x1xi32>
    %163 = arith.cmpi sge, %150, %162 : vector<64x1xi32>
    %164 = arith.andi %161, %163 : vector<64x1xi1>
    %c510_i32_65 = arith.constant 510 : i32
    %165 = vector.broadcast %c510_i32_65 : i32 to vector<64x1xi32>
    %166 = arith.cmpi sle, %150, %165 : vector<64x1xi32>
    %167 = arith.andi %164, %166 : vector<64x1xi1>
    %c512_i32 = arith.constant 512 : i32
    %168 = vector.broadcast %c512_i32 : i32 to vector<64x1xi32>
    %169 = arith.addi %148, %168 : vector<64x1xi32>
    %c1024_i32 = arith.constant 1024 : i32
    %170 = vector.broadcast %c1024_i32 : i32 to vector<64x1xi32>
    %171 = arith.muli %169, %170 : vector<64x1xi32>
    %c512_i32_66 = arith.constant 512 : i32
    %172 = vector.broadcast %c512_i32_66 : i32 to vector<64x1xi32>
    %173 = arith.addi %149, %172 : vector<64x1xi32>
    %174 = arith.addi %171, %173 : vector<64x1xi32>
    %c1024_i32_67 = arith.constant 1024 : i32
    %175 = vector.broadcast %c1024_i32_67 : i32 to vector<64x1xi32>
    %176 = arith.muli %174, %175 : vector<64x1xi32>
    %c512_i32_68 = arith.constant 512 : i32
    %177 = vector.broadcast %c512_i32_68 : i32 to vector<64x1xi32>
    %178 = arith.addi %150, %177 : vector<64x1xi32>
    %179 = arith.addi %176, %178 : vector<64x1xi32>
    %c-1073741824_i32 = arith.constant -1073741824 : i32
    %180 = vector.broadcast %c-1073741824_i32 : i32 to vector<64x1xi32>
    %181 = arith.select %167, %179, %180 : vector<64x1xi1>, vector<64x1xi32>
    %182 = vector.extract_strided_slice %146 {offsets = [0, 0], sizes = [64, 1], strides = [1, 1]} : vector<64x3xf32> to vector<64x1xf32>
    %183 = vector.extract_strided_slice %146 {offsets = [0, 1], sizes = [64, 1], strides = [1, 1]} : vector<64x3xf32> to vector<64x1xf32>
    %184 = vector.extract_strided_slice %146 {offsets = [0, 2], sizes = [64, 1], strides = [1, 1]} : vector<64x3xf32> to vector<64x1xf32>
    %c0_69 = arith.constant 0 : index
    %c0_70 = arith.constant 0 : index
    %c0_71 = arith.constant 0 : index
    %185 = vector.load %arg8[%c0_69, %c0_70, %c0_71] : memref<1x1x128xi32, #tpu.memory_space<vmem>>, vector<1x1x128xi32>
    %186 = vector.shape_cast %185 : vector<1x1x128xi32> to vector<1x128xi32>
    %cst_72 = arith.constant 0.000000e+00 : f32
    %187 = vector.broadcast %cst_72 : f32 to vector<64x128xf32>
    %cst_73 = arith.constant 1.000000e+00 : f32
    %188 = vector.broadcast %cst_73 : f32 to vector<64x1xf32>
    %189 = arith.subf %188, %182 : vector<64x1xf32>
    %cst_74 = arith.constant 1.000000e+00 : f32
    %190 = vector.broadcast %cst_74 : f32 to vector<64x1xf32>
    %191 = arith.subf %190, %183 : vector<64x1xf32>
    %192 = arith.mulf %189, %191 : vector<64x1xf32>
    %cst_75 = arith.constant 1.000000e+00 : f32
    %193 = vector.broadcast %cst_75 : f32 to vector<64x1xf32>
    %194 = arith.subf %193, %184 : vector<64x1xf32>
    %195 = arith.mulf %192, %194 : vector<64x1xf32>
    %c0_i32 = arith.constant 0 : i32
    %196 = vector.broadcast %c0_i32 : i32 to vector<64x1xi32>
    %197 = arith.addi %181, %196 : vector<64x1xi32>
    %198 = vector.broadcast %197 : vector<64x1xi32> to vector<64x128xi32>
    %199 = vector.broadcast %186 : vector<1x128xi32> to vector<64x128xi32>
    %200 = arith.cmpi eq, %198, %199 : vector<64x128xi32>
    %201 = vector.broadcast %195 : vector<64x1xf32> to vector<64x128xf32>
    %202 = arith.addf %187, %201 : vector<64x128xf32>
    %203 = arith.select %200, %202, %187 : vector<64x128xi1>, vector<64x128xf32>
    %204 = arith.mulf %192, %184 : vector<64x1xf32>
    %c1_i32_76 = arith.constant 1 : i32
    %205 = vector.broadcast %c1_i32_76 : i32 to vector<64x1xi32>
    %206 = arith.addi %181, %205 : vector<64x1xi32>
    %207 = vector.broadcast %206 : vector<64x1xi32> to vector<64x128xi32>
    %208 = vector.broadcast %186 : vector<1x128xi32> to vector<64x128xi32>
    %209 = arith.cmpi eq, %207, %208 : vector<64x128xi32>
    %210 = vector.broadcast %204 : vector<64x1xf32> to vector<64x128xf32>
    %211 = arith.addf %203, %210 : vector<64x128xf32>
    %212 = arith.select %209, %211, %203 : vector<64x128xi1>, vector<64x128xf32>
    %213 = arith.mulf %189, %183 : vector<64x1xf32>
    %cst_77 = arith.constant 1.000000e+00 : f32
    %214 = vector.broadcast %cst_77 : f32 to vector<64x1xf32>
    %215 = arith.subf %214, %184 : vector<64x1xf32>
    %216 = arith.mulf %213, %215 : vector<64x1xf32>
    %c1024_i32_78 = arith.constant 1024 : i32
    %217 = vector.broadcast %c1024_i32_78 : i32 to vector<64x1xi32>
    %218 = arith.addi %181, %217 : vector<64x1xi32>
    %219 = vector.broadcast %218 : vector<64x1xi32> to vector<64x128xi32>
    %220 = vector.broadcast %186 : vector<1x128xi32> to vector<64x128xi32>
    %221 = arith.cmpi eq, %219, %220 : vector<64x128xi32>
    %222 = vector.broadcast %216 : vector<64x1xf32> to vector<64x128xf32>
    %223 = arith.addf %212, %222 : vector<64x128xf32>
    %224 = arith.select %221, %223, %212 : vector<64x128xi1>, vector<64x128xf32>
    %225 = arith.mulf %213, %184 : vector<64x1xf32>
    %c1025_i32 = arith.constant 1025 : i32
    %226 = vector.broadcast %c1025_i32 : i32 to vector<64x1xi32>
    %227 = arith.addi %181, %226 : vector<64x1xi32>
    %228 = vector.broadcast %227 : vector<64x1xi32> to vector<64x128xi32>
    %229 = vector.broadcast %186 : vector<1x128xi32> to vector<64x128xi32>
    %230 = arith.cmpi eq, %228, %229 : vector<64x128xi32>
    %231 = vector.broadcast %225 : vector<64x1xf32> to vector<64x128xf32>
    %232 = arith.addf %224, %231 : vector<64x128xf32>
    %233 = arith.select %230, %232, %224 : vector<64x128xi1>, vector<64x128xf32>
    %cst_79 = arith.constant 1.000000e+00 : f32
    %234 = vector.broadcast %cst_79 : f32 to vector<64x1xf32>
    %235 = arith.subf %234, %183 : vector<64x1xf32>
    %236 = arith.mulf %182, %235 : vector<64x1xf32>
    %cst_80 = arith.constant 1.000000e+00 : f32
    %237 = vector.broadcast %cst_80 : f32 to vector<64x1xf32>
    %238 = arith.subf %237, %184 : vector<64x1xf32>
    %239 = arith.mulf %236, %238 : vector<64x1xf32>
    %c1048576_i32 = arith.constant 1048576 : i32
    %240 = vector.broadcast %c1048576_i32 : i32 to vector<64x1xi32>
    %241 = arith.addi %181, %240 : vector<64x1xi32>
    %242 = vector.broadcast %241 : vector<64x1xi32> to vector<64x128xi32>
    %243 = vector.broadcast %186 : vector<1x128xi32> to vector<64x128xi32>
    %244 = arith.cmpi eq, %242, %243 : vector<64x128xi32>
    %245 = vector.broadcast %239 : vector<64x1xf32> to vector<64x128xf32>
    %246 = arith.addf %233, %245 : vector<64x128xf32>
    %247 = arith.select %244, %246, %233 : vector<64x128xi1>, vector<64x128xf32>
    %248 = arith.mulf %236, %184 : vector<64x1xf32>
    %c1048577_i32 = arith.constant 1048577 : i32
    %249 = vector.broadcast %c1048577_i32 : i32 to vector<64x1xi32>
    %250 = arith.addi %181, %249 : vector<64x1xi32>
    %251 = vector.broadcast %250 : vector<64x1xi32> to vector<64x128xi32>
    %252 = vector.broadcast %186 : vector<1x128xi32> to vector<64x128xi32>
    %253 = arith.cmpi eq, %251, %252 : vector<64x128xi32>
    %254 = vector.broadcast %248 : vector<64x1xf32> to vector<64x128xf32>
    %255 = arith.addf %247, %254 : vector<64x128xf32>
    %256 = arith.select %253, %255, %247 : vector<64x128xi1>, vector<64x128xf32>
    %257 = arith.mulf %182, %183 : vector<64x1xf32>
    %cst_81 = arith.constant 1.000000e+00 : f32
    %258 = vector.broadcast %cst_81 : f32 to vector<64x1xf32>
    %259 = arith.subf %258, %184 : vector<64x1xf32>
    %260 = arith.mulf %257, %259 : vector<64x1xf32>
    %c1049600_i32 = arith.constant 1049600 : i32
    %261 = vector.broadcast %c1049600_i32 : i32 to vector<64x1xi32>
    %262 = arith.addi %181, %261 : vector<64x1xi32>
    %263 = vector.broadcast %262 : vector<64x1xi32> to vector<64x128xi32>
    %264 = vector.broadcast %186 : vector<1x128xi32> to vector<64x128xi32>
    %265 = arith.cmpi eq, %263, %264 : vector<64x128xi32>
    %266 = vector.broadcast %260 : vector<64x1xf32> to vector<64x128xf32>
    %267 = arith.addf %256, %266 : vector<64x128xf32>
    %268 = arith.select %265, %267, %256 : vector<64x128xi1>, vector<64x128xf32>
    %269 = arith.mulf %257, %184 : vector<64x1xf32>
    %c1049601_i32 = arith.constant 1049601 : i32
    %270 = vector.broadcast %c1049601_i32 : i32 to vector<64x1xi32>
    %271 = arith.addi %181, %270 : vector<64x1xi32>
    %272 = vector.broadcast %271 : vector<64x1xi32> to vector<64x128xi32>
    %273 = vector.broadcast %186 : vector<1x128xi32> to vector<64x128xi32>
    %274 = arith.cmpi eq, %272, %273 : vector<64x128xi32>
    %275 = vector.broadcast %269 : vector<64x1xf32> to vector<64x128xf32>
    %276 = arith.addf %268, %275 : vector<64x128xf32>
    %277 = arith.select %274, %276, %268 : vector<64x128xi1>, vector<64x128xf32>
    %278 = arith.truncf %277 : vector<64x128xf32> to vector<64x128xbf16>
    %c0_82 = arith.constant 0 : index
    %c0_83 = arith.constant 0 : index
    %c0_84 = arith.constant 0 : index
    %279 = vector.load %arg9[%c0_82, %c0_83, %c0_84] : memref<1x128x128xbf16, #tpu.memory_space<vmem>>, vector<1x128x128xbf16>
    %280 = vector.shape_cast %279 : vector<1x128x128xbf16> to vector<128x128xbf16>
    %cst_85 = arith.constant dense<0.000000e+00> : vector<64x128xf32>
    %281 = tpu.matmul %278, %280, %cst_85 {dimension_numbers = #tpu.dot_dimension_numbers<[1], [0], [0], [1], [0, 0, 1, 1], [], []>} : vector<64x128xbf16>, vector<128x128xbf16>, vector<64x128xf32> -> vector<64x128xf32>
    %cst_86 = arith.constant 0.000000e+00 : f32
    %282 = vector.broadcast %cst_86 : f32 to vector<64x32xf32>
    %283 = arith.maximumf %142, %282 : vector<64x32xf32>
    %c0_87 = arith.constant 0 : index
    %c0_88 = arith.constant 0 : index
    %284 = vector.load %arg15[%c0_87, %c0_88] : memref<32x29xf32, #tpu.memory_space<vmem>>, vector<32x29xf32>
    %cst_89 = arith.constant dense<0.000000e+00> : vector<64x29xf32>
    %285 = tpu.matmul %283, %284, %cst_89 {dimension_numbers = #tpu.dot_dimension_numbers<[1], [0], [0], [1], [0, 0, 1, 1], [], []>} : vector<64x32xf32>, vector<32x29xf32>, vector<64x29xf32> -> vector<64x29xf32>
    %cst_90 = arith.constant 0.000000e+00 : f32
    %286 = vector.broadcast %cst_90 : f32 to vector<64x128xf32>
    %287 = arith.maximumf %281, %286 : vector<64x128xf32>
    %c0_91 = arith.constant 0 : index
    %c0_92 = arith.constant 0 : index
    %288 = vector.load %arg16[%c0_91, %c0_92] : memref<128x29xf32, #tpu.memory_space<vmem>>, vector<128x29xf32>
    %cst_93 = arith.constant dense<0.000000e+00> : vector<64x29xf32>
    %289 = tpu.matmul %287, %288, %cst_93 {dimension_numbers = #tpu.dot_dimension_numbers<[1], [0], [0], [1], [0, 0, 1, 1], [], []>} : vector<64x128xf32>, vector<128x29xf32>, vector<64x29xf32> -> vector<64x29xf32>
    %290 = arith.addf %285, %289 : vector<64x29xf32>
    %c0_94 = arith.constant 0 : index
    %c0_95 = arith.constant 0 : index
    %291 = vector.load %arg17[%c0_94, %c0_95] : memref<1x29xf32, #tpu.memory_space<vmem>>, vector<1x29xf32>
    %292 = vector.broadcast %291 : vector<1x29xf32> to vector<64x29xf32>
    %293 = arith.addf %290, %292 : vector<64x29xf32>
    %cst_96 = arith.constant 0.000000e+00 : f32
    %294 = vector.broadcast %cst_96 : f32 to vector<64x29xf32>
    %295 = arith.maximumf %293, %294 : vector<64x29xf32>
    %c0_97 = arith.constant 0 : index
    %c0_98 = arith.constant 0 : index
    %296 = vector.load %arg18[%c0_97, %c0_98] : memref<29x128xf32, #tpu.memory_space<vmem>>, vector<29x128xf32>
    %cst_99 = arith.constant dense<0.000000e+00> : vector<64x128xf32>
    %297 = tpu.matmul %295, %296, %cst_99 {dimension_numbers = #tpu.dot_dimension_numbers<[1], [0], [0], [1], [0, 0, 1, 1], [], []>} : vector<64x29xf32>, vector<29x128xf32>, vector<64x128xf32> -> vector<64x128xf32>
    %c0_100 = arith.constant 0 : index
    %c0_101 = arith.constant 0 : index
    %298 = vector.load %arg19[%c0_100, %c0_101] : memref<1x128xf32, #tpu.memory_space<vmem>>, vector<1x128xf32>
    %299 = vector.broadcast %298 : vector<1x128xf32> to vector<64x128xf32>
    %300 = arith.addf %297, %299 : vector<64x128xf32>
    %c0_102 = arith.constant 0 : index
    %c0_103 = arith.constant 0 : index
    %301 = vector.load %arg20[%c0_102, %c0_103] : memref<32x128xf32, #tpu.memory_space<vmem>>, vector<32x128xf32>
    %cst_104 = arith.constant dense<0.000000e+00> : vector<64x128xf32>
    %302 = tpu.matmul %142, %301, %cst_104 {dimension_numbers = #tpu.dot_dimension_numbers<[1], [0], [0], [1], [0, 0, 1, 1], [], []>} : vector<64x32xf32>, vector<32x128xf32>, vector<64x128xf32> -> vector<64x128xf32>
    %c0_105 = arith.constant 0 : index
    %c0_106 = arith.constant 0 : index
    %303 = vector.load %arg21[%c0_105, %c0_106] : memref<128x128xf32, #tpu.memory_space<vmem>>, vector<128x128xf32>
    %cst_107 = arith.constant dense<0.000000e+00> : vector<64x128xf32>
    %304 = tpu.matmul %281, %303, %cst_107 {dimension_numbers = #tpu.dot_dimension_numbers<[1], [0], [0], [1], [0, 0, 1, 1], [], []>} : vector<64x128xf32>, vector<128x128xf32>, vector<64x128xf32> -> vector<64x128xf32>
    %305 = arith.addf %302, %304 : vector<64x128xf32>
    %c0_108 = arith.constant 0 : index
    %c0_109 = arith.constant 0 : index
    %c0_110 = arith.constant 0 : index
    %306 = vector.load %arg3[%c0_108, %c0_109, %c0_110] : memref<1x64x128xf32, #tpu.memory_space<vmem>>, vector<1x64x128xf32>
    %307 = vector.shape_cast %306 : vector<1x64x128xf32> to vector<64x128xf32>
    %308 = arith.addf %307, %305 : vector<64x128xf32>
    %309 = arith.addf %308, %300 : vector<64x128xf32>
    %c0_111 = arith.constant 0 : index
    %c0_112 = arith.constant 0 : index
    %c0_113 = arith.constant 0 : index
    %310 = vector.load %arg22[%c0_111, %c0_112, %c0_113] : memref<1x64x128xf32, #tpu.memory_space<vmem>>, vector<1x64x128xf32>
    %311 = vector.shape_cast %310 : vector<1x64x128xf32> to vector<64x128xf32>
    %312 = vector.shape_cast %309 : vector<64x128xf32> to vector<1x64x128xf32>
    tpu.vector_store %arg22[%c0_111, %c0_112, %c0_113], %312 {strides = array<i32>} : memref<1x64x128xf32, #tpu.memory_space<vmem>>, vector<1x64x128xf32>,
    return
  }
  func.func @transform_0(%arg0: i32, %arg1: i32) -> (i32, i32, i32) {
    %c0_i32 = arith.constant 0 : i32
    %c0_i32_0 = arith.constant 0 : i32
    return %arg0, %arg1, %c0_i32 : i32, i32, i32
  }
  func.func @transform_1(%arg0: i32, %arg1: i32) -> (i32, i32, i32) {
    %c0_i32 = arith.constant 0 : i32
    %c0_i32_0 = arith.constant 0 : i32
    return %arg0, %arg1, %c0_i32 : i32, i32, i32
  }
  func.func @transform_2(%arg0: i32, %arg1: i32) -> (i32, i32, i32) {
    %c0_i32 = arith.constant 0 : i32
    %c0_i32_0 = arith.constant 0 : i32
    %c0_i32_1 = arith.constant 0 : i32
    return %arg0, %c0_i32, %c0_i32_0 : i32, i32, i32
  }
  func.func @transform_3(%arg0: i32, %arg1: i32) -> (i32, i32) {
    %c0_i32 = arith.constant 0 : i32
    %c0_i32_0 = arith.constant 0 : i32
    %c0_i32_1 = arith.constant 0 : i32
    return %c0_i32, %c0_i32_0 : i32, i32
  }
  func.func @transform_4(%arg0: i32, %arg1: i32) -> (i32, i32) {
    %c0_i32 = arith.constant 0 : i32
    %c0_i32_0 = arith.constant 0 : i32
    %c0_i32_1 = arith.constant 0 : i32
    return %c0_i32, %c0_i32_0 : i32, i32
  }
  func.func @transform_5(%arg0: i32, %arg1: i32) -> (i32, i32) {
    %c0_i32 = arith.constant 0 : i32
    %c0_i32_0 = arith.constant 0 : i32
    %c0_i32_1 = arith.constant 0 : i32
    return %c0_i32, %c0_i32_0 : i32, i32
  }
  func.func @transform_6(%arg0: i32, %arg1: i32) -> (i32, i32, i32) {
    %c0_i32 = arith.constant 0 : i32
    %c0_i32_0 = arith.constant 0 : i32
    %c0_i32_1 = arith.constant 0 : i32
    return %arg0, %c0_i32, %c0_i32_0 : i32, i32, i32
  }
  func.func @transform_7(%arg0: i32, %arg1: i32) -> (i32, i32, i32) {
    %c0_i32 = arith.constant 0 : i32
    %c0_i32_0 = arith.constant 0 : i32
    %c0_i32_1 = arith.constant 0 : i32
    return %arg0, %c0_i32, %c0_i32_0 : i32, i32, i32
  }
  func.func @transform_8(%arg0: i32, %arg1: i32) -> (i32, i32) {
    %c0_i32 = arith.constant 0 : i32
    %c0_i32_0 = arith.constant 0 : i32
    %c0_i32_1 = arith.constant 0 : i32
    return %c0_i32, %c0_i32_0 : i32, i32
  }
  func.func @transform_9(%arg0: i32, %arg1: i32) -> (i32, i32) {
    %c0_i32 = arith.constant 0 : i32
    %c0_i32_0 = arith.constant 0 : i32
    %c0_i32_1 = arith.constant 0 : i32
    return %c0_i32, %c0_i32_0 : i32, i32
  }
  func.func @transform_10(%arg0: i32, %arg1: i32) -> (i32, i32) {
    %c0_i32 = arith.constant 0 : i32
    %c0_i32_0 = arith.constant 0 : i32
    %c0_i32_1 = arith.constant 0 : i32
    return %c0_i32, %c0_i32_0 : i32, i32
  }
  func.func @transform_11(%arg0: i32, %arg1: i32) -> (i32, i32) {
    %c0_i32 = arith.constant 0 : i32
    %c0_i32_0 = arith.constant 0 : i32
    %c0_i32_1 = arith.constant 0 : i32
    return %c0_i32, %c0_i32_0 : i32, i32
  }
  func.func @transform_12(%arg0: i32, %arg1: i32) -> (i32, i32) {
    %c0_i32 = arith.constant 0 : i32
    %c0_i32_0 = arith.constant 0 : i32
    %c0_i32_1 = arith.constant 0 : i32
    return %c0_i32, %c0_i32_0 : i32, i32
  }
  func.func @transform_13(%arg0: i32, %arg1: i32) -> (i32, i32) {
    %c0_i32 = arith.constant 0 : i32
    %c0_i32_0 = arith.constant 0 : i32
    %c0_i32_1 = arith.constant 0 : i32
    return %c0_i32, %c0_i32_0 : i32, i32
  }
  func.func @transform_14(%arg0: i32, %arg1: i32) -> (i32, i32) {
    %c0_i32 = arith.constant 0 : i32
    %c0_i32_0 = arith.constant 0 : i32
    %c0_i32_1 = arith.constant 0 : i32
    return %c0_i32, %c0_i32_0 : i32, i32
  }
  func.func @transform_15(%arg0: i32, %arg1: i32) -> (i32, i32) {
    %c0_i32 = arith.constant 0 : i32
    %c0_i32_0 = arith.constant 0 : i32
    %c0_i32_1 = arith.constant 0 : i32
    return %c0_i32, %c0_i32_0 : i32, i32
  }
  func.func @transform_16(%arg0: i32, %arg1: i32) -> (i32, i32) {
    %c0_i32 = arith.constant 0 : i32
    %c0_i32_0 = arith.constant 0 : i32
    %c0_i32_1 = arith.constant 0 : i32
    return %c0_i32, %c0_i32_0 : i32, i32
  }
  func.func @transform_17(%arg0: i32, %arg1: i32) -> (i32, i32) {
    %c0_i32 = arith.constant 0 : i32
    %c0_i32_0 = arith.constant 0 : i32
    %c0_i32_1 = arith.constant 0 : i32
    return %c0_i32, %c0_i32_0 : i32, i32
  }
  func.func @transform_18(%arg0: i32, %arg1: i32) -> (i32, i32) {
    %c0_i32 = arith.constant 0 : i32
    %c0_i32_0 = arith.constant 0 : i32
    %c0_i32_1 = arith.constant 0 : i32
    return %c0_i32, %c0_i32_0 : i32, i32
  }
  func.func @transform_19(%arg0: i32, %arg1: i32) -> (i32, i32) {
    %c0_i32 = arith.constant 0 : i32
    %c0_i32_0 = arith.constant 0 : i32
    %c0_i32_1 = arith.constant 0 : i32
    return %c0_i32, %c0_i32_0 : i32, i32
  }
  func.func @transform_20(%arg0: i32, %arg1: i32) -> (i32, i32, i32) {
    %c0_i32 = arith.constant 0 : i32
    %c0_i32_0 = arith.constant 0 : i32
    return %arg0, %arg1, %c0_i32 : i32, i32, i32
  }
}

</mosaic_0001>

<bundles_post_ra>
// kernel: feature_interpolator_forward.2
= control target key start
LH: loop header
LB: loop body
LE: loop exit
PB: predicated region body
PF: predicated region fallthrough
CT: control target
= control target key end

     0   :  { %vm161_vm0 = vcmask 195584   ;;  %s4000_s1 = inlined_call_operand.vmem [shape: f32[24,24], index: 1, kind: input, shape index: {}]   ;;  %s4001_s0 = inlined_call_operand.vmem [shape: f32[512,24], index: 0, kind: input, shape index: {}]   ;;  %s4002_s3 = inlined_call_operand.vmem [shape: f32[24,128], index: 3, kind: input, shape index: {}]   ;;  %s4003_s5 = inlined_call_operand.vmem [shape: f32[24,128], index: 5, kind: input, shape index: {}]   ;;  %s4004_s2 = inlined_call_operand.vmem [shape: f32[1,24], index: 2, kind: input, shape index: {}]   ;;  %s4005_s4 = inlined_call_operand.vmem [shape: f32[1,128], index: 4, kind: input, shape index: {}]   ;;  %s4006_s6 = inlined_call_operand.vmem [shape: f32[512,128], index: 6, kind: output, shape index: {}]  }
   0x1   :  { %v151_v0 = vld [vmem:[%s4000_s1] sm:$0xff]  ;;  %v152_v1 = vld [vmem:[%s4000_s1 + $0x8] sm:$0xff]  ;;  %v153_v4 = vld [vmem:[%s4000_s1 + $0x10] sm:$0xff] }
   0x2   :  { %v2739_v2 = vpack.c.bf16 %v152_v1, %v151_v0  ;;  %v2927_v3 = vld [vmem:[%s4001_s0] sm:$0xff]  ;;  %v2936_v6 = vld [vmem:[%s4001_s0 + $0x8] sm:$0xff]  ;;  %v2941_v7 = vld [vmem:[%s4001_s0 + $0x10] sm:$0xff] }
   0x3   :  { %v87_v5 = vmax.f32 %v2927_v3, 0.0  ;;  %v88_v8 = vmax.f32 %v2936_v6, 0.0  ;;  %v89_v9 = vmax.f32 %v2941_v7, 0.0  ;;  %v2949_v10 = vld [vmem:[%s4001_s0 + $0x18] sm:$0xff]  ;;  %v2954_v11 = vld [vmem:[%s4001_s0 + $0x20] sm:$0xff]  ;;  %v2963_v14 = vld [vmem:[%s4001_s0 + $0x28] sm:$0xff] }
   0x4   :  { %2740 = vmatprep.subr.bf16.mxu0 %v2739_v2  ;;  %v90_v12 = vmax.f32 %v2949_v10, 0.0  ;;  %v91_v13 = vmax.f32 %v2954_v11, 0.0  ;;  %v2968_v15 = vld [vmem:[%s4001_s0 + $0x30] sm:$0xff]  ;;  %v92_v16 = vmax.f32 %v2963_v14, 0.0  ;;  %v2977_v18 = vld [vmem:[%s4001_s0 + $0x38] sm:$0xff]  ;;  %v2982_v19 = vld [vmem:[%s4001_s0 + $0x40] sm:$0xff] }
   0x5   :  { %2742 = vmatpush3.bf16.msra.mxu0 %v2739_v2  ;;  %2439 = vmatprep.mubr.msk.f32.mxu0 %vm161_vm0, %v87_v5  ;;  %v93_v17 = vmax.f32 %v2968_v15, 0.0  ;;  %v94_v20 = vmax.f32 %v2977_v18, 0.0  ;;  %v95_v21 = vmax.f32 %v2982_v19, 0.0  ;;  %v2991_v22 = vld [vmem:[%s4001_s0 + $0x48] sm:$0xff]  ;;  %v2996_v23 = vld [vmem:[%s4001_s0 + $0x50] sm:$0xff]  ;;  %v3005_v26 = vld [vmem:[%s4001_s0 + $0x58] sm:$0xff] }
   0x6   :  { %2437 = vmatprep.subr.mxu0 %v153_v4  ;;  %v96_v24 = vmax.f32 %v2991_v22, 0.0  ;;  %v97_v25 = vmax.f32 %v2996_v23, 0.0  ;;  %v3010_v27 = vld [vmem:[%s4001_s0 + $0x60] sm:$0xff]  ;;  %v98_v28 = vmax.f32 %v3005_v26, 0.0  ;;  %v3019_v30 = vld [vmem:[%s4001_s0 + $0x68] sm:$0xff]  ;;  %v3024_v31 = vld [vmem:[%s4001_s0 + $0x70] sm:$0xff] }
   0x7   :  { %v99_v29 = vmax.f32 %v3010_v27, 0.0  ;;  %v100_v32 = vmax.f32 %v3019_v30, 0.0  ;;  %v101_v33 = vmax.f32 %v3024_v31, 0.0  ;;  %v3033_v34 = vld [vmem:[%s4001_s0 + $0x78] sm:$0xff]  ;;  %v3038_v35 = vld [vmem:[%s4001_s0 + $0x80] sm:$0xff]  ;;  %v3047_v38 = vld [vmem:[%s4001_s0 + $0x88] sm:$0xff] }
   0x8   :  { %v102_v36 = vmax.f32 %v3033_v34, 0.0  ;;  %v103_v37 = vmax.f32 %v3038_v35, 0.0  ;;  %v3052_v39 = vld [vmem:[%s4001_s0 + $0x90] sm:$0xff]  ;;  %v104_v40 = vmax.f32 %v3047_v38, 0.0  ;;  %v3061_v42 = vld [vmem:[%s4001_s0 + $0x98] sm:$0xff]  ;;  %v3066_v43 = vld [vmem:[%s4001_s0 + $0xa0] sm:$0xff] }
   0x9   :  { %2438 = vmatpush3.msra.mxu0 %v153_v4  ;;  %v105_v41 = vmax.f32 %v3052_v39, 0.0  ;;  %v106_v44 = vmax.f32 %v3061_v42, 0.0  ;;  %v107_v45 = vmax.f32 %v3066_v43, 0.0  ;;  %v3075_v46 = vld [vmem:[%s4001_s0 + $0xa8] sm:$0xff]  ;;  %v3080_v47 = vld [vmem:[%s4001_s0 + $0xb0] sm:$0xff]  ;;  %v3089_v50 = vld [vmem:[%s4001_s0 + $0xb8] sm:$0xff] }
   0xa   :  { %2440 = vmatmul.mubr.msk.f32.vlgmr.msra.gmra.mrb[0].mxu0 %vm161_vm0, %v88_v8  ;;  %v108_v48 = vmax.f32 %v3075_v46, 0.0  ;;  %v109_v49 = vmax.f32 %v3080_v47, 0.0  ;;  %v3094_v51 = vld [vmem:[%s4001_s0 + $0xc0] sm:$0xff]  ;;  %v110_v52 = vmax.f32 %v3089_v50, 0.0  ;;  %v3103_v54 = vld [vmem:[%s4001_s0 + $0xc8] sm:$0xff]  ;;  %v3108_v55 = vld [vmem:[%s4001_s0 + $0xd0] sm:$0xff] }
   0xb   :  { %2442 = vmatprep.mubr.msk.f32.mxu0 %vm161_vm0, %v89_v9  ;;  %v111_v53 = vmax.f32 %v3094_v51, 0.0  ;;  %v112_v56 = vmax.f32 %v3103_v54, 0.0  ;;  %v113_v57 = vmax.f32 %v3108_v55, 0.0  ;;  %v3117_v58 = vld [vmem:[%s4001_s0 + $0xd8] sm:$0xff]  ;;  %v3122_v59 = vld [vmem:[%s4001_s0 + $0xe0] sm:$0xff]  ;;  %v3131_v62 = vld [vmem:[%s4001_s0 + $0xe8] sm:$0xff] }
   0xc   :  { %v114_v60 = vmax.f32 %v3117_v58, 0.0  ;;  %v115_v61 = vmax.f32 %v3122_v59, 0.0  ;;  %v3136_v63 = vld [vmem:[%s4001_s0 + $0xf0] sm:$0xff]  ;;  %v116_v0 = vmax.f32 %v3131_v62, 0.0  ;;  %v3145_v2 = vld [vmem:[%s4001_s0 + $0xf8] sm:$0xff]  ;;  %v3150_v4 = vld [vmem:[%s4001_s0 + $0x100] sm:$0xff] }
   0xd   :  { %v117_v1 = vmax.f32 %v3136_v63, 0.0  ;;  %v118_v5 = vmax.f32 %v3145_v2, 0.0  ;;  %v119_v8 = vmax.f32 %v3150_v4, 0.0  ;;  %v3159_v9 = vld [vmem:[%s4001_s0 + $0x108] sm:$0xff] }
   0xe   :  { %2443 = vmatmul.mubr.msk.f32.gmra.mrb[2].mxu0 %vm161_vm0, %v90_v12  ;;  %v3164_v12 = vld [vmem:[%s4001_s0 + $0x110] sm:$0xff] }
   0xf   :  { %2445 = vmatprep.mubr.msk.f32.mxu0 %vm161_vm0, %v91_v13  ;;  %v120_v13 = vmax.f32 %v3159_v9, 0.0 }
  0x12   :  { %2446 = vmatmul.mubr.msk.f32.gmra.mrb[4].mxu0 %vm161_vm0, %v92_v16  ;;  %v121_v16 = vmax.f32 %v3164_v12, 0.0 }
  0x13   :  { %2448 = vmatprep.mubr.msk.f32.mxu0 %vm161_vm0, %v93_v17  ;;  %v3173_v17 = vld [vmem:[%s4001_s0 + $0x118] sm:$0xff] }
  0x16   :  { %2449 = vmatmul.mubr.msk.f32.gmra.mrb[6].mxu0 %vm161_vm0, %v94_v20  ;;  %v3178_v20 = vld [vmem:[%s4001_s0 + $0x120] sm:$0xff] }
  0x17   :  { %2451 = vmatprep.mubr.msk.f32.mxu0 %vm161_vm0, %v95_v21  ;;  %v122_v21 = vmax.f32 %v3173_v17, 0.0 }
  0x1a   :  { %2452 = vmatmul.mubr.msk.f32.gmra.mrb[8].mxu0 %vm161_vm0, %v96_v24  ;;  %v123_v24 = vmax.f32 %v3178_v20, 0.0 }
  0x1b   :  { %2454 = vmatprep.mubr.msk.f32.mxu0 %vm161_vm0, %v97_v25  ;;  %v3187_v25 = vld [vmem:[%s4001_s0 + $0x128] sm:$0xff] }
  0x1e   :  { %2455 = vmatmul.mubr.msk.f32.gmra.mrb[10].mxu0 %vm161_vm0, %v98_v28  ;;  %v3192_v28 = vld [vmem:[%s4001_s0 + $0x130] sm:$0xff] }
  0x1f   :  { %2457 = vmatprep.mubr.msk.f32.mxu0 %vm161_vm0, %v99_v29  ;;  %v124_v29 = vmax.f32 %v3187_v25, 0.0 }
  0x22   :  { %2458 = vmatmul.mubr.msk.f32.gmra.mrb[12].mxu0 %vm161_vm0, %v100_v32  ;;  %v125_v32 = vmax.f32 %v3192_v28, 0.0 }
  0x23   :  { %2460 = vmatprep.mubr.msk.f32.mxu0 %vm161_vm0, %v101_v33  ;;  %v3201_v33 = vld [vmem:[%s4001_s0 + $0x138] sm:$0xff] }
  0x26   :  { %2461 = vmatmul.mubr.msk.f32.gmra.mrb[14].mxu0 %vm161_vm0, %v102_v36  ;;  %v3206_v36 = vld [vmem:[%s4001_s0 + $0x140] sm:$0xff] }
  0x27   :  { %2463 = vmatprep.mubr.msk.f32.mxu0 %vm161_vm0, %v103_v37  ;;  %v126_v37 = vmax.f32 %v3201_v33, 0.0 }
  0x2a   :  { %2464 = vmatmul.mubr.msk.f32.gmra.mrb[16].mxu0 %vm161_vm0, %v104_v40  ;;  %v127_v40 = vmax.f32 %v3206_v36, 0.0 }
  0x2b   :  { %2466 = vmatprep.mubr.msk.f32.mxu0 %vm161_vm0, %v105_v41  ;;  %v3215_v41 = vld [vmem:[%s4001_s0 + $0x148] sm:$0xff] }
  0x2e   :  { %2467 = vmatmul.mubr.msk.f32.gmra.mrb[18].mxu0 %vm161_vm0, %v106_v44  ;;  %v3220_v44 = vld [vmem:[%s4001_s0 + $0x150] sm:$0xff] }
  0x2f   :  { %2469 = vmatprep.mubr.msk.f32.mxu0 %vm161_vm0, %v107_v45  ;;  %v128_v45 = vmax.f32 %v3215_v41, 0.0 }
  0x32   :  { %2470 = vmatmul.mubr.msk.f32.gmra.mrb[20].mxu0 %vm161_vm0, %v108_v48  ;;  %v129_v48 = vmax.f32 %v3220_v44, 0.0 }
  0x33   :  { %2472 = vmatprep.mubr.msk.f32.mxu0 %vm161_vm0, %v109_v49  ;;  %v3229_v49 = vld [vmem:[%s4001_s0 + $0x158] sm:$0xff] }
  0x36   :  { %2473 = vmatmul.mubr.msk.f32.gmra.mrb[22].mxu0 %vm161_vm0, %v110_v52  ;;  %v3234_v52 = vld [vmem:[%s4001_s0 + $0x160] sm:$0xff] }
  0x37   :  { %2475 = vmatprep.mubr.msk.f32.mxu0 %vm161_vm0, %v111_v53  ;;  %v130_v53 = vmax.f32 %v3229_v49, 0.0 }
  0x3a   :  { %2476 = vmatmul.mubr.msk.f32.gmra.mrb[24].mxu0 %vm161_vm0, %v112_v56  ;;  %v131_v56 = vmax.f32 %v3234_v52, 0.0 }
  0x3b   :  { %2478 = vmatprep.mubr.msk.f32.mxu0 %vm161_vm0, %v113_v57  ;;  %v3243_v57 = vld [vmem:[%s4001_s0 + $0x168] sm:$0xff] }
  0x3e   :  { %2479 = vmatmul.mubr.msk.f32.gmra.mrb[26].mxu0 %vm161_vm0, %v114_v60  ;;  %v803_v60 = vld [vmem:[%s4002_s3] sm:$0xff] }
  0x3f   :  { %2481 = vmatprep.mubr.msk.f32.mxu0 %vm161_vm0, %v115_v61  ;;  %v804_v61 = vld [vmem:[%s4002_s3 + $0x8] sm:$0xff] }
  0x42   :  { %2482 = vmatmul.mubr.msk.f32.gmra.mrb[28].mxu0 %vm161_vm0, %v116_v0  ;;  %v3254_v0 = vld [vmem:[%s4001_s0 + $0x170] sm:$0xff] }
  0x43   :  { %2484 = vmatprep.mubr.msk.f32.mxu0 %vm161_vm0, %v117_v1  ;;  %v2743_v1 = vpack.c.bf16 %v804_v61, %v803_v60  ;;  %v3308_v61 = vld [vmem:[%s4001_s0 + $0x1a8] sm:$0xff] }
  0x44   :  { %4028 = vst [vmem:[#allocation7_spill] sm:$0xff] %v3308_v61 }
  0x45   :  { %2744 = vmatprep.subr.bf16.mxu0 %v2743_v1  ;;  %2751 = vmatprep.subr.bf16.mxu1 %v2743_v1 }
  0x46   :  { %2485 = vmatmul.mubr.msk.f32.gmra.mrb[30].mxu0 %vm161_vm0, %v118_v5  ;;  %v132_v5 = vmax.f32 %v3243_v57, 0.0  ;;  %2753 = vmatpush3.bf16.msra.mxu1 %v2743_v1 }
  0x47   :  { %2487 = vmatprep.mubr.msk.f32.mxu0 %vm161_vm0, %v119_v8  ;;  %v133_v8 = vmax.f32 %v3254_v0, 0.0  ;;  %2746 = vmatpush3.bf16.msra.mxu0 %v2743_v1  ;;  %v3313_v1 = vld [vmem:[%s4001_s0 + $0x1b0] sm:$0xff] }
  0x48   :  { %4029 = vst [vmem:[#allocation8_spill] sm:$0xff] %v3313_v1 }
  0x4a   :  { %2488 = vmatmul.mubr.msk.f32.gmra.mrb[32].mxu0 %vm161_vm0, %v120_v13  ;;  %v3263_v13 = vld [vmem:[%s4001_s0 + $0x178] sm:$0xff] }
  0x4b   :  { %2490 = vmatprep.mubr.msk.f32.mxu0 %vm161_vm0, %v121_v16  ;;  %v3268_v16 = vld [vmem:[%s4001_s0 + $0x180] sm:$0xff] }
  0x4c   :  { %4023 = vst [vmem:[#allocation2_spill] sm:$0xff] %v3268_v16 }
  0x4e   :  { %2491 = vmatmul.mubr.msk.f32.gmra.mrb[34].mxu0 %vm161_vm0, %v122_v21  ;;  %v805_v21 = vld [vmem:[%s4002_s3 + $0x10] sm:$0xff] }
  0x4f   :  { %2493 = vmatprep.mubr.msk.f32.mxu0 %vm161_vm0, %v123_v24  ;;  %v134_v24 = vmax.f32 %v3263_v13, 0.0  ;;  %2539 = vmatprep.subr.mxu0 %v805_v21 }
  0x50   :  { %2540 = vmatpush3.msra.mxu0 %v805_v21  ;;  %2752 = vmatprep.subr.mxu1 %v805_v21 }
  0x51   :  { %2754 = vmatpush3.msra.mxu1 %v805_v21  ;;  %v3322_v21 = vld [vmem:[%s4001_s0 + $0x1b8] sm:$0xff] }
  0x52   :  { %2494 = vmatmul.mubr.msk.f32.gmra.mrb[36].mxu0 %vm161_vm0, %v124_v29  ;;  %v135_v29 = vmax.f32 %v3268_v16, 0.0  ;;  %4030 = vst [vmem:[#allocation9_spill] sm:$0xff] %v3322_v21 }
  0x53   :  { %2496 = vmatprep.mubr.msk.f32.mxu0 %vm161_vm0, %v125_v32  ;;  %v3280_v32 = vld [vmem:[%s4001_s0 + $0x188] sm:$0xff] }
  0x54   :  { %4024 = vst [vmem:[#allocation3_spill] sm:$0xff] %v3280_v32 }
  0x56   :  { %2497 = vmatmul.mubr.msk.f32.gmra.mrb[38].mxu0 %vm161_vm0, %v126_v37  ;;  %v3285_v37 = vld [vmem:[%s4001_s0 + $0x190] sm:$0xff] }
  0x57   :  { %2499 = vmatprep.mubr.msk.f32.mxu0 %vm161_vm0, %v127_v40  ;;  %4025 = vst [vmem:[#allocation4_spill] sm:$0xff] %v3285_v37  ;;  %v136_v40 = vmax.f32 %v3280_v32, 0.0 }
  0x5a   :  { %2500 = vmatmul.mubr.msk.f32.gmra.mrb[40].mxu0 %vm161_vm0, %v128_v45  ;;  %v137_v45 = vmax.f32 %v3285_v37, 0.0 }
  0x5b   :  { %2502 = vmatprep.mubr.msk.f32.mxu0 %vm161_vm0, %v129_v48  ;;  %v3294_v48 = vld [vmem:[%s4001_s0 + $0x198] sm:$0xff] }
  0x5c   :  { %4026 = vst [vmem:[#allocation5_spill] sm:$0xff] %v3294_v48 }
  0x5e   :  { %2503 = vmatmul.mubr.msk.f32.gmra.mrb[42].mxu0 %vm161_vm0, %v130_v53  ;;  %v3299_v53 = vld [vmem:[%s4001_s0 + $0x1a0] sm:$0xff] }
  0x5f   :  { %2505 = vmatprep.mubr.msk.f32.mxu0 %vm161_vm0, %v131_v56  ;;  %4027 = vst [vmem:[#allocation6_spill] sm:$0xff] %v3299_v53  ;;  %v138_v56 = vmax.f32 %v3294_v48, 0.0  ;;  %v139_v60 = vmax.f32 %v3299_v53, 0.0 }
  0x62   :  { %2506 = vmatmul.mubr.msk.f32.gmra.mrb[44].mxu0 %vm161_vm0, %v132_v5  ;;  %v140_v5 = vmax.f32 %v3308_v61, 0.0 }
  0x63   :  { %2508 = vmatprep.mubr.msk.f32.mxu0 %vm161_vm0, %v133_v8  ;;  %v141_v8 = vmax.f32 %v3313_v1, 0.0 }
  0x66   :  { %2509 = vmatmul.mubr.msk.f32.gmra.mrb[46].mxu0 %vm161_vm0, %v134_v24  ;;  %v3327_v24 = vld [vmem:[%s4001_s0 + $0x1c0] sm:$0xff] }
  0x67   :  { %2511 = vmatprep.mubr.msk.f32.mxu0 %vm161_vm0, %v135_v29  ;;  %4031 = vst [vmem:[#allocation10_spill] sm:$0xff] %v3327_v24  ;;  %v142_v29 = vmax.f32 %v3322_v21, 0.0 }
  0x6a   :  { %2512 = vmatmul.mubr.msk.f32.gmra.mrb[48].mxu0 %vm161_vm0, %v136_v40  ;;  %v143_v40 = vmax.f32 %v3327_v24, 0.0  ;;  %v3355_v24 = vld [vmem:[%s4001_s0 + $0x1e0] sm:$0xff] }
  0x6b   :  { %2514 = vmatprep.mubr.msk.f32.mxu0 %vm161_vm0, %v137_v45  ;;  %v3336_v45 = vld [vmem:[%s4001_s0 + $0x1c8] sm:$0xff]  ;;  %4035 = vst [vmem:[#allocation14_spill] sm:$0xff] %v3355_v24 }
  0x6c   :  { %4032 = vst [vmem:[#allocation11_spill] sm:$0xff] %v3336_v45 }
  0x6e   :  { %2515 = vmatmul.mubr.msk.f32.gmra.mrb[50].mxu0 %vm161_vm0, %v138_v56  ;;  %v3341_v56 = vld [vmem:[%s4001_s0 + $0x1d0] sm:$0xff] }
  0x6f   :  { %2517 = vmatprep.mubr.msk.f32.mxu0 %vm161_vm0, %v139_v60  ;;  %4033 = vst [vmem:[#allocation12_spill] sm:$0xff] %v3341_v56  ;;  %v144_v60 = vmax.f32 %v3336_v45, 0.0  ;;  %v3369_v45 = vld [vmem:[%s4001_s0 + $0x1f0] sm:$0xff] }
  0x70   :  { %4037 = vst [vmem:[#allocation16_spill] sm:$0xff] %v3369_v45 }
  0x72   :  { %2518 = vmatmul.mubr.msk.f32.gmra.mrb[52].mxu0 %vm161_vm0, %v140_v5  ;;  %v145_v5 = vmax.f32 %v3341_v56, 0.0  ;;  %v3364_v56 = vld [vmem:[%s4001_s0 + $0x1e8] sm:$0xff] }
  0x73   :  { %2520 = vmatprep.mubr.msk.f32.mxu0 %vm161_vm0, %v141_v8  ;;  %v3350_v8 = vld [vmem:[%s4001_s0 + $0x1d8] sm:$0xff]  ;;  %4036 = vst [vmem:[#allocation15_spill] sm:$0xff] %v3364_v56 }
  0x74   :  { %4034 = vst [vmem:[#allocation13_spill] sm:$0xff] %v3350_v8 }
  0x76   :  { %2521 = vmatmul.mubr.msk.f32.gmra.mrb[54].mxu0 %vm161_vm0, %v142_v29  ;;  %v146_v29 = vmax.f32 %v3350_v8, 0.0 }
  0x77   :  { %2523 = vmatprep.mubr.msk.f32.mxu0 %vm161_vm0, %v143_v40  ;;  %v147_v40 = vmax.f32 %v3355_v24, 0.0  ;;  %v3378_v24 = vld [vmem:[%s4001_s0 + $0x1f8] sm:$0xff] }
  0x78   :  { %4038 = vst [vmem:[#allocation17_spill] sm:$0xff] %v3378_v24  ;;  %v150_v8 = vmax.f32 %v3378_v24, 0.0 }
  0x7a   :  { %2524 = vmatmul.mubr.msk.f32.gmra.mrb[56].mxu0 %vm161_vm0, %v144_v60  ;;  %v148_v60 = vmax.f32 %v3364_v56, 0.0 }
  0x7b   :  { %2526 = vmatprep.mubr.msk.f32.mxu0 %vm161_vm0, %v145_v5  ;;  %v149_v5 = vmax.f32 %v3369_v45, 0.0 }
  0x7e   :  { %2527 = vmatmul.mubr.msk.f32.gmra.mrb[58].mxu0 %vm161_vm0, %v146_v29  ;;  %v1390_v29 = vld [vmem:[%s4003_s5] sm:$0xff] }
  0x7f   :  { %2529 = vmatprep.mubr.msk.f32.mxu0 %vm161_vm0, %v147_v40  ;;  %v1391_v40 = vld [vmem:[%s4003_s5 + $0x8] sm:$0xff] }
  0x80   :  { %v3390_v45 = vpack.c.bf16 %v1391_v40, %v1390_v29 }
  0x82   :  { %2530 = vmatmul.mubr.msk.f32.gmra.mrb[60].mxu0 %vm161_vm0, %v148_v60  ;;  %2748 = vmatprep.subr.bf16.mxu1 %v3390_v45  ;;  %v3396_v60 = vld [vmem:[%s4004_s2] ss:$0 sm:$0xff] }
  0x83   :  { %2532 = vmatprep.mubr.msk.f32.mxu0 %vm161_vm0, %v149_v5 }
  0x86   :  { %2533 = vmatmul.mubr.msk.f32.gmra.mrb[62].mxu0 %vm161_vm0, %v150_v8 }
  0xdd   :  { %v2441_v5 = vpop.f32.mrb[0].mxu0 }
  0xde   :  { %v426_v8 = vadd.f32 %v2441_v5, %v3396_v60  ;;  %v420_v24 = vpop.f32.mrb[1].mxu0 }
  0xdf   :  { %v421_v56 = vadd.f32 %v3396_v60, %v420_v24 }
  0xe0   :  { %v740_v61 = vmax.f32 %v426_v8, 0.0 }
  0xe1   :  { %v739_v21 = vmax.f32 %v421_v56, 0.0  ;;  %v2444_v1 = vpop.f32.mrb[2].mxu0 }
  0xe2   :  { %v436_v53 = vadd.f32 %v2444_v1, %v3396_v60  ;;  %v430_v29 = vpop.f32.mrb[3].mxu0 }
  0xe3   :  { %v431_v40 = vadd.f32 %v3396_v60, %v430_v29  ;;  %2541 = vmatprep.mubr.msk.f32.mxu0 %vm161_vm0, %v739_v21 }
  0xe4   :  { %2542 = vmatmul.mubr.msk.f32.vlgmr.msra.gmra.mrb[64].mxu0 %vm161_vm0, %v740_v61  ;;  %v742_v32 = vmax.f32 %v436_v53, 0.0 }
  0xe5   :  { %v741_v48 = vmax.f32 %v431_v40, 0.0  ;;  %v2447_v37 = vpop.f32.mrb[4].mxu0 }
  0xe6   :  { %v446_v5 = vadd.f32 %v2447_v37, %v3396_v60  ;;  %v440_v16 = vpop.f32.mrb[5].mxu0 }
  0xe7   :  { %v441_v24 = vadd.f32 %v3396_v60, %v440_v16  ;;  %2544 = vmatprep.mubr.msk.f32.mxu0 %vm161_vm0, %v741_v48 }
  0xe8   :  { %2545 = vmatmul.mubr.msk.f32.gmra.mrb[66].mxu0 %vm161_vm0, %v742_v32  ;;  %v744_v8 = vmax.f32 %v446_v5, 0.0 }
  0xe9   :  { %v743_v1 = vmax.f32 %v441_v24, 0.0  ;;  %v2450_v56 = vpop.f32.mrb[6].mxu0 }
  0xea   :  { %v456_v29 = vadd.f32 %v2450_v56, %v3396_v60  ;;  %v450_v21 = vpop.f32.mrb[7].mxu0 }
  0xeb   :  { %v451_v61 = vadd.f32 %v3396_v60, %v450_v21  ;;  %2547 = vmatprep.mubr.msk.f32.mxu0 %vm161_vm0, %v743_v1 }
  0xec   :  { %2548 = vmatmul.mubr.msk.f32.gmra.mrb[68].mxu0 %vm161_vm0, %v744_v8  ;;  %v746_v40 = vmax.f32 %v456_v29, 0.0 }
  0xed   :  { %v745_v37 = vmax.f32 %v451_v61, 0.0  ;;  %v2453_v53 = vpop.f32.mrb[8].mxu0 }
  0xee   :  { %v466_v16 = vadd.f32 %v2453_v53, %v3396_v60  ;;  %v460_v48 = vpop.f32.mrb[9].mxu0 }
  0xef   :  { %v461_v32 = vadd.f32 %v3396_v60, %v460_v48  ;;  %2550 = vmatprep.mubr.msk.f32.mxu0 %vm161_vm0, %v745_v37 }
  0xf0   :  { %2551 = vmatmul.mubr.msk.f32.gmra.mrb[70].mxu0 %vm161_vm0, %v746_v40  ;;  %v748_v56 = vmax.f32 %v466_v16, 0.0 }
  0xf1   :  { %v747_v5 = vmax.f32 %v461_v32, 0.0  ;;  %v2456_v24 = vpop.f32.mrb[10].mxu0 }
  0xf2   :  { %v476_v21 = vadd.f32 %v2456_v24, %v3396_v60  ;;  %v470_v1 = vpop.f32.mrb[11].mxu0 }
  0xf3   :  { %v471_v8 = vadd.f32 %v3396_v60, %v470_v1  ;;  %2553 = vmatprep.mubr.msk.f32.mxu0 %vm161_vm0, %v747_v5 }
  0xf4   :  { %2554 = vmatmul.mubr.msk.f32.gmra.mrb[72].mxu0 %vm161_vm0, %v748_v56  ;;  %v750_v53 = vmax.f32 %v476_v21, 0.0 }
  0xf5   :  { %v749_v29 = vmax.f32 %v471_v8, 0.0  ;;  %v2459_v61 = vpop.f32.mrb[12].mxu0 }
  0xf6   :  { %v486_v48 = vadd.f32 %v2459_v61, %v3396_v60  ;;  %v480_v37 = vpop.f32.mrb[13].mxu0 }
  0xf7   :  { %v481_v40 = vadd.f32 %v3396_v60, %v480_v37  ;;  %2556 = vmatprep.mubr.msk.f32.mxu0 %vm161_vm0, %v749_v29 }
  0xf8   :  { %2557 = vmatmul.mubr.msk.f32.gmra.mrb[74].mxu0 %vm161_vm0, %v750_v53  ;;  %v752_v24 = vmax.f32 %v486_v48, 0.0 }
  0xf9   :  { %v751_v16 = vmax.f32 %v481_v40, 0.0  ;;  %v2462_v32 = vpop.f32.mrb[14].mxu0 }
  0xfa   :  { %v496_v1 = vadd.f32 %v2462_v32, %v3396_v60  ;;  %v490_v5 = vpop.f32.mrb[15].mxu0 }
  0xfb   :  { %v491_v56 = vadd.f32 %v3396_v60, %v490_v5  ;;  %2559 = vmatprep.mubr.msk.f32.mxu0 %vm161_vm0, %v751_v16 }
  0xfc   :  { %2560 = vmatmul.mubr.msk.f32.gmra.mrb[76].mxu0 %vm161_vm0, %v752_v24  ;;  %v754_v61 = vmax.f32 %v496_v1, 0.0 }
  0xfd   :  { %v753_v21 = vmax.f32 %v491_v56, 0.0  ;;  %v2465_v8 = vpop.f32.mrb[16].mxu0 }
  0xfe   :  { %v506_v37 = vadd.f32 %v2465_v8, %v3396_v60  ;;  %v500_v29 = vpop.f32.mrb[17].mxu0 }
  0xff   :  { %v501_v53 = vadd.f32 %v3396_v60, %v500_v29  ;;  %2562 = vmatprep.mubr.msk.f32.mxu0 %vm161_vm0, %v753_v21 }
 0x100   :  { %2563 = vmatmul.mubr.msk.f32.gmra.mrb[78].mxu0 %vm161_vm0, %v754_v61  ;;  %v756_v32 = vmax.f32 %v506_v37, 0.0 }
 0x101   :  { %v755_v48 = vmax.f32 %v501_v53, 0.0  ;;  %v2468_v40 = vpop.f32.mrb[18].mxu0 }
 0x102   :  { %v516_v5 = vadd.f32 %v2468_v40, %v3396_v60  ;;  %v510_v16 = vpop.f32.mrb[19].mxu0 }
 0x103   :  { %v511_v24 = vadd.f32 %v3396_v60, %v510_v16  ;;  %2565 = vmatprep.mubr.msk.f32.mxu0 %vm161_vm0, %v755_v48 }
 0x104   :  { %2566 = vmatmul.mubr.msk.f32.gmra.mrb[80].mxu0 %vm161_vm0, %v756_v32  ;;  %v758_v8 = vmax.f32 %v516_v5, 0.0 }
 0x105   :  { %v757_v1 = vmax.f32 %v511_v24, 0.0  ;;  %v2471_v56 = vpop.f32.mrb[20].mxu0 }
 0x106   :  { %v526_v29 = vadd.f32 %v2471_v56, %v3396_v60  ;;  %v520_v21 = vpop.f32.mrb[21].mxu0 }
 0x107   :  { %v521_v61 = vadd.f32 %v3396_v60, %v520_v21  ;;  %2568 = vmatprep.mubr.msk.f32.mxu0 %vm161_vm0, %v757_v1 }
 0x108   :  { %2569 = vmatmul.mubr.msk.f32.gmra.mrb[82].mxu0 %vm161_vm0, %v758_v8  ;;  %v760_v40 = vmax.f32 %v526_v29, 0.0 }
 0x109   :  { %v759_v37 = vmax.f32 %v521_v61, 0.0  ;;  %v2474_v53 = vpop.f32.mrb[22].mxu0 }
 0x10a   :  { %v536_v16 = vadd.f32 %v2474_v53, %v3396_v60  ;;  %v530_v48 = vpop.f32.mrb[23].mxu0 }
 0x10b   :  { %v531_v32 = vadd.f32 %v3396_v60, %v530_v48  ;;  %2571 = vmatprep.mubr.msk.f32.mxu0 %vm161_vm0, %v759_v37 }
 0x10c   :  { %2572 = vmatmul.mubr.msk.f32.gmra.mrb[84].mxu0 %vm161_vm0, %v760_v40  ;;  %v762_v56 = vmax.f32 %v536_v16, 0.0 }
 0x10d   :  { %v761_v5 = vmax.f32 %v531_v32, 0.0  ;;  %v2477_v24 = vpop.f32.mrb[24].mxu0 }
 0x10e   :  { %v546_v21 = vadd.f32 %v2477_v24, %v3396_v60  ;;  %v540_v1 = vpop.f32.mrb[25].mxu0 }
 0x10f   :  { %v541_v8 = vadd.f32 %v3396_v60, %v540_v1  ;;  %2574 = vmatprep.mubr.msk.f32.mxu0 %vm161_vm0, %v761_v5 }
 0x110   :  { %2575 = vmatmul.mubr.msk.f32.gmra.mrb[86].mxu0 %vm161_vm0, %v762_v56  ;;  %v764_v53 = vmax.f32 %v546_v21, 0.0 }
 0x111   :  { %v763_v29 = vmax.f32 %v541_v8, 0.0  ;;  %v2480_v61 = vpop.f32.mrb[26].mxu0 }
 0x112   :  { %v556_v48 = vadd.f32 %v2480_v61, %v3396_v60  ;;  %v550_v37 = vpop.f32.mrb[27].mxu0 }
 0x113   :  { %v551_v40 = vadd.f32 %v3396_v60, %v550_v37  ;;  %2577 = vmatprep.mubr.msk.f32.mxu0 %vm161_vm0, %v763_v29 }
 0x114   :  { %2578 = vmatmul.mubr.msk.f32.gmra.mrb[88].mxu0 %vm161_vm0, %v764_v53  ;;  %v766_v24 = vmax.f32 %v556_v48, 0.0 }
 0x115   :  { %v765_v16 = vmax.f32 %v551_v40, 0.0  ;;  %v2483_v32 = vpop.f32.mrb[28].mxu0 }
 0x116   :  { %v566_v1 = vadd.f32 %v2483_v32, %v3396_v60  ;;  %v560_v5 = vpop.f32.mrb[29].mxu0 }
 0x117   :  { %v561_v56 = vadd.f32 %v3396_v60, %v560_v5  ;;  %2580 = vmatprep.mubr.msk.f32.mxu0 %vm161_vm0, %v765_v16 }
 0x118   :  { %2581 = vmatmul.mubr.msk.f32.gmra.mrb[90].mxu0 %vm161_vm0, %v766_v24  ;;  %v768_v61 = vmax.f32 %v566_v1, 0.0 }
 0x119   :  { %v767_v21 = vmax.f32 %v561_v56, 0.0  ;;  %v2486_v8 = vpop.f32.mrb[30].mxu0 }
 0x11a   :  { %v576_v37 = vadd.f32 %v2486_v8, %v3396_v60  ;;  %v570_v29 = vpop.f32.mrb[31].mxu0 }
 0x11b   :  { %v571_v53 = vadd.f32 %v3396_v60, %v570_v29  ;;  %2583 = vmatprep.mubr.msk.f32.mxu0 %vm161_vm0, %v767_v21 }
 0x11c   :  { %2584 = vmatmul.mubr.msk.f32.gmra.mrb[92].mxu0 %vm161_vm0, %v768_v61  ;;  %v770_v32 = vmax.f32 %v576_v37, 0.0  ;;  %v1392_v37 = vld [vmem:[%s4003_s5 + $0x10] sm:$0xff] }
 0x11d   :  { %v769_v48 = vmax.f32 %v571_v53, 0.0  ;;  %v2489_v40 = vpop.f32.mrb[32].mxu0 }
 0x11e   :  { %v586_v5 = vadd.f32 %v2489_v40, %v3396_v60  ;;  %v580_v16 = vpop.f32.mrb[33].mxu0 }
 0x11f   :  { %v581_v24 = vadd.f32 %v3396_v60, %v580_v16  ;;  %2586 = vmatprep.mubr.msk.f32.mxu0 %vm161_vm0, %v769_v48 }
 0x120   :  { %2587 = vmatmul.mubr.msk.f32.gmra.mrb[94].mxu0 %vm161_vm0, %v770_v32  ;;  %v772_v8 = vmax.f32 %v586_v5, 0.0 }
 0x121   :  { %v771_v1 = vmax.f32 %v581_v24, 0.0  ;;  %v2492_v56 = vpop.f32.mrb[34].mxu0 }
 0x122   :  { %v596_v29 = vadd.f32 %v2492_v56, %v3396_v60  ;;  %v590_v21 = vpop.f32.mrb[35].mxu0 }
 0x123   :  { %v591_v61 = vadd.f32 %v3396_v60, %v590_v21  ;;  %2589 = vmatprep.mubr.msk.f32.mxu1 %vm161_vm0, %v771_v1 }
 0x124   :  { %2590 = vmatmul.mubr.msk.f32.vlgmr.msra.gmra.mrb[0].mxu1 %vm161_vm0, %v772_v8  ;;  %v774_v40 = vmax.f32 %v596_v29, 0.0 }
 0x125   :  { %v773_v53 = vmax.f32 %v591_v61, 0.0  ;;  %2750 = vmatpush3.bf16.msra.mxu1 %v3390_v45  ;;  %v2495_v48 = vpop.f32.mrb[36].mxu0 }
 0x126   :  { %v606_v32 = vadd.f32 %v2495_v48, %v3396_v60  ;;  %v600_v5 = vpop.f32.mrb[37].mxu0  ;;  %2641 = vmatprep.subr.mxu1 %v1392_v37 }
 0x127   :  { %v601_v16 = vadd.f32 %v3396_v60, %v600_v5  ;;  %2592 = vmatprep.mubr.msk.f32.mxu1 %vm161_vm0, %v773_v53 }
 0x128   :  { %2593 = vmatmul.mubr.msk.f32.gmra.mrb[2].mxu1 %vm161_vm0, %v774_v40  ;;  %v776_v56 = vmax.f32 %v606_v32, 0.0 }
 0x129   :  { %v775_v24 = vmax.f32 %v601_v16, 0.0  ;;  %v2498_v1 = vpop.f32.mrb[38].mxu0  ;;  %2642 = vmatpush3.msra.mxu1 %v1392_v37 }
 0x12a   :  { %v616_v8 = vadd.f32 %v2498_v1, %v3396_v60  ;;  %v610_v21 = vpop.f32.mrb[39].mxu0 }
 0x12b   :  { %v611_v45 = vadd.f32 %v3396_v60, %v610_v21  ;;  %2595 = vmatprep.mubr.msk.f32.mxu1 %vm161_vm0, %v775_v24 }
 0x12c   :  { %2596 = vmatmul.mubr.msk.f32.gmra.mrb[4].mxu1 %vm161_vm0, %v776_v56  ;;  %v778_v48 = vmax.f32 %v616_v8, 0.0 }
 0x12d   :  { %v777_v29 = vmax.f32 %v611_v45, 0.0  ;;  %v2501_v61 = vpop.f32.mrb[40].mxu0 }
 0x12e   :  { %v626_v53 = vadd.f32 %v2501_v61, %v3396_v60  ;;  %v620_v5 = vpop.f32.mrb[41].mxu0 }
 0x12f   :  { %v621_v40 = vadd.f32 %v3396_v60, %v620_v5  ;;  %2598 = vmatprep.mubr.msk.f32.mxu1 %vm161_vm0, %v777_v29 }
 0x130   :  { %2599 = vmatmul.mubr.msk.f32.gmra.mrb[6].mxu1 %vm161_vm0, %v778_v48  ;;  %v780_v16 = vmax.f32 %v626_v53, 0.0 }
 0x131   :  { %v779_v37 = vmax.f32 %v621_v40, 0.0  ;;  %v2504_v32 = vpop.f32.mrb[42].mxu0 }
 0x132   :  { %v636_v1 = vadd.f32 %v2504_v32, %v3396_v60  ;;  %v630_v24 = vpop.f32.mrb[43].mxu0 }
 0x133   :  { %v631_v56 = vadd.f32 %v3396_v60, %v630_v24  ;;  %2601 = vmatprep.mubr.msk.f32.mxu1 %vm161_vm0, %v779_v37 }
 0x134   :  { %2602 = vmatmul.mubr.msk.f32.gmra.mrb[8].mxu1 %vm161_vm0, %v780_v16  ;;  %v782_v45 = vmax.f32 %v636_v1, 0.0 }
 0x135   :  { %v781_v8 = vmax.f32 %v631_v56, 0.0  ;;  %v2507_v21 = vpop.f32.mrb[44].mxu0 }
 0x136   :  { %v646_v61 = vadd.f32 %v2507_v21, %v3396_v60  ;;  %v640_v29 = vpop.f32.mrb[45].mxu0 }
 0x137   :  { %v641_v48 = vadd.f32 %v3396_v60, %v640_v29  ;;  %2604 = vmatprep.mubr.msk.f32.mxu1 %vm161_vm0, %v781_v8 }
 0x138   :  { %2605 = vmatmul.mubr.msk.f32.gmra.mrb[10].mxu1 %vm161_vm0, %v782_v45  ;;  %v784_v40 = vmax.f32 %v646_v61, 0.0 }
 0x139   :  { %v783_v53 = vmax.f32 %v641_v48, 0.0  ;;  %v2510_v5 = vpop.f32.mrb[46].mxu0 }
 0x13a   :  { %v656_v32 = vadd.f32 %v2510_v5, %v3396_v60  ;;  %v650_v37 = vpop.f32.mrb[47].mxu0 }
 0x13b   :  { %v651_v16 = vadd.f32 %v3396_v60, %v650_v37  ;;  %2607 = vmatprep.mubr.msk.f32.mxu1 %vm161_vm0, %v783_v53 }
 0x13c   :  { %2608 = vmatmul.mubr.msk.f32.gmra.mrb[12].mxu1 %vm161_vm0, %v784_v40  ;;  %v786_v56 = vmax.f32 %v656_v32, 0.0 }
 0x13d   :  { %v785_v1 = vmax.f32 %v651_v16, 0.0  ;;  %v2513_v24 = vpop.f32.mrb[48].mxu0 }
 0x13e   :  { %v666_v21 = vadd.f32 %v2513_v24, %v3396_v60  ;;  %v660_v8 = vpop.f32.mrb[49].mxu0 }
 0x13f   :  { %v661_v45 = vadd.f32 %v3396_v60, %v660_v8  ;;  %2610 = vmatprep.mubr.msk.f32.mxu1 %vm161_vm0, %v785_v1 }
 0x140   :  { %2611 = vmatmul.mubr.msk.f32.gmra.mrb[14].mxu1 %vm161_vm0, %v786_v56  ;;  %v788_v48 = vmax.f32 %v666_v21, 0.0 }
 0x141   :  { %v787_v61 = vmax.f32 %v661_v45, 0.0  ;;  %v2516_v29 = vpop.f32.mrb[50].mxu0 }
 0x142   :  { %v676_v5 = vadd.f32 %v2516_v29, %v3396_v60  ;;  %v670_v53 = vpop.f32.mrb[51].mxu0 }
 0x143   :  { %v671_v40 = vadd.f32 %v3396_v60, %v670_v53  ;;  %2613 = vmatprep.mubr.msk.f32.mxu1 %vm161_vm0, %v787_v61 }
 0x144   :  { %2614 = vmatmul.mubr.msk.f32.gmra.mrb[16].mxu1 %vm161_vm0, %v788_v48  ;;  %v790_v16 = vmax.f32 %v676_v5, 0.0 }
 0x145   :  { %v789_v32 = vmax.f32 %v671_v40, 0.0  ;;  %v2519_v37 = vpop.f32.mrb[52].mxu0 }
 0x146   :  { %v686_v24 = vadd.f32 %v2519_v37, %v3396_v60  ;;  %v680_v1 = vpop.f32.mrb[53].mxu0 }
 0x147   :  { %v681_v56 = vadd.f32 %v3396_v60, %v680_v1  ;;  %2616 = vmatprep.mubr.msk.f32.mxu1 %vm161_vm0, %v789_v32 }
 0x148   :  { %2617 = vmatmul.mubr.msk.f32.gmra.mrb[18].mxu1 %vm161_vm0, %v790_v16  ;;  %v792_v45 = vmax.f32 %v686_v24, 0.0 }
 0x149   :  { %v791_v21 = vmax.f32 %v681_v56, 0.0  ;;  %v2522_v8 = vpop.f32.mrb[54].mxu0 }
 0x14a   :  { %v696_v29 = vadd.f32 %v2522_v8, %v3396_v60  ;;  %v690_v61 = vpop.f32.mrb[55].mxu0 }
 0x14b   :  { %v691_v48 = vadd.f32 %v3396_v60, %v690_v61  ;;  %2619 = vmatprep.mubr.msk.f32.mxu1 %vm161_vm0, %v791_v21 }
 0x14c   :  { %2620 = vmatmul.mubr.msk.f32.gmra.mrb[20].mxu1 %vm161_vm0, %v792_v45  ;;  %v794_v40 = vmax.f32 %v696_v29, 0.0 }
 0x14d   :  { %v793_v5 = vmax.f32 %v691_v48, 0.0  ;;  %v2525_v53 = vpop.f32.mrb[56].mxu0 }
 0x14e   :  { %v706_v37 = vadd.f32 %v2525_v53, %v3396_v60  ;;  %v700_v32 = vpop.f32.mrb[57].mxu0 }
 0x14f   :  { %v701_v16 = vadd.f32 %v3396_v60, %v700_v32  ;;  %2622 = vmatprep.mubr.msk.f32.mxu1 %vm161_vm0, %v793_v5 }
 0x150   :  { %2623 = vmatmul.mubr.msk.f32.gmra.mrb[22].mxu1 %vm161_vm0, %v794_v40  ;;  %v796_v56 = vmax.f32 %v706_v37, 0.0 }
 0x151   :  { %v795_v24 = vmax.f32 %v701_v16, 0.0  ;;  %v2528_v1 = vpop.f32.mrb[58].mxu0 }
 0x152   :  { %v716_v8 = vadd.f32 %v2528_v1, %v3396_v60  ;;  %v710_v21 = vpop.f32.mrb[59].mxu0 }
 0x153   :  { %v711_v45 = vadd.f32 %v3396_v60, %v710_v21  ;;  %2625 = vmatprep.mubr.msk.f32.mxu1 %vm161_vm0, %v795_v24 }
 0x154   :  { %2626 = vmatmul.mubr.msk.f32.gmra.mrb[24].mxu1 %vm161_vm0, %v796_v56  ;;  %v798_v48 = vmax.f32 %v716_v8, 0.0 }
 0x155   :  { %v797_v29 = vmax.f32 %v711_v45, 0.0  ;;  %v2531_v61 = vpop.f32.mrb[60].mxu0 }
 0x156   :  { %v726_v53 = vadd.f32 %v2531_v61, %v3396_v60  ;;  %v720_v5 = vpop.f32.mrb[61].mxu0 }
 0x157   :  { %v721_v40 = vadd.f32 %v3396_v60, %v720_v5  ;;  %2628 = vmatprep.mubr.msk.f32.mxu1 %vm161_vm0, %v797_v29 }
 0x158   :  { %2629 = vmatmul.mubr.msk.f32.gmra.mrb[26].mxu1 %vm161_vm0, %v798_v48  ;;  %v800_v16 = vmax.f32 %v726_v53, 0.0 }
 0x159   :  { %v799_v37 = vmax.f32 %v721_v40, 0.0  ;;  %v2534_v32 = vpop.f32.mrb[62].mxu0 }
 0x15a   :  { %v736_v1 = vadd.f32 %v2534_v32, %v3396_v60  ;;  %v730_v24 = vpop.f32.mrb[63].mxu0 }
 0x15b   :  { %v731_v56 = vadd.f32 %v3396_v60, %v730_v24  ;;  %2631 = vmatprep.mubr.msk.f32.mxu1 %vm161_vm0, %v799_v37  ;;  %v3715_v60 = vld [vmem:[%s4005_s4] ss:$0 sm:$0xff] }
 0x15c   :  { %2632 = vmatmul.mubr.msk.f32.gmra.mrb[28].mxu1 %vm161_vm0, %v800_v16  ;;  %v802_v21 = vmax.f32 %v736_v1, 0.0 }
 0x15d   :  { %v801_v8 = vmax.f32 %v731_v56, 0.0 }
 0x15f   :  { %2634 = vmatprep.mubr.msk.f32.mxu1 %vm161_vm0, %v801_v8 }
 0x160   :  { %2635 = vmatmul.mubr.msk.f32.gmra.mrb[30].mxu1 %vm161_vm0, %v802_v21 }
 0x161   :  { %2643 = vmatprep.mubr.msk.f32.mxu1 %vm161_vm0, %v2927_v3 }
 0x164   :  { %2644 = vmatmul.mubr.msk.f32.vlgmr.msra.gmra.mrb[32].mxu1 %vm161_vm0, %v2936_v6 }
 0x165   :  { %2646 = vmatprep.mubr.msk.f32.mxu1 %vm161_vm0, %v2941_v7 }
 0x168   :  { %2647 = vmatmul.mubr.msk.f32.gmra.mrb[34].mxu1 %vm161_vm0, %v2949_v10 }
 0x169   :  { %2649 = vmatprep.mubr.msk.f32.mxu1 %vm161_vm0, %v2954_v11 }
 0x16c   :  { %2650 = vmatmul.mubr.msk.f32.gmra.mrb[36].mxu1 %vm161_vm0, %v2963_v14 }
 0x16d   :  { %2652 = vmatprep.mubr.msk.f32.mxu1 %vm161_vm0, %v2968_v15  ;;  %v4039_v15 = vld [vmem:[#allocation2_spill] sm:$0xff] }
 0x170   :  { %2653 = vmatmul.mubr.msk.f32.gmra.mrb[38].mxu1 %vm161_vm0, %v2977_v18 }
 0x171   :  { %2655 = vmatprep.mubr.msk.f32.mxu1 %vm161_vm0, %v2982_v19 }
 0x174   :  { %2656 = vmatmul.mubr.msk.f32.gmra.mrb[40].mxu1 %vm161_vm0, %v2991_v22  ;;  %v4040_v22 = vld [vmem:[#allocation3_spill] sm:$0xff] }
 0x175   :  { %2658 = vmatprep.mubr.msk.f32.mxu1 %vm161_vm0, %v2996_v23  ;;  %v4041_v23 = vld [vmem:[#allocation4_spill] sm:$0xff] }
 0x178   :  { %2659 = vmatmul.mubr.msk.f32.gmra.mrb[42].mxu1 %vm161_vm0, %v3005_v26 }
 0x179   :  { %2661 = vmatprep.mubr.msk.f32.mxu1 %vm161_vm0, %v3010_v27 }
 0x17c   :  { %2662 = vmatmul.mubr.msk.f32.gmra.mrb[44].mxu1 %vm161_vm0, %v3019_v30  ;;  %v4042_v30 = vld [vmem:[#allocation5_spill] sm:$0xff] }
 0x17d   :  { %2664 = vmatprep.mubr.msk.f32.mxu1 %vm161_vm0, %v3024_v31  ;;  %v4043_v31 = vld [vmem:[#allocation6_spill] sm:$0xff] }
 0x180   :  { %2665 = vmatmul.mubr.msk.f32.gmra.mrb[46].mxu1 %vm161_vm0, %v3033_v34 }
 0x181   :  { %2667 = vmatprep.mubr.msk.f32.mxu1 %vm161_vm0, %v3038_v35 }
 0x184   :  { %2668 = vmatmul.mubr.msk.f32.gmra.mrb[48].mxu1 %vm161_vm0, %v3047_v38  ;;  %v4044_v38 = vld [vmem:[#allocation7_spill] sm:$0xff] }
 0x185   :  { %2670 = vmatprep.mubr.msk.f32.mxu1 %vm161_vm0, %v3052_v39  ;;  %v4045_v39 = vld [vmem:[#allocation8_spill] sm:$0xff] }
 0x188   :  { %2671 = vmatmul.mubr.msk.f32.gmra.mrb[50].mxu1 %vm161_vm0, %v3061_v42 }
 0x189   :  { %2673 = vmatprep.mubr.msk.f32.mxu1 %vm161_vm0, %v3066_v43 }
 0x18c   :  { %2674 = vmatmul.mubr.msk.f32.gmra.mrb[52].mxu1 %vm161_vm0, %v3075_v46  ;;  %v4046_v46 = vld [vmem:[#allocation9_spill] sm:$0xff] }
 0x18d   :  { %2676 = vmatprep.mubr.msk.f32.mxu1 %vm161_vm0, %v3080_v47  ;;  %v4047_v47 = vld [vmem:[#allocation10_spill] sm:$0xff] }
 0x190   :  { %2677 = vmatmul.mubr.msk.f32.gmra.mrb[54].mxu1 %vm161_vm0, %v3089_v50 }
 0x191   :  { %2679 = vmatprep.mubr.msk.f32.mxu1 %vm161_vm0, %v3094_v51 }
 0x194   :  { %2680 = vmatmul.mubr.msk.f32.gmra.mrb[56].mxu1 %vm161_vm0, %v3103_v54  ;;  %v4048_v54 = vld [vmem:[#allocation11_spill] sm:$0xff] }
 0x195   :  { %2682 = vmatprep.mubr.msk.f32.mxu1 %vm161_vm0, %v3108_v55  ;;  %v4049_v55 = vld [vmem:[#allocation12_spill] sm:$0xff] }
 0x198   :  { %2683 = vmatmul.mubr.msk.f32.gmra.mrb[58].mxu1 %vm161_vm0, %v3117_v58 }
 0x199   :  { %2685 = vmatprep.mubr.msk.f32.mxu1 %vm161_vm0, %v3122_v59 }
 0x19c   :  { %2686 = vmatmul.mubr.msk.f32.gmra.mrb[60].mxu1 %vm161_vm0, %v3131_v62  ;;  %v4050_v62 = vld [vmem:[#allocation13_spill] sm:$0xff] }
 0x19d   :  { %2688 = vmatprep.mubr.msk.f32.mxu1 %vm161_vm0, %v3136_v63  ;;  %v4051_v63 = vld [vmem:[#allocation14_spill] sm:$0xff] }
 0x1a0   :  { %2689 = vmatmul.mubr.msk.f32.gmra.mrb[62].mxu1 %vm161_vm0, %v3145_v2 }
 0x1a1   :  { %2691 = vmatprep.mubr.msk.f32.mxu1 %vm161_vm0, %v3150_v4 }
 0x1a4   :  { %2692 = vmatmul.mubr.msk.f32.gmra.mrb[0].mxu1 %vm161_vm0, %v3159_v9  ;;  %v4052_v9 = vld [vmem:[#allocation15_spill] sm:$0xff] }
 0x1a5   :  { %2694 = vmatprep.mubr.msk.f32.mxu1 %vm161_vm0, %v3164_v12  ;;  %v4053_v12 = vld [vmem:[#allocation16_spill] sm:$0xff] }
 0x1a8   :  { %2695 = vmatmul.mubr.msk.f32.gmra.mrb[2].mxu1 %vm161_vm0, %v3173_v17 }
 0x1a9   :  { %2697 = vmatprep.mubr.msk.f32.mxu1 %vm161_vm0, %v3178_v20 }
 0x1ac   :  { %2698 = vmatmul.mubr.msk.f32.gmra.mrb[4].mxu1 %vm161_vm0, %v3187_v25  ;;  %v4054_v25 = vld [vmem:[#allocation17_spill] sm:$0xff] }
 0x1ad   :  { %2700 = vmatprep.mubr.msk.f32.mxu1 %vm161_vm0, %v3192_v28 }
 0x1b0   :  { %2701 = vmatmul.mubr.msk.f32.gmra.mrb[6].mxu1 %vm161_vm0, %v3201_v33 }
 0x1b1   :  { %2703 = vmatprep.mubr.msk.f32.mxu1 %vm161_vm0, %v3206_v36 }
 0x1b4   :  { %2704 = vmatmul.mubr.msk.f32.gmra.mrb[8].mxu1 %vm161_vm0, %v3215_v41 }
 0x1b5   :  { %2706 = vmatprep.mubr.msk.f32.mxu1 %vm161_vm0, %v3220_v44 }
 0x1b7   :  { %v2543_v3 = vpop.f32.mrb[64].mxu0 }
 0x1b8   :  { %v1071_v6 = vpop.f32.mrb[65].mxu0  ;;  %2707 = vmatmul.mubr.msk.f32.gmra.mrb[10].mxu1 %vm161_vm0, %v3229_v49  ;;  %v1077_v45 = vadd.f32 %v2543_v3, %v3715_v60 }
 0x1b9   :  { %2709 = vmatprep.mubr.msk.f32.mxu1 %vm161_vm0, %v3234_v52  ;;  %v1072_v29 = vadd.f32 %v3715_v60, %v1071_v6 }
 0x1bb   :  { %v2546_v7 = vpop.f32.mrb[66].mxu0 }
 0x1bc   :  { %v1081_v10 = vpop.f32.mrb[67].mxu0  ;;  %2710 = vmatmul.mubr.msk.f32.gmra.mrb[12].mxu1 %vm161_vm0, %v3243_v57  ;;  %v1087_v40 = vadd.f32 %v2546_v7, %v3715_v60 }
 0x1bd   :  { %2712 = vmatprep.mubr.msk.f32.mxu1 %vm161_vm0, %v3254_v0  ;;  %v1082_v37 = vadd.f32 %v3715_v60, %v1081_v10 }
 0x1bf   :  { %v2549_v11 = vpop.f32.mrb[68].mxu0 }
 0x1c0   :  { %v3624_v14 = vpop.f32.mrb[69].mxu0  ;;  %2713 = vmatmul.mubr.msk.f32.gmra.mrb[14].mxu1 %vm161_vm0, %v3263_v13  ;;  %v1097_v56 = vadd.f32 %v2549_v11, %v3715_v60 }
 0x1c1   :  { %2715 = vmatprep.mubr.msk.f32.mxu1 %vm161_vm0, %v4039_v15  ;;  %v1092_v8 = vadd.f32 %v3715_v60, %v3624_v14 }
 0x1c3   :  { %v3630_v18 = vpop.f32.mrb[70].mxu0 }
 0x1c4   :  { %v3632_v19 = vpop.f32.mrb[71].mxu0  ;;  %2716 = vmatmul.mubr.msk.f32.gmra.mrb[16].mxu1 %vm161_vm0, %v4040_v22  ;;  %v1107_v10 = vadd.f32 %v3630_v18, %v3715_v60 }
 0x1c5   :  { %2718 = vmatprep.mubr.msk.f32.mxu1 %vm161_vm0, %v4041_v23  ;;  %v1102_v11 = vadd.f32 %v3715_v60, %v3632_v19 }
 0x1c7   :  { %v3638_v26 = vpop.f32.mrb[72].mxu0 }
 0x1c8   :  { %v3640_v27 = vpop.f32.mrb[73].mxu0  ;;  %2719 = vmatmul.mubr.msk.f32.gmra.mrb[18].mxu1 %vm161_vm0, %v4042_v30  ;;  %v1117_v30 = vadd.f32 %v3638_v26, %v3715_v60 }
 0x1c9   :  { %2721 = vmatprep.mubr.msk.f32.mxu1 %vm161_vm0, %v4043_v31  ;;  %v1112_v18 = vadd.f32 %v3715_v60, %v3640_v27 }
 0x1cb   :  { %v3646_v34 = vpop.f32.mrb[74].mxu0 }
 0x1cc   :  { %v3648_v35 = vpop.f32.mrb[75].mxu0  ;;  %2722 = vmatmul.mubr.msk.f32.gmra.mrb[20].mxu1 %vm161_vm0, %v4044_v38 }
 0x1cd   :  { %2724 = vmatprep.mubr.msk.f32.mxu1 %vm161_vm0, %v4045_v39  ;;  %v1122_v26 = vadd.f32 %v3715_v60, %v3648_v35 }
 0x1cf   :  { %v3654_v42 = vpop.f32.mrb[76].mxu0 }
 0x1d0   :  { %v3656_v43 = vpop.f32.mrb[77].mxu0  ;;  %2725 = vmatmul.mubr.msk.f32.gmra.mrb[22].mxu1 %vm161_vm0, %v4046_v46  ;;  %v1127_v46 = vadd.f32 %v3646_v34, %v3715_v60 }
 0x1d1   :  { %2727 = vmatprep.mubr.msk.f32.mxu1 %vm161_vm0, %v4047_v47  ;;  %v1132_v34 = vadd.f32 %v3715_v60, %v3656_v43 }
 0x1d3   :  { %v3662_v50 = vpop.f32.mrb[78].mxu0 }
 0x1d4   :  { %v3664_v51 = vpop.f32.mrb[79].mxu0  ;;  %2728 = vmatmul.mubr.msk.f32.gmra.mrb[24].mxu1 %vm161_vm0, %v4048_v54 }
 0x1d5   :  { %2730 = vmatprep.mubr.msk.f32.mxu1 %vm161_vm0, %v4049_v55 }
 0x1d7   :  { %v3670_v58 = vpop.f32.mrb[80].mxu0 }
 0x1d8   :  { %v3672_v59 = vpop.f32.mrb[81].mxu0  ;;  %2731 = vmatmul.mubr.msk.f32.gmra.mrb[26].mxu1 %vm161_vm0, %v4050_v62  ;;  %v1137_v62 = vadd.f32 %v3654_v42, %v3715_v60  ;;  %v1142_v42 = vadd.f32 %v3715_v60, %v3664_v51 }
 0x1d9   :  { %2733 = vmatprep.mubr.msk.f32.mxu1 %vm161_vm0, %v4051_v63 }
 0x1db   :  { %v3678_v2 = vpop.f32.mrb[82].mxu0 }
 0x1dc   :  { %v3680_v4 = vpop.f32.mrb[83].mxu0  ;;  %2734 = vmatmul.mubr.msk.f32.gmra.mrb[28].mxu1 %vm161_vm0, %v4052_v9 }
 0x1dd   :  { %2736 = vmatprep.mubr.msk.f32.mxu1 %vm161_vm0, %v4053_v12 }
 0x1df   :  { %v3686_v17 = vpop.f32.mrb[84].mxu0 }
 0x1e0   :  { %v3688_v20 = vpop.f32.mrb[85].mxu0  ;;  %2737 = vmatmul.mubr.msk.f32.gmra.mrb[30].mxu1 %vm161_vm0, %v4054_v25  ;;  %v1147_v25 = vadd.f32 %v3662_v50, %v3715_v60  ;;  %v1152_v50 = vadd.f32 %v3715_v60, %v3672_v59 }
 0x1e3   :  { %v3692_v28 = vpop.f32.mrb[86].mxu0 }
 0x1e4   :  { %v3694_v33 = vpop.f32.mrb[87].mxu0 }
 0x1e7   :  { %v3696_v36 = vpop.f32.mrb[88].mxu0 }
 0x1e8   :  { %v3698_v41 = vpop.f32.mrb[89].mxu0 }
 0x1eb   :  { %v3700_v44 = vpop.f32.mrb[90].mxu0 }
 0x1ec   :  { %v3702_v49 = vpop.f32.mrb[91].mxu0 }
 0x1ef   :  { %v3704_v52 = vpop.f32.mrb[92].mxu0 }
 0x1f0   :  { %v3706_v57 = vpop.f32.mrb[93].mxu0 }
 0x1f3   :  { %v3708_v0 = vpop.f32.mrb[94].mxu0 }
 0x1f4   :  { %v3710_v13 = vpop.f32.mrb[95].mxu0 }
 0x237   :  { %v2645_v61 = vpop.f32.mrb[32].mxu1 }
 0x238   :  { %v1657_v48 = vadd.f32 %v2645_v61, %v1077_v45  ;;  %v1651_v53 = vpop.f32.mrb[33].mxu1 }
 0x239   :  { %v1652_v5 = vadd.f32 %v1651_v53, %v1072_v29 }
 0x23a   :  { %1971 = vst [vmem:[%s4006_s6 + $0x8] sm:$0xff] %v1657_v48  ;;  %v1157_v48 = vadd.f32 %v3670_v58, %v3715_v60  ;;  %v1162_v58 = vadd.f32 %v3715_v60, %v3680_v4 }
 0x23b   :  { %1970 = vst [vmem:[%s4006_s6] sm:$0xff] %v1652_v5  ;;  %v2648_v32 = vpop.f32.mrb[34].mxu1 }
 0x23c   :  { %v1667_v16 = vadd.f32 %v2648_v32, %v1087_v40  ;;  %v1661_v1 = vpop.f32.mrb[35].mxu1 }
 0x23d   :  { %v1662_v24 = vadd.f32 %v1661_v1, %v1082_v37  ;;  %v1167_v37 = vadd.f32 %v3678_v2, %v3715_v60  ;;  %v1172_v2 = vadd.f32 %v3715_v60, %v3688_v20 }
 0x23e   :  { %1973 = vst [vmem:[%s4006_s6 + $0x18] sm:$0xff] %v1667_v16 }
 0x23f   :  { %1972 = vst [vmem:[%s4006_s6 + $0x10] sm:$0xff] %v1662_v24  ;;  %v2651_v21 = vpop.f32.mrb[36].mxu1  ;;  %v1177_v24 = vadd.f32 %v3686_v17, %v3715_v60  ;;  %v1182_v17 = vadd.f32 %v3715_v60, %v3694_v33 }
 0x240   :  { %v1677_v3 = vadd.f32 %v2651_v21, %v1097_v56  ;;  %v1671_v6 = vpop.f32.mrb[37].mxu1 }
 0x241   :  { %v1672_v7 = vadd.f32 %v1671_v6, %v1092_v8 }
 0x242   :  { %1975 = vst [vmem:[%s4006_s6 + $0x28] sm:$0xff] %v1677_v3  ;;  %v1187_v3 = vadd.f32 %v3692_v28, %v3715_v60  ;;  %v1192_v28 = vadd.f32 %v3715_v60, %v3698_v41 }
 0x243   :  { %1974 = vst [vmem:[%s4006_s6 + $0x20] sm:$0xff] %v1672_v7  ;;  %v2654_v14 = vpop.f32.mrb[38].mxu1 }
 0x244   :  { %v1687_v15 = vadd.f32 %v2654_v14, %v1107_v10  ;;  %v1681_v22 = vpop.f32.mrb[39].mxu1 }
 0x245   :  { %v1682_v23 = vadd.f32 %v1681_v22, %v1102_v11  ;;  %v1197_v11 = vadd.f32 %v3696_v36, %v3715_v60  ;;  %v1202_v36 = vadd.f32 %v3715_v60, %v3702_v49 }
 0x246   :  { %1977 = vst [vmem:[%s4006_s6 + $0x38] sm:$0xff] %v1687_v15 }
 0x247   :  { %1976 = vst [vmem:[%s4006_s6 + $0x30] sm:$0xff] %v1682_v23  ;;  %v2657_v19 = vpop.f32.mrb[40].mxu1  ;;  %v1207_v23 = vadd.f32 %v3700_v44, %v3715_v60  ;;  %v1212_v44 = vadd.f32 %v3715_v60, %v3706_v57 }
 0x248   :  { %v1697_v31 = vadd.f32 %v2657_v19, %v1117_v30  ;;  %v1691_v38 = vpop.f32.mrb[41].mxu1 }
 0x249   :  { %v1692_v39 = vadd.f32 %v1691_v38, %v1112_v18 }
 0x24a   :  { %1979 = vst [vmem:[%s4006_s6 + $0x48] sm:$0xff] %v1697_v31  ;;  %v1217_v31 = vadd.f32 %v3704_v52, %v3715_v60  ;;  %v1222_v52 = vadd.f32 %v3715_v60, %v3710_v13 }
 0x24b   :  { %1978 = vst [vmem:[%s4006_s6 + $0x40] sm:$0xff] %v1692_v39  ;;  %v2660_v27 = vpop.f32.mrb[42].mxu1 }
 0x24c   :  { %v1707_v47 = vadd.f32 %v2660_v27, %v1127_v46  ;;  %v1701_v54 = vpop.f32.mrb[43].mxu1 }
 0x24d   :  { %v1702_v55 = vadd.f32 %v1701_v54, %v1122_v26  ;;  %v1227_v26 = vadd.f32 %v3708_v0, %v3715_v60 }
 0x24e   :  { %1981 = vst [vmem:[%s4006_s6 + $0x58] sm:$0xff] %v1707_v47 }
 0x24f   :  { %1980 = vst [vmem:[%s4006_s6 + $0x50] sm:$0xff] %v1702_v55  ;;  %v2663_v35 = vpop.f32.mrb[44].mxu1 }
 0x250   :  { %v1717_v63 = vadd.f32 %v2663_v35, %v1137_v62  ;;  %v1711_v9 = vpop.f32.mrb[45].mxu1 }
 0x251   :  { %v1712_v12 = vadd.f32 %v1711_v9, %v1132_v34 }
 0x252   :  { %1983 = vst [vmem:[%s4006_s6 + $0x68] sm:$0xff] %v1717_v63 }
 0x253   :  { %1982 = vst [vmem:[%s4006_s6 + $0x60] sm:$0xff] %v1712_v12  ;;  %v2666_v43 = vpop.f32.mrb[46].mxu1 }
 0x254   :  { %v1727_v45 = vadd.f32 %v2666_v43, %v1147_v25  ;;  %v1721_v29 = vpop.f32.mrb[47].mxu1 }
 0x255   :  { %v1722_v61 = vadd.f32 %v1721_v29, %v1142_v42 }
 0x256   :  { %1985 = vst [vmem:[%s4006_s6 + $0x78] sm:$0xff] %v1727_v45 }
 0x257   :  { %1984 = vst [vmem:[%s4006_s6 + $0x70] sm:$0xff] %v1722_v61  ;;  %v2669_v51 = vpop.f32.mrb[48].mxu1 }
 0x258   :  { %v1737_v53 = vadd.f32 %v2669_v51, %v1157_v48  ;;  %v1731_v5 = vpop.f32.mrb[49].mxu1 }
 0x259   :  { %v1732_v40 = vadd.f32 %v1731_v5, %v1152_v50 }
 0x25a   :  { %1987 = vst [vmem:[%s4006_s6 + $0x88] sm:$0xff] %v1737_v53 }
 0x25b   :  { %1986 = vst [vmem:[%s4006_s6 + $0x80] sm:$0xff] %v1732_v40  ;;  %v2672_v59 = vpop.f32.mrb[50].mxu1 }
 0x25c   :  { %v1747_v32 = vadd.f32 %v2672_v59, %v1167_v37  ;;  %v1741_v16 = vpop.f32.mrb[51].mxu1 }
 0x25d   :  { %v1742_v1 = vadd.f32 %v1741_v16, %v1162_v58 }
 0x25e   :  { %1989 = vst [vmem:[%s4006_s6 + $0x98] sm:$0xff] %v1747_v32 }
 0x25f   :  { %1988 = vst [vmem:[%s4006_s6 + $0x90] sm:$0xff] %v1742_v1  ;;  %v2675_v4 = vpop.f32.mrb[52].mxu1 }
 0x260   :  { %v1757_v56 = vadd.f32 %v2675_v4, %v1177_v24  ;;  %v1751_v8 = vpop.f32.mrb[53].mxu1 }
 0x261   :  { %v1752_v21 = vadd.f32 %v1751_v8, %v1172_v2 }
 0x262   :  { %1991 = vst [vmem:[%s4006_s6 + $0xa8] sm:$0xff] %v1757_v56 }
 0x263   :  { %1990 = vst [vmem:[%s4006_s6 + $0xa0] sm:$0xff] %v1752_v21  ;;  %v2678_v20 = vpop.f32.mrb[54].mxu1 }
 0x264   :  { %v1767_v6 = vadd.f32 %v2678_v20, %v1187_v3  ;;  %v1761_v7 = vpop.f32.mrb[55].mxu1 }
 0x265   :  { %v1762_v10 = vadd.f32 %v1761_v7, %v1182_v17 }
 0x266   :  { %1993 = vst [vmem:[%s4006_s6 + $0xb8] sm:$0xff] %v1767_v6 }
 0x267   :  { %1992 = vst [vmem:[%s4006_s6 + $0xb0] sm:$0xff] %v1762_v10  ;;  %v2681_v33 = vpop.f32.mrb[56].mxu1 }
 0x268   :  { %v1777_v14 = vadd.f32 %v2681_v33, %v1197_v11  ;;  %v1771_v15 = vpop.f32.mrb[57].mxu1 }
 0x269   :  { %v1772_v22 = vadd.f32 %v1771_v15, %v1192_v28 }
 0x26a   :  { %1995 = vst [vmem:[%s4006_s6 + $0xc8] sm:$0xff] %v1777_v14 }
 0x26b   :  { %1994 = vst [vmem:[%s4006_s6 + $0xc0] sm:$0xff] %v1772_v22  ;;  %v2684_v41 = vpop.f32.mrb[58].mxu1 }
 0x26c   :  { %v1787_v30 = vadd.f32 %v2684_v41, %v1207_v23  ;;  %v1781_v18 = vpop.f32.mrb[59].mxu1 }
 0x26d   :  { %v1782_v19 = vadd.f32 %v1781_v18, %v1202_v36 }
 0x26e   :  { %1997 = vst [vmem:[%s4006_s6 + $0xd8] sm:$0xff] %v1787_v30 }
 0x26f   :  { %1996 = vst [vmem:[%s4006_s6 + $0xd0] sm:$0xff] %v1782_v19  ;;  %v2687_v49 = vpop.f32.mrb[60].mxu1 }
 0x270   :  { %v1797_v38 = vadd.f32 %v2687_v49, %v1217_v31  ;;  %v1791_v39 = vpop.f32.mrb[61].mxu1 }
 0x271   :  { %v1792_v46 = vadd.f32 %v1791_v39, %v1212_v44 }
 0x272   :  { %1999 = vst [vmem:[%s4006_s6 + $0xe8] sm:$0xff] %v1797_v38 }
 0x273   :  { %1998 = vst [vmem:[%s4006_s6 + $0xe0] sm:$0xff] %v1792_v46  ;;  %v2690_v57 = vpop.f32.mrb[62].mxu1 }
 0x274   :  { %v1807_v27 = vadd.f32 %v2690_v57, %v1227_v26  ;;  %v1801_v47 = vpop.f32.mrb[63].mxu1 }
 0x275   :  { %v1802_v54 = vadd.f32 %v1801_v47, %v1222_v52 }
 0x276   :  { %2001 = vst [vmem:[%s4006_s6 + $0xf8] sm:$0xff] %v1807_v27 }
 0x277   :  { %2000 = vst [vmem:[%s4006_s6 + $0xf0] sm:$0xff] %v1802_v54  ;;  %v2693_v0 = vpop.f32.mrb[0].mxu1 }
 0x278   :  { %v2819_v55 = vadd.f32 %v2693_v0, %v3715_v60  ;;  %v1811_v13 = vpop.f32.mrb[1].mxu1 }
 0x279   :  { %v2820_v62 = vadd.f32 %v3715_v60, %v1811_v13 }
 0x27a   :  { %2003 = vst [vmem:[%s4006_s6 + $0x108] sm:$0xff] %v2819_v55 }
 0x27b   :  { %2002 = vst [vmem:[%s4006_s6 + $0x100] sm:$0xff] %v2820_v62  ;;  %v2696_v34 = vpop.f32.mrb[2].mxu1 }
 0x27c   :  { %v2821_v35 = vadd.f32 %v2696_v34, %v3715_v60  ;;  %v1821_v63 = vpop.f32.mrb[3].mxu1 }
 0x27d   :  { %v2822_v9 = vadd.f32 %v3715_v60, %v1821_v63 }
 0x27e   :  { %2005 = vst [vmem:[%s4006_s6 + $0x118] sm:$0xff] %v2821_v35 }
 0x27f   :  { %2004 = vst [vmem:[%s4006_s6 + $0x110] sm:$0xff] %v2822_v9  ;;  %v2699_v12 = vpop.f32.mrb[4].mxu1 }
 0x280   :  { %v2823_v25 = vadd.f32 %v2699_v12, %v3715_v60  ;;  %v1831_v42 = vpop.f32.mrb[5].mxu1 }
 0x281   :  { %v2824_v43 = vadd.f32 %v3715_v60, %v1831_v42 }
 0x282   :  { %2007 = vst [vmem:[%s4006_s6 + $0x128] sm:$0xff] %v2823_v25 }
 0x283   :  { %2006 = vst [vmem:[%s4006_s6 + $0x120] sm:$0xff] %v2824_v43  ;;  %v2702_v45 = vpop.f32.mrb[6].mxu1 }
 0x284   :  { %v2825_v29 = vadd.f32 %v2702_v45, %v3715_v60  ;;  %v1841_v61 = vpop.f32.mrb[7].mxu1 }
 0x285   :  { %v2826_v48 = vadd.f32 %v3715_v60, %v1841_v61 }
 0x286   :  { %2009 = vst [vmem:[%s4006_s6 + $0x138] sm:$0xff] %v2825_v29 }
 0x287   :  { %2008 = vst [vmem:[%s4006_s6 + $0x130] sm:$0xff] %v2826_v48  ;;  %v2705_v50 = vpop.f32.mrb[8].mxu1 }
 0x288   :  { %v2827_v51 = vadd.f32 %v2705_v50, %v3715_v60  ;;  %v1851_v53 = vpop.f32.mrb[9].mxu1 }
 0x289   :  { %v2828_v5 = vadd.f32 %v3715_v60, %v1851_v53 }
 0x28a   :  { %2011 = vst [vmem:[%s4006_s6 + $0x148] sm:$0xff] %v2827_v51 }
 0x28b   :  { %2010 = vst [vmem:[%s4006_s6 + $0x140] sm:$0xff] %v2828_v5  ;;  %v2708_v40 = vpop.f32.mrb[10].mxu1 }
 0x28c   :  { %v2829_v37 = vadd.f32 %v2708_v40, %v3715_v60  ;;  %v1861_v58 = vpop.f32.mrb[11].mxu1 }
 0x28d   :  { %v2830_v59 = vadd.f32 %v3715_v60, %v1861_v58 }
 0x28e   :  { %2013 = vst [vmem:[%s4006_s6 + $0x158] sm:$0xff] %v2829_v37 }
 0x28f   :  { %2012 = vst [vmem:[%s4006_s6 + $0x150] sm:$0xff] %v2830_v59  ;;  %v2711_v32 = vpop.f32.mrb[12].mxu1 }
 0x290   :  { %v2831_v16 = vadd.f32 %v2711_v32, %v3715_v60  ;;  %v1871_v1 = vpop.f32.mrb[13].mxu1 }
 0x291   :  { %v2832_v24 = vadd.f32 %v3715_v60, %v1871_v1 }
 0x292   :  { %2015 = vst [vmem:[%s4006_s6 + $0x168] sm:$0xff] %v2831_v16 }
 0x293   :  { %2014 = vst [vmem:[%s4006_s6 + $0x160] sm:$0xff] %v2832_v24  ;;  %v2714_v2 = vpop.f32.mrb[14].mxu1 }
 0x294   :  { %v2833_v4 = vadd.f32 %v2714_v2, %v3715_v60  ;;  %v1881_v56 = vpop.f32.mrb[15].mxu1 }
 0x295   :  { %v2834_v8 = vadd.f32 %v3715_v60, %v1881_v56 }
 0x296   :  { %2017 = vst [vmem:[%s4006_s6 + $0x178] sm:$0xff] %v2833_v4 }
 0x297   :  { %2016 = vst [vmem:[%s4006_s6 + $0x170] sm:$0xff] %v2834_v8  ;;  %v2717_v21 = vpop.f32.mrb[16].mxu1 }
 0x298   :  { %v2835_v3 = vadd.f32 %v2717_v21, %v3715_v60  ;;  %v1891_v17 = vpop.f32.mrb[17].mxu1 }
 0x299   :  { %v2836_v20 = vadd.f32 %v3715_v60, %v1891_v17 }
 0x29a   :  { %2019 = vst [vmem:[%s4006_s6 + $0x188] sm:$0xff] %v2835_v3 }
 0x29b   :  { %2018 = vst [vmem:[%s4006_s6 + $0x180] sm:$0xff] %v2836_v20  ;;  %v2720_v6 = vpop.f32.mrb[18].mxu1 }
 0x29c   :  { %v2837_v7 = vadd.f32 %v2720_v6, %v3715_v60  ;;  %v1901_v10 = vpop.f32.mrb[19].mxu1 }
 0x29d   :  { %v2838_v11 = vadd.f32 %v3715_v60, %v1901_v10 }
 0x29e   :  { %2021 = vst [vmem:[%s4006_s6 + $0x198] sm:$0xff] %v2837_v7 }
 0x29f   :  { %2020 = vst [vmem:[%s4006_s6 + $0x190] sm:$0xff] %v2838_v11  ;;  %v2723_v28 = vpop.f32.mrb[20].mxu1 }
 0x2a0   :  { %v2839_v33 = vadd.f32 %v2723_v28, %v3715_v60  ;;  %v1911_v14 = vpop.f32.mrb[21].mxu1 }
 0x2a1   :  { %v2840_v15 = vadd.f32 %v3715_v60, %v1911_v14 }
 0x2a2   :  { %2023 = vst [vmem:[%s4006_s6 + $0x1a8] sm:$0xff] %v2839_v33 }
 0x2a3   :  { %2022 = vst [vmem:[%s4006_s6 + $0x1a0] sm:$0xff] %v2840_v15  ;;  %v2726_v22 = vpop.f32.mrb[22].mxu1 }
 0x2a4   :  { %v2841_v23 = vadd.f32 %v2726_v22, %v3715_v60  ;;  %v1921_v36 = vpop.f32.mrb[23].mxu1 }
 0x2a5   :  { %v2842_v41 = vadd.f32 %v3715_v60, %v1921_v36 }
 0x2a6   :  { %2025 = vst [vmem:[%s4006_s6 + $0x1b8] sm:$0xff] %v2841_v23 }
 0x2a7   :  { %2024 = vst [vmem:[%s4006_s6 + $0x1b0] sm:$0xff] %v2842_v41  ;;  %v2729_v30 = vpop.f32.mrb[24].mxu1 }
 0x2a8   :  { %v2843_v18 = vadd.f32 %v2729_v30, %v3715_v60  ;;  %v1931_v19 = vpop.f32.mrb[25].mxu1 }
 0x2a9   :  { %v2844_v31 = vadd.f32 %v3715_v60, %v1931_v19 }
 0x2aa   :  { %2027 = vst [vmem:[%s4006_s6 + $0x1c8] sm:$0xff] %v2843_v18 }
 0x2ab   :  { %2026 = vst [vmem:[%s4006_s6 + $0x1c0] sm:$0xff] %v2844_v31  ;;  %v2732_v44 = vpop.f32.mrb[26].mxu1 }
 0x2ac   :  { %v2845_v49 = vadd.f32 %v2732_v44, %v3715_v60  ;;  %v1941_v38 = vpop.f32.mrb[27].mxu1 }
 0x2ad   :  { %v2846_v39 = vadd.f32 %v3715_v60, %v1941_v38 }
 0x2ae   :  { %2029 = vst [vmem:[%s4006_s6 + $0x1d8] sm:$0xff] %v2845_v49 }
 0x2af   :  { %2028 = vst [vmem:[%s4006_s6 + $0x1d0] sm:$0xff] %v2846_v39  ;;  %v2735_v46 = vpop.f32.mrb[28].mxu1 }
 0x2b0   :  { %v2847_v26 = vadd.f32 %v2735_v46, %v3715_v60  ;;  %v1951_v52 = vpop.f32.mrb[29].mxu1 }
 0x2b1   :  { %v2848_v57 = vadd.f32 %v3715_v60, %v1951_v52 }
 0x2b2   :  { %2031 = vst [vmem:[%s4006_s6 + $0x1e8] sm:$0xff] %v2847_v26 }
 0x2b3   :  { %2030 = vst [vmem:[%s4006_s6 + $0x1e0] sm:$0xff] %v2848_v57  ;;  %v2738_v27 = vpop.f32.mrb[30].mxu1 }
 0x2b4   :  { %v2849_v47 = vadd.f32 %v2738_v27, %v3715_v60  ;;  %v1961_v54 = vpop.f32.mrb[31].mxu1 }
 0x2b5   :  { %v2850_v0 = vadd.f32 %v3715_v60, %v1961_v54 }
 0x2b6   :  { %2033 = vst [vmem:[%s4006_s6 + $0x1f8] sm:$0xff] %v2849_v47 }
 0x2b7   :  { %2032 = vst [vmem:[%s4006_s6 + $0x1f0] sm:$0xff] %v2850_v0 }

// kernel: feature_interpolator_forward.3
= control target key start
LH: loop header
LB: loop body
LE: loop exit
PB: predicated region body
PF: predicated region fallthrough
CT: control target
= control target key end

     0   :  { %s5282_s22 = smov 0   ;;  %s5284_s23 = smov 0   ;;  %s7259_s0 = inlined_call_operand.vmem [shape: f32[2,64,3], index: 0, kind: input, shape index: {}]   ;;  %s7260_s1 = inlined_call_operand.vmem [shape: f32[2,64,128], index: 1, kind: input, shape index: {}]   ;;  %s7261_s2 = inlined_call_operand.vmem [shape: bf16[2,64,128], index: 2, kind: input, shape index: {}]   ;;  %s7262_s3 = inlined_call_operand.vmem [shape: s32[2,64], index: 3, kind: input, shape index: {}]   ;;  %s7263_s4 = inlined_call_operand.vmem [shape: s32[1,128], index: 4, kind: input, shape index: {}]   ;;  %s7264_s5 = inlined_call_operand.vmem [shape: f32[128,16], index: 5, kind: input, shape index: {}]   ;;  %s7265_s6 = inlined_call_operand.vmem [shape: s32[2,1,128], index: 6, kind: input, shape index: {}]   ;;  %s7266_s7 = inlined_call_operand.vmem [shape: bf16[2,128,128], index: 7, kind: input, shape index: {}]   ;;  %s7267_s8 = inlined_call_operand.vmem [shape: f32[16,16], index: 8, kind: input, shape index: {}]   ;;  %s7268_s9 = inlined_call_operand.vmem [shape: f32[1,16], index: 9, kind: input, shape index: {}]   ;;  %s7269_s10 = inlined_call_operand.vmem [shape: f32[16,32], index: 10, kind: input, shape index: {}]   ;;  %s7270_s11 = inlined_call_operand.vmem [shape: f32[1,32], index: 11, kind: input, shape index: {}]   ;;  %s7271_s12 = inlined_call_operand.vmem [shape: f32[16,32], index: 12, kind: input, shape index: {}]   ;;  %s7272_s13 = inlined_call_operand.vmem [shape: f32[32,29], index: 13, kind: input, shape index: {}]   ;;  %s7273_s14 = inlined_call_operand.vmem [shape: f32[128,29], index: 14, kind: input, shape index: {}]   ;;  %s7274_s15 = inlined_call_operand.vmem [shape: f32[1,29], index: 15, kind: input, shape index: {}]   ;;  %s7275_s16 = inlined_call_operand.vmem [shape: f32[29,128], index: 16, kind: input, shape index: {}]   ;;  %s7276_s17 = inlined_call_operand.vmem [shape: f32[1,128], index: 17, kind: input, shape index: {}]   ;;  %s7277_s18 = inlined_call_operand.vmem [shape: f32[32,128], index: 18, kind: input, shape index: {}]   ;;  %s7278_s19 = inlined_call_operand.vmem [shape: f32[128,128], index: 19, kind: input, shape index: {}]   ;;  %s7279_s20 = inlined_call_operand.vmem [shape: f32[2,64,128], index: 20, kind: output, shape index: {}]  }
   0x1   :  { %7315 = sst [smem:[#allocation30_spill]] %s7259_s0 }
   0x2   :  { %7316 = sst [smem:[#allocation31_spill]] %s7260_s1  ;;  %s5280_s1 = smov 0  }
   0x3   :  { %7317 = sst [smem:[#allocation32_spill]] %s7261_s2 }
   0x4   :  { %7318 = sst [smem:[#allocation33_spill]] %s7262_s3 }
   0x5   :  { %7319 = sst [smem:[#allocation34_spill]] %s7263_s4 }
   0x6 LB: > { %s42_s24 = sadd.s32 1, %s5163_s22  ;;  %p4304_p0 = scmp.ge.s32.totalorder %s5167_s23, 1  ;;  %s5167_s23 = sphi %s5284_s23, %s30_s23   ;;  %s5163_s22 = sphi %s5282_s22, %s7395_s22   ;;  %s5159_s1 = sphi %s5280_s1, %s7394_s1  }
   0x7   : > { %p44_p1 = scmp.ge.s32.totalorder %s42_s24, 2  ;;  %p628_p2 = scmp.lt.s32.totalorder %s5167_s23, 3 }
   0x9   : > { %s7397_s24 = smov (%p44_p1, %s42_s24), 0  ;;  %p629_p3 = pnand %p4304_p0, %p628_p2 }
   0xb   : > { %632 = sbr.rel (%p629_p3) target bundleno = 1705 (0x6a9), region = 100 }
  0x12   : > { %p717_p4 = scmp.lt.s32.totalorder %s5159_s1, 1  ;;  %v5169_v0 = vmov 1   ;;  %s7320_s26 = sld [smem:[#allocation30_spill]]  ;;  %vm1254_vm12 = vcmask 523264  }
  0x13   : > { %5114 = vset.pattern.permute.xlu1 %v5169_v0  ;;  %5113 = vset.pattern.permute.xlu0 %v5169_v0  ;;  %s7321_s25 = sld [smem:[#allocation32_spill]] }
  0x14   : > { %s7399_s1 = smov (!%p717_p4, %s5159_s1), 1 }
  0x15   : > { %s5303_s2 = sshll.u32 %s7399_s1, 6  ;;  %s4416_s30 = sshll.u32 %s7399_s1, 5 }
  0x16   : > { %s5331_s29 = scalar_lea.vmem %s7266_s7, %s5303_s2 }
  0x18   : > { %s5309_s27 = scalar_lea.vmem %s7320_s26, %s5303_s2  ;;  %s5172_s26 = smov 127  }
  0x19   : > { %v5312_v1 = vld [vmem:[%s5309_s27 + $0x8] sm:$0xff]  ;;  %v5315_v2 = vld [vmem:[%s5309_s27] sm:$0xff]  ;;  %v5318_v3 = vld [vmem:[%s5309_s27 + $0x10] sm:$0xff]  ;;  %s740_s3 = scalar_lea.vmem %s7321_s25, %s4416_s30  ;;  %s7322_s30 = sld [smem:[#allocation33_spill]] }
  0x1a   : > { %v4316_v4 = vadd.f32 0.5, %v5312_v1  ;;  %v4315_v5 = vadd.f32 0.5, %v5315_v2  ;;  %v4317_v6 = vadd.f32 0.5, %v5318_v3  ;;  %v5324_v7 = vld [vmem:[%s5309_s27 + $0x18] sm:$0xff]  ;;  %v765_v8 = vld [vmem:[%s5309_s27 + $0x28] sm:$0xff]  ;;  %v5336_v12 = vld [vmem:[%s5309_s27 + $0x30] sm:$0xff] }
  0x1b   : > { %v4318_v9 = vadd.f32 0.5, %v5324_v7  ;;  %v4320_v10 = vadd.f32 0.5, %v765_v8  ;;  %v767_v11 = vld [vmem:[%s5309_s27 + $0x38] sm:$0xff]  ;;  %v4321_v19 = vadd.f32 0.5, %v5336_v12  ;;  %v5340_v39 = vld [vmem:[%s5309_s27 + $0x20] sm:$0xff]  ;;  %s5173_s25 = smov 126  }
  0x1c   : > { %v777_v13 = vmul.f32 2.0, %v4316_v4  ;;  %v776_v14 = vmul.f32 2.0, %v4315_v5  ;;  %v778_v15 = vmul.f32 2.0, %v4317_v6  ;;  %v4322_v16 = vadd.f32 0.5, %v767_v11 }
  0x1d   : > { %v779_v17 = vmul.f32 2.0, %v4318_v9  ;;  %v781_v18 = vmul.f32 2.0, %v4320_v10  ;;  %v782_v25 = vmul.f32 2.0, %v4321_v19  ;;  %v4319_v53 = vadd.f32 0.5, %v5340_v39 }
  0x1e   : > { %v4324_v20 = vadd.f32 -1.0, %v777_v13  ;;  %v4323_v21 = vadd.f32 -1.0, %v776_v14  ;;  %v4325_v22 = vadd.f32 -1.0, %v778_v15  ;;  %v783_v29 = vmul.f32 2.0, %v4322_v16 }
  0x1f   : > { %v4326_v23 = vadd.f32 -1.0, %v779_v17  ;;  %v4328_v24 = vadd.f32 -1.0, %v781_v18  ;;  %v4329_v32 = vadd.f32 -1.0, %v782_v25  ;;  %v780_v4 = vmul.f32 2.0, %v4319_v53 }
  0x20   : > { %v793_v26 = vadd.f32 1.0, %v4324_v20  ;;  %v792_v27 = vadd.f32 1.0, %v4323_v21  ;;  %v794_v28 = vadd.f32 1.0, %v4325_v22  ;;  %v4330_v43 = vadd.f32 -1.0, %v783_v29 }
  0x21   : > { %v795_v30 = vadd.f32 1.0, %v4326_v23  ;;  %v797_v31 = vadd.f32 1.0, %v4328_v24  ;;  %v798_v38 = vadd.f32 1.0, %v4329_v32  ;;  %v4327_v21 = vadd.f32 -1.0, %v780_v4 }
  0x22   : > { %v801_v33 = vmul.f32 8.0, %v793_v26  ;;  %v800_v34 = vmul.f32 8.0, %v792_v27  ;;  %v802_v35 = vmul.f32 8.0, %v794_v28  ;;  %v799_v57 = vadd.f32 1.0, %v4330_v43 }
  0x23   : > { %v803_v36 = vmul.f32 8.0, %v795_v30  ;;  %v805_v37 = vmul.f32 8.0, %v797_v31  ;;  %v806_v46 = vmul.f32 8.0, %v798_v38  ;;  %v5170_v26 = vmov 2  }
  0x24   : > { %v4332_v40 = vadd.f32 -1.0, %v801_v33  ;;  %v4331_v41 = vadd.f32 -1.0, %v800_v34  ;;  %v4333_v42 = vadd.f32 -1.0, %v802_v35  ;;  %v807_v9 = vmul.f32 8.0, %v799_v57 }
  0x25   : > { %v4334_v44 = vadd.f32 -1.0, %v803_v36  ;;  %v4336_v45 = vadd.f32 -1.0, %v805_v37  ;;  %v4337_v52 = vadd.f32 -1.0, %v806_v46  ;;  %v796_v29 = vadd.f32 1.0, %v4327_v21 }
  0x26   : > { %v817_v47 = vmul.f32 0.5, %v4332_v40  ;;  %v816_v48 = vmul.f32 0.5, %v4331_v41  ;;  %v818_v49 = vmul.f32 0.5, %v4333_v42  ;;  %v4338_v20 = vadd.f32 -1.0, %v807_v9  ;;  %v5133_v9 = vld [vmem:[%s740_s3 + $0x10] sm:$0xff]  }
  0x27   : > { %v819_v50 = vmul.f32 0.5, %v4334_v44  ;;  %v821_v51 = vmul.f32 0.5, %v4336_v45  ;;  %v822_v59 = vmul.f32 0.5, %v4337_v52  ;;  %v804_v36 = vmul.f32 8.0, %v796_v29 }
  0x28   : > { %v825_v54 = vmax.f32 %v817_v47, 0.0  ;;  %v824_v55 = vmax.f32 %v816_v48, 0.0  ;;  %v826_v56 = vmax.f32 %v818_v49, 0.0  ;;  %v823_v28 = vmul.f32 0.5, %v4338_v20 }
  0x29   : > { %v827_v58 = vmax.f32 %v819_v50, 0.0  ;;  %v829_v63 = vmax.f32 %v821_v51, 0.0  ;;  %v830_v11 = vmax.f32 %v822_v59, 0.0  ;;  %v4335_v42 = vadd.f32 -1.0, %v804_v36 }
  0x2a   : > { %v833_v60 = vmin.f32 %v825_v54, 7.0  ;;  %v832_v61 = vmin.f32 %v824_v55, 7.0  ;;  %v5343_v62 = vmin.f32 %v826_v56, 7.0  ;;  %v831_v35 = vmax.f32 %v823_v28, 0.0 }
  0x2b   : > { %v835_v8 = vmin.f32 %v827_v58, 7.0  ;;  %v837_v17 = vmin.f32 %v829_v63, 7.0  ;;  %v838_v23 = vmin.f32 %v830_v11, 7.0  ;;  %v820_v47 = vmul.f32 0.5, %v4335_v42  ;;  %v5134_v11 = vld [vmem:[%s740_s3 + $0x18] sm:$0xff]  }
  0x2c   : > { %v841_v5 = vfloor.f32 %v833_v60  ;;  %v840_v6 = vfloor.f32 %v832_v61  ;;  %v842_v10 = vfloor.f32 %v5343_v62  ;;  %v839_v41 = vmin.f32 %v831_v35, 7.0 }
  0x2d   : > { %v843_v19 = vfloor.f32 %v835_v8  ;;  %v845_v25 = vfloor.f32 %v837_v17  ;;  %v846_v30 = vfloor.f32 %v838_v23  ;;  %v828_v52 = vmax.f32 %v820_v47, 0.0 }
  0x2e   : > { %v5346_v13 = vsub.f32 %v833_v60, %v841_v5  ;;  %v5348_v14 = vsub.f32 %v832_v61, %v840_v6  ;;  %v5051_v15 = vtrunc.f32 %v840_v6  ;;  %v5053_v16 = vtrunc.f32 %v841_v5  ;;  %v5132_v6 = vld [vmem:[%s740_s3 + $0x8] sm:$0xff]  }
  0x2f   : > { %v5055_v24 = vtrunc.f32 %v842_v10  ;;  %v5057_v27 = vtrunc.f32 %v843_v19  ;;  %v5361_v31 = vsub.f32 %v837_v17, %v845_v25  ;;  %v5365_v33 = vsub.f32 %v838_v23, %v846_v30 }
  0x30   : > { %1005 = vperm.xlu1 %5114, %v5346_v13   ;;  %1000 = vperm.xlu0 %5113, %v5348_v14   ;;  %v5352_v18 = vcvt.f32.s32 %v5051_v15  ;;  %v5354_v22 = vcvt.f32.s32 %v5053_v16  ;;  %v5373_v37 = vsub.f32 1.0, %v5348_v14  ;;  %v5379_v40 = vsub.f32 %v835_v8, %v843_v19 }
  0x31   : > { %v5363_v32 = vcvt.f32.s32 %v5055_v24  ;;  %v5368_v34 = vcvt.f32.s32 %v5057_v27  ;;  %v5383_v43 = vsub.f32 1.0, %v5346_v13  ;;  %v5061_v45 = vtrunc.f32 %v845_v25 }
  0x32   : > { %v5387_v44 = vsub.f32 1.0, %v5379_v40  ;;  %v847_v46 = vfloor.f32 %v839_v41  ;;  %v5391_v48 = vadd.s32 1, %v5352_v18  ;;  %v5063_v51 = vtrunc.f32 %v846_v30 }
  0x33   : > { %v5377_v38 = vadd.s32 1, %v5363_v32  ;;  %v5394_v49 = vcvt.f32.s32 %v5061_v45  ;;  %v5398_v53 = vadd.s32 1, %v5354_v22  ;;  %v836_v56 = vmin.f32 %v828_v52, 7.0 }
  0x34   : > { %5115 = vset.pattern.permute.xlu1 %v5170_v26  ;;  %871 = vperm.xlu0 %5113, %v5352_v18   ;;  %v5065_v50 = vtrunc.f32 %v847_v46  ;;  %v5403_v55 = vcvt.f32.s32 %v5063_v51  ;;  %v5416_v60 = vadd.s32 1, %v5368_v34  ;;  %v5418_v61 = vsub.f32 %v839_v41, %v847_v46 }
  0x35   : > { %1062 = vperm.xlu1 %5115, %v5354_v22   ;;  %v844_v58 = vfloor.f32 %v836_v56  ;;  %v5437_v4 = vsub.f32 %v5343_v62, %v842_v10  ;;  %v5131_v62 = vld [vmem:[%s740_s3] sm:$0xff]   ;;  %v963_v15 = vadd.s32 1, %v5394_v49  ;;  %v907_v17 = vsub.f32 1.0, %v5361_v31  ;;  %s7393_s3 = sld [smem:[#allocation31_spill]] }
  0x36   : > { %v5401_v54 = vcvt.f32.s32 %v5065_v50  ;;  %v5408_v57 = vadd.s32 1, %v5403_v55  ;;  %v5424_v63 = vsub.f32 1.0, %v5418_v61  ;;  %4577 = vmatprep.subr.bf16.mxu0 %v5131_v62  ;;  %v5476_v20 = vsub.f32 1.0, %v5365_v33 }
  0x37   : > { %v5413_v59 = vsub.f32 %v836_v56, %v844_v58  ;;  %v5442_v5 = vsub.f32 1.0, %v5437_v4  ;;  %4578 = vmatpush3.bf16.msra.mxu0 %v5131_v62  ;;  %v5059_v8 = vtrunc.f32 %v844_v58  ;;  %v7281_v23 = vmov 0  }
  0x38   : > { %874 = vperm.xlu0 %5113, %v5354_v22   ;;  %4579 = vmatprep.subr.bf16.mxu0 %v5132_v6  ;;  %v5468_v19 = vadd.s32 1, %v5401_v54  ;;  %v5531_v42 = vmul.f32 20.0, %v5315_v2 }
  0x39   : > { %5116 = vset.pattern.permute.xlu1 %v5169_v0  ;;  %v5060_v10 = vcvt.f32.s32 %v5059_v8  ;;  %v5482_v21 = vsub.f32 1.0, %v5413_v59 }
  0x3a   : > { %877 = vperm.xlu1 %5116, %v5363_v32   ;;  %v2051_v45 = vfloor.f32 %v5531_v42 }
  0x3b   : > { %4580 = vmatpush3.bf16.msra.mxu0 %v5132_v6  ;;  %v5462_v16 = vadd.s32 1, %v5060_v10  ;;  %s7226_s28 = scalar_lea.vmem %s7393_s3, %s5303_s2 }
  0x3c   : > { %880 = vperm.xlu0 %5113, %v5368_v34   ;;  %4581 = vmatprep.subr.bf16.mxu0 %v5133_v9  ;;  %v5067_v47 = vtrunc.f32 %v2051_v45 }
  0x3e   : > { %912 = vperm.xlu1 %5116, %v5373_v37  }
  0x3f   : > { %4582 = vmatpush3.bf16.msra.mxu0 %v5133_v9 }
  0x40   : > { %973 = vperm.xlu0 %5113, %v5377_v38   ;;  %4583 = vmatprep.subr.bf16.mxu0 %v5134_v11 }
  0x42   : > { %917 = vperm.xlu1 %5116, %v5383_v43  }
  0x43   : > { %4584 = vmatpush3.bf16.msra.mxu0 %v5134_v11 }
  0x44   : > { %927 = vperm.xlu0 %5113, %v5387_v44  }
  0x46   : > { %967 = vperm.xlu1 %5116, %v5391_v48  }
  0x48   : > { %886 = vperm.xlu0 %5113, %v5394_v49  }
  0x4a   : > { %970 = vperm.xlu1 %5116, %v5398_v53  }
  0x4c   : > { %892 = vperm.xlu0 %5113, %v5401_v54  }
  0x4e   : > { %5117 = vset.pattern.permute.xlu1 %v5170_v26 }
  0x4f   : > { %1131 = vperm.xlu1 %5117, %v5391_v48  }
  0x50   : > { %985 = vperm.xlu0 %5113, %v5408_v57  }
  0x53   : > { %5118 = vset.pattern.permute.xlu1 %v5169_v0 }
  0x54   : > { %1020 = vperm.xlu0 %5113, %v5413_v59   ;;  %976 = vperm.xlu1 %5118, %v5416_v60  }
  0x58   : > { %947 = vperm.xlu0 %5113, %v5424_v63   ;;  %5119 = vset.pattern.permute.xlu1 %v5170_v26 }
  0x59   : > { %1068 = vperm.xlu1 %5119, %v5368_v34  }
  0x5c   : > { %5127 = vset.pattern.permute.xlu0 %v5170_v26 }
  0x5d   : > { %1059 = vperm.xlu0 %5127, %v5352_v18   ;;  %1091 = vperm.xlu1 %5119, %v5373_v37  }
  0x61   : > { %1134 = vperm.xlu0 %5127, %v5398_v53   ;;  %1137 = vperm.xlu1 %5119, %v5377_v38  }
  0x65   : > { %1065 = vperm.xlu0 %5127, %v5363_v32   ;;  %1163 = vperm.xlu1 %5119, %v5348_v14  }
  0x69   : > { %1095 = vperm.xlu0 %5127, %v5383_v43   ;;  %5120 = vset.pattern.permute.xlu1 %v5169_v0 }
  0x6a   : > { %922 = vperm.xlu1 %5120, %v5442_v5  }
  0x6d   : > { %1140 = vperm.xlu0 %5127, %v5416_v60  }
  0x6e   : > { %1010 = vperm.xlu1 %5120, %v5437_v4  }
  0x71   : > { %1167 = vperm.xlu0 %5127, %v5346_v13  }
  0x72   : > { %1015 = vperm.xlu1 %5120, %v5379_v40  }
  0x75   : > { %1099 = vperm.xlu0 %5127, %v5442_v5  }
  0x76   : > { %5121 = vset.pattern.permute.xlu1 %v5170_v26 }
  0x77   : > { %1103 = vperm.xlu1 %5121, %v5387_v44  }
  0x79   : > { %1175 = vperm.xlu0 %5127, %v5379_v40  }
  0x7b   : > { %1171 = vperm.xlu1 %5121, %v5437_v4  }
  0x7d   : > { %1071 = vperm.xlu0 %5127, %v5060_v10  }
  0x7f   : > { %5122 = vset.pattern.permute.xlu1 %v5169_v0 }
  0x80   : > { %883 = vperm.xlu1 %5122, %v5060_v10  }
  0x81   : > { %1146 = vperm.xlu0 %5127, %v963_v15  }
  0x84   : > { %979 = vperm.xlu1 %5122, %v5462_v16  }
  0x85   : > { %1077 = vperm.xlu0 %5127, %v5403_v55  }
  0x88   : > { %982 = vperm.xlu1 %5122, %v963_v15  }
  0x89   : > { %1111 = vperm.xlu0 %5127, %v907_v17  }
  0x8c   : > { %5123 = vset.pattern.permute.xlu1 %v5170_v26 }
  0x8d   : > { %1152 = vperm.xlu0 %5127, %v5468_v19   ;;  %1074 = vperm.xlu1 %5123, %v5394_v49  }
  0x91   : > { %1183 = vperm.xlu0 %5127, %v5361_v31   ;;  %1143 = vperm.xlu1 %5123, %v5462_v16  }
  0x95   : > { %1115 = vperm.xlu0 %5127, %v5476_v20   ;;  %5124 = vset.pattern.permute.xlu1 %v5169_v0 }
  0x96   : > { %889 = vperm.xlu1 %5124, %v5403_v55  }
  0x99   : > { %1191 = vperm.xlu0 %5127, %v5418_v61  }
  0x9a   : > { %932 = vperm.xlu1 %5124, %v5482_v21  }
  0x9d   : > { %5130 = vset.pattern.permute.xlu0 %v7281_v23 }
  0x9e   : > { %1410 = vperm.xlu0 %5130, %v5391_v48   ;;  %937 = vperm.xlu1 %5124, %v907_v17  }
  0xa2   : > { %1413 = vperm.xlu0 %5130, %v5398_v53   ;;  %988 = vperm.xlu1 %5124, %v5468_v19  }
  0xa6   : > { %1374 = vperm.xlu0 %5130, %v5383_v43   ;;  %1025 = vperm.xlu1 %5124, %v5361_v31  }
  0xaa   : > { %1344 = vperm.xlu0 %5130, %v5363_v32   ;;  %5125 = vset.pattern.permute.xlu1 %v5170_v26 }
  0xab   : > { %1080 = vperm.xlu1 %5125, %v5401_v54  }
  0xae   : > { %1347 = vperm.xlu0 %5130, %v5368_v34  }
  0xaf   : > { %v5496_v24 = vpop.permute.xlu1 %1005  ;;  %1107 = vperm.xlu1 %5125, %v5482_v21   ;;  %v5499_v25 = vpop.permute.xlu0 %1000 }
  0xb2   : > { %1419 = vperm.xlu0 %5130, %v5416_v60  }
  0xb3   : > { %1149 = vperm.xlu1 %5125, %v5408_v57   ;;  %v5503_v27 = vpop.permute.xlu0 %871 }
  0xb4   : > { %v5505_v28 = vpop.permute.xlu1 %1062 }
  0xb6   : > { %1382 = vperm.xlu0 %5130, %v5387_v44  }
  0xb7   : > { %1179 = vperm.xlu1 %5125, %v5413_v59   ;;  %v5509_v29 = vpop.permute.xlu0 %874 }
  0xb9   : > { %v5511_v30 = vpop.permute.xlu1 %877 }
  0xba   : > { %1350 = vperm.xlu0 %5130, %v5060_v10   ;;  %v5618_v10 = vld [vmem:[%s7322_s30] ss:$0 sm:$0xff] }
  0xbb   : > { %5126 = vset.pattern.permute.xlu1 %v5169_v0  ;;  %v5514_v32 = vpop.permute.xlu0 %880  ;;  %vm894_vm8 = vcmp.eq.s32.totalorder %v5618_v10, %v5503_v27  ;;  %vm895_vm9 = vcmp.eq.s32.totalorder %v5618_v10, %v5509_v29 }
  0xbc   : > { %942 = vperm.xlu1 %5126, %v5476_v20  }
  0xbd   : > { %v5517_v34 = vpop.permute.xlu1 %912 }
  0xbe   : > { %1353 = vperm.xlu0 %5130, %v5394_v49   ;;  %v5555_v49 = vcvt.f32.s32 %v5067_v47  ;;  %v950_v47 = vsel %vm894_vm8, %v5517_v34, 0.0 }
  0xbf   : > { %v5520_v35 = vpop.permute.xlu0 %973 }
  0xc0   : > { %1030 = vperm.xlu1 %5126, %v5365_v33   ;;  %vm2075_vm0 = vcmp.ge.s32.totalorder %v5555_v49, 4294966784  ;;  %vm2083_vm2 = vcmp.le.s32.totalorder %v5555_v49, 510  ;;  %vm992_vm15 = vcmp.eq.s32.totalorder %v5618_v10, %v5520_v35 }
  0xc1   : > { %v5523_v36 = vpop.permute.xlu1 %917  ;;  %v5602_v8 = vsel %vm2083_vm2, 1, %v7281_v23 }
  0xc2   : > { %1425 = vperm.xlu0 %5130, %v963_v15   ;;  %v951_v29 = vsel %vm895_vm9, %v5523_v36, 0.0 }
  0xc3   : > { %v5525_v41 = vpop.permute.xlu0 %927 }
  0xc4   : > { %1035 = vperm.xlu1 %5126, %v5418_v61  }
  0xc5   : > { %v5528_v0 = vpop.permute.xlu1 %967 }
  0xc6   : > { %1390 = vperm.xlu0 %5130, %v907_v17   ;;  %vm990_vm4 = vcmp.eq.s32.totalorder %v5618_v10, %v5528_v0 }
  0xc7   : > { %v5533_v43 = vpop.permute.xlu0 %886 }
  0xc8   : > { %5128 = vset.pattern.permute.xlu1 %v5170_v26  ;;  %v5548_v26 = vmul.f32 20.0, %v5318_v3  ;;  %v5565_v3 = vadd.s32 512, %v5555_v49 }
  0xc9   : > { %1119 = vperm.xlu1 %5128, %v5424_v63   ;;  %v5537_v44 = vpop.permute.xlu1 %970 }
  0xca   : > { %1356 = vperm.xlu0 %5130, %v5403_v55   ;;  %v2053_v50 = vfloor.f32 %v5548_v26  ;;  %vm991_vm5 = vcmp.eq.s32.totalorder %v5618_v10, %v5537_v44 }
  0xcb   : > { %v5541_v46 = vpop.permute.xlu0 %892  ;;  %v1039_v0 = vsel %vm991_vm5, %v5496_v24, 0.0 }
  0xcc   : > { %v5071_v53 = vtrunc.f32 %v2053_v50 }
  0xcd   : > { %1187 = vperm.xlu1 %5128, %v5365_v33  }
  0xce   : > { %1359 = vperm.xlu0 %5130, %v5401_v54   ;;  %v1132_v2 = vpop.permute.xlu1 %1131  ;;  %v5577_v55 = vcvt.f32.s32 %v5071_v53 }
  0xcf   : > { %v5550_v48 = vpop.permute.xlu0 %985 }
  0xd0   : > { %v5585_v60 = vadd.s32 512, %v5577_v55  ;;  %vm2077_vm1 = vcmp.ge.s32.totalorder %v5577_v55, 4294966784  ;;  %vm2085_vm3 = vcmp.le.s32.totalorder %v5577_v55, 510 }
  0xd1   : > { %5129 = vset.pattern.permute.xlu1 %v7281_v23  ;;  %v2101_v62 = vsel %vm2077_vm1, 1, %v7281_v23  ;;  %v5623_v11 = vsel %vm2085_vm3, 1, %v7281_v23 }
  0xd2   : > { %1431 = vperm.xlu0 %5130, %v5468_v19   ;;  %1338 = vperm.xlu1 %5129, %v5352_v18   ;;  %v1038_v19 = vsel %vm990_vm4, %v5499_v25, 0.0  ;;  %vm897_vm4 = vcmp.eq.s32.totalorder %v5618_v10, %v5514_v32 }
  0xd3   : > { %v5558_v51 = vpop.permute.xlu1 %976  ;;  %v5560_v52 = vpop.permute.xlu0 %1020 }
  0xd4   : > { %vm993_vm5 = vcmp.eq.s32.totalorder %v5618_v10, %v5558_v51 }
  0xd6   : > { %1398 = vperm.xlu0 %5130, %v5424_v63   ;;  %1341 = vperm.xlu1 %5129, %v5354_v22   ;;  %v2099_v22 = vsel %vm2075_vm0, 1, %v7281_v23 }
  0xd7   : > { %v5569_v54 = vpop.permute.xlu0 %947 }
  0xd8   : > { %v5571_v18 = vpop.permute.xlu1 %1068 }
  0xda   : > { %1370 = vperm.xlu1 %5129, %v5373_v37   ;;  %2259 = vrot.lane.b32.xlu0 %v5565_v3, %s5172_s26 }
  0xdc   : > { %v1060_v56 = vpop.permute.xlu0 %1059  ;;  %v1092_v58 = vpop.permute.xlu1 %1091 }
  0xde   : > { %1442 = vperm.xlu1 %5129, %v5348_v14   ;;  %2107 = vrot.lane.b32.xlu0 %v2099_v22, %s5172_s26 }
  0xe0   : > { %v1135_v37 = vpop.permute.xlu0 %1134  ;;  %v5587_v63 = vpop.permute.xlu1 %1137 }
  0xe2   : > { %1446 = vperm.xlu1 %5129, %v5346_v13   ;;  %2263 = vrot.lane.b32.xlu0 %v5585_v60, %s5172_s26 }
  0xe4   : > { %v1066_v14 = vpop.permute.xlu0 %1065  ;;  %v1164_v6 = vpop.permute.xlu1 %1163 }
  0xe6   : > { %1416 = vperm.xlu1 %5129, %v5377_v38   ;;  %2111 = vrot.lane.b32.xlu0 %v2101_v62, %s5172_s26  ;;  %v5613_v38 = vld [vmem:[%s7322_s30 + $0x1] ss:$0 sm:$0xff] }
  0xe7   : > { %vm1154_vm6 = vcmp.eq.s32.totalorder %v5613_v38, %v1132_v2  ;;  %vm1082_vm7 = vcmp.eq.s32.totalorder %v5613_v38, %v1060_v56  ;;  %vm1155_vm10 = vcmp.eq.s32.totalorder %v5613_v38, %v1135_v37  ;;  %vm1083_vm11 = vcmp.eq.s32.totalorder %v5613_v38, %v5505_v28 }
  0xe8   : > { %v1096_v13 = vpop.permute.xlu0 %1095  ;;  %v1194_v15 = vsel %vm1154_vm6, %v1164_v6, 0.0  ;;  %v1122_v44 = vsel %vm1082_vm7, %v1092_v58, 0.0  ;;  %v1046_v37 = vadd.f32 %v1038_v19, %v950_v47  ;;  %v1047_v6 = vadd.f32 %v1039_v0, %v951_v29 }
  0xe9   : > { %v5605_v9 = vpop.permute.xlu1 %922  ;;  %v1202_v2 = vadd.f32 %v1194_v15, %v1122_v44  ;;  %v1123_v53 = vsel %vm1083_vm11, %v1096_v13, 0.0  ;;  %vm1084_vm13 = vcmp.eq.s32.totalorder %v5613_v38, %v1066_v14  ;;  %vm1085_vm6 = vcmp.eq.s32.totalorder %v5613_v38, %v5571_v18 }
  0xea   : > { %1378 = vperm.xlu1 %5129, %v5442_v5   ;;  %2147 = vrot.lane.b32.xlu0 %v5602_v8, %s5172_s26  ;;  %vm896_vm7 = vcmp.eq.s32.totalorder %v5618_v10, %v5511_v30  ;;  %vm1156_vm8 = vcmp.eq.s32.totalorder %v5613_v38, %v5587_v63  ;;  %v953_v18 = vsel %vm897_vm4, %v5525_v41, 0.0  ;;  %v5674_v14 = vsub.f32 %v5531_v42, %v2051_v45 }
  0xeb   : > { %v1210_v25 = vmul.f32 %v1202_v2, %v1046_v37  ;;  %v952_v30 = vsel %vm896_vm7, %v5605_v9, 0.0  ;;  %v5690_v9 = vmul.f32 20.0, %v5312_v1  ;;  %v5705_v1 = vsub.f32 %v5548_v26, %v2053_v50 }
  0xec   : > { %v1141_v5 = vpop.permute.xlu0 %1140  ;;  %v5685_v41 = vsub.f32 1.0, %v5674_v14 }
  0xed   : > { %v1011_v17 = vpop.permute.xlu1 %1010  ;;  %vm1157_vm14 = vcmp.eq.s32.totalorder %v5613_v38, %v1141_v5  ;;  %v2052_v0 = vfloor.f32 %v5690_v9  ;;  %v5725_v26 = vsub.f32 1.0, %v5705_v1 }
  0xee   : > { %1450 = vperm.xlu1 %5129, %v5437_v4   ;;  %2151 = vrot.lane.b32.xlu0 %v5623_v11, %s5172_s26 }
  0xef   : > { %v5069_v2 = vtrunc.f32 %v2052_v0 }
  0xf0   : > { %v1168_v27 = vpop.permute.xlu0 %1167 }
  0xf1   : > { %v1195_v56 = vsel %vm1155_vm10, %v1168_v27, 0.0  ;;  %v1016_v4 = vpop.permute.xlu1 %1015  ;;  %v5720_v27 = vmul.f32 20.0, %v5340_v39 }
  0xf2   : > { %v1203_v23 = vadd.f32 %v1195_v56, %v1123_v53  ;;  %1454 = vperm.xlu1 %5129, %v5379_v40   ;;  %2179 = vrot.lane.b32.xlu0 %v2099_v22, %s5173_s25  ;;  %v1040_v40 = vsel %vm992_vm15, %v1011_v17, 0.0 }
  0xf3   : > { %v1048_v13 = vadd.f32 %v1040_v40, %v952_v30  ;;  %v7287_v39 = vfloor.f32 %v5720_v27 }
  0xf4   : > { %v1100_v24 = vpop.permute.xlu0 %1099  ;;  %v1211_v28 = vmul.f32 %v1203_v23, %v1047_v6  ;;  %v7323_v6 = vmov 0  }
  0xf5   : > { %v1124_v22 = vsel %vm1084_vm13, %v1100_v24, 0.0  ;;  %v5075_v56 = vtrunc.f32 %v7287_v39 }
  0xf6   : > { %1422 = vperm.xlu1 %5129, %v5462_v16   ;;  %v1104_v34 = vpop.permute.xlu1 %1103  ;;  %v1218_v36 = vpack.c.bf16 %v1211_v28, %v1210_v25  ;;  %2183 = vrot.lane.b32.xlu0 %v2101_v62, %s5173_s25  ;;  %v1041_v16 = vsel %vm993_vm5, %v1016_v4, 0.0 }
  0xf7   : > { %v1125_v58 = vsel %vm1085_vm6, %v1104_v34, 0.0  ;;  %v1049_v5 = vadd.f32 %v1041_v16, %v953_v18  ;;  %v5766_v25 = vcvt.f32.s32 %v5075_v56  ;;  %vm899_vm6 = vcmp.eq.s32.totalorder %v5618_v10, %v5533_v43 }
  0xf8   : > { %v1176_v23 = vpop.permute.xlu0 %1175  ;;  %4585 = vmatprep.mubr.msk.bf16.mxu0 %vm1254_vm12, %v1218_v36  ;;  %v5877_v43 = vsub.f32 %v5690_v9, %v2052_v0  ;;  %v1497_v0 = vld [vmem:[%s7264_s5] sm:$0xff] }
  0xf9   : > { %v1197_v62 = vsel %vm1157_vm14, %v1176_v23, 0.0  ;;  %v5777_v40 = vadd.s32 512, %v5766_v25  ;;  %v5780_v23 = vmul.f32 20.0, %v5336_v12  ;;  %vm7285_vm14 = vcmp.ge.s32.totalorder %v5766_v25, 4294966784 }
  0xfa   : > { %v1205_v35 = vadd.f32 %v1197_v62, %v1125_v58  ;;  %1386 = vperm.xlu1 %5129, %v5482_v21   ;;  %v1172_v51 = vpop.permute.xlu1 %1171  ;;  %2211 = vrot.lane.b32.xlu0 %v5602_v8, %s5173_s25  ;;  %7324 = vst [vmem:[#allocation2_spill] sm:$0xff] %v5877_v43 }
  0xfb   : > { %v1196_v63 = vsel %vm1156_vm8, %v1172_v51, 0.0  ;;  %v7283_v62 = vfloor.f32 %v5780_v23 }
  0xfc   : > { %v1204_v21 = vadd.f32 %v1196_v63, %v1124_v22  ;;  %v5677_v15 = vpop.permute.xlu0 %1071  ;;  %v1213_v17 = vmul.f32 %v1205_v35, %v1049_v5 }
  0xfd   : > { %v5079_v18 = vtrunc.f32 %v7283_v62 }
  0xfe   : > { %v1212_v8 = vmul.f32 %v1204_v21, %v1048_v13  ;;  %1458 = vperm.xlu1 %5129, %v5413_v59   ;;  %2291 = vrot.lane.b32.xlu0 %v5565_v3, %s5173_s25  ;;  %v5823_v21 = vsel %vm7285_vm14, 1, %v7323_v6  ;;  %vm1086_vm14 = vcmp.eq.s32.totalorder %v5613_v38, %v5677_v15 }
  0xff   : > { %v5682_v32 = vpop.permute.xlu1 %883  ;;  %v5818_v5 = vcvt.f32.s32 %v5079_v18 }
 0x100   : > { %v1219_v42 = vpack.c.bf16 %v1213_v17, %v1212_v8  ;;  %v5687_v45 = vpop.permute.xlu0 %1146  ;;  %vm898_vm7 = vcmp.eq.s32.totalorder %v5618_v10, %v5682_v32 }
 0x101   : > { %vm7284_vm15 = vcmp.ge.s32.totalorder %v5818_v5, 4294966784  ;;  %vm1159_vm4 = vcmp.eq.s32.totalorder %v5613_v38, %v5687_v45 }
 0x102   : > { %1462 = vperm.xlu1 %5129, %v5361_v31   ;;  %4586 = vmatmul.mubr.msk.bf16.vlgmr.msra.gmra.mrb[0].mxu0 %vm1254_vm12, %v1219_v42  ;;  %v5834_v42 = vadd.s32 512, %v5818_v5 }
 0x103   : > { %v5694_v19 = vpop.permute.xlu1 %979  ;;  %2340 = vrot.lane.b32.xlu0 %v5685_v41, %s5172_s26 }
 0x104   : > { %v5698_v59 = vpop.permute.xlu0 %1077  ;;  %vm994_vm8 = vcmp.eq.s32.totalorder %v5618_v10, %v5694_v19 }
 0x106   : > { %1428 = vperm.xlu1 %5129, %v5408_v57   ;;  %v5717_v57 = vmul.f32 20.0, %v5324_v7 }
 0x107   : > { %v5707_v44 = vpop.permute.xlu1 %982  ;;  %2215 = vrot.lane.b32.xlu0 %v5623_v11, %s5173_s25 }
 0x108   : > { %v5711_v31 = vpop.permute.xlu0 %1111  ;;  %v2054_v7 = vfloor.f32 %v5717_v57  ;;  %vm995_vm5 = vcmp.eq.s32.totalorder %v5618_v10, %v5707_v44 }
 0x10a   : > { %1394 = vperm.xlu1 %5129, %v5476_v20   ;;  %v5732_v20 = vcvt.f32.s32 %v5069_v2 }
 0x10b   : > { %2295 = vrot.lane.b32.xlu0 %v5585_v60, %s5173_s25 }
 0x10c   : > { %v5727_v50 = vpop.permute.xlu0 %1152  ;;  %v5729_v11 = vpop.permute.xlu1 %1074  ;;  %v5744_v53 = vadd.s32 512, %v5732_v20  ;;  %vm2076_vm9 = vcmp.ge.s32.totalorder %v5732_v20, 4294966784  ;;  %vm2084_vm11 = vcmp.le.s32.totalorder %v5732_v20, 510 }
 0x10d   : > { %v2100_v24 = vsel %vm2076_vm9, 1, %v7323_v6  ;;  %v2140_v51 = vsel %vm2084_vm11, 1, %v7323_v6 }
 0x10e   : > { %1466 = vperm.xlu1 %5129, %v5365_v33   ;;  %v5073_v33 = vtrunc.f32 %v2054_v7 }
 0x10f   : > { %2344 = vrot.lane.b32.xlu0 %v5725_v26, %s5172_s26 }
 0x110   : > { %v5738_v47 = vpop.permute.xlu0 %1183  ;;  %v5740_v29 = vpop.permute.xlu1 %1143 }
 0x111   : > { %v1199_v45 = vsel %vm1159_vm4, %v5738_v47, 0.0 }
 0x112   : > { %1470 = vperm.xlu1 %5129, %v5418_v61   ;;  %v5759_v61 = vcvt.f32.s32 %v5073_v33 }
 0x113   : > { %2372 = vrot.lane.b32.xlu0 %v5685_v41, %s5173_s25 }
 0x114   : > { %v5752_v4 = vpop.permute.xlu0 %1115  ;;  %v5772_v36 = vadd.s32 512, %v5759_v61  ;;  %vm7286_vm10 = vcmp.ge.s32.totalorder %v5759_v61, 4294966784  ;;  %vm2086_vm13 = vcmp.le.s32.totalorder %v5759_v61, 510 }
 0x115   : > { %v5755_v37 = vpop.permute.xlu1 %889  ;;  %v2102_v58 = vsel %vm7286_vm10, 1, %v7323_v6  ;;  %v5816_v13 = vsel %vm2086_vm13, 1, %v7323_v6  ;;  %vm1158_vm10 = vcmp.eq.s32.totalorder %v5613_v38, %v5740_v29 }
 0x116   : > { %2261 = vrot.lane.b32.xlu1 %v5744_v53, %s5172_s26 }
 0x117   : > { %2376 = vrot.lane.b32.xlu0 %v5725_v26, %s5173_s25 }
 0x118   : > { %v5768_v28 = vpop.permute.xlu0 %1191 }
 0x119   : > { %v933_v34 = vpop.permute.xlu1 %932 }
 0x11a   : > { %2109 = vrot.lane.b32.xlu1 %v2100_v24, %s5172_s26  ;;  %v954_v44 = vsel %vm898_vm7, %v933_v34, 0.0  ;;  %vm1161_vm7 = vcmp.eq.s32.totalorder %v5613_v38, %v5727_v50 }
 0x11b   : > { %2504 = vrot.lane.b32.xlu0 %v5674_v14, %s5173_s25 }
 0x11d   : > { %v5783_v16 = vpop.permute.xlu0 %1410  ;;  %v938_v22 = vpop.permute.xlu1 %937 }
 0x11e   : > { %2265 = vrot.lane.b32.xlu1 %v5772_v36, %s5172_s26 }
 0x11f   : > { %2267 = vrot.lane.b32.xlu0 %v5777_v40, %s5172_s26 }
 0x121   : > { %v5794_v12 = vpop.permute.xlu0 %1413  ;;  %v5796_v35 = vpop.permute.xlu1 %988 }
 0x122   : > { %2113 = vrot.lane.b32.xlu1 %v2102_v58, %s5172_s26 }
 0x123   : > { %2508 = vrot.lane.b32.xlu0 %v5705_v1, %s5173_s25 }
 0x125   : > { %v5807_v30 = vpop.permute.xlu0 %1374  ;;  %v1026_v63 = vpop.permute.xlu1 %1025 }
 0x126   : > { %2149 = vrot.lane.b32.xlu1 %v2140_v51, %s5172_s26  ;;  %v1043_v62 = vsel %vm995_vm5, %v1026_v63, 0.0  ;;  %vm1087_vm5 = vcmp.eq.s32.totalorder %v5613_v38, %v5729_v11  ;;  %v1042_v11 = vsel %vm994_vm8, %v5560_v52, 0.0  ;;  %v1498_v52 = vld [vmem:[%s7264_s5 + $0x8] sm:$0xff]  ;;  %vm997_vm8 = vcmp.eq.s32.totalorder %v5618_v10, %v5796_v35 }
 0x127   : > { %2632 = vrot.lane.b32.xlu0 %v5674_v14, %s5172_s26  ;;  %v1127_v47 = vsel %vm1087_vm5, %v5711_v31, 0.0  ;;  %v1050_v29 = vadd.f32 %v1042_v11, %v954_v44  ;;  %vm1088_vm5 = vcmp.eq.s32.totalorder %v5613_v38, %v5698_v59 }
 0x128   : > { %v1207_v15 = vadd.f32 %v1199_v45, %v1127_v47  ;;  %v5901_v45 = vsub.f32 1.0, %v5877_v43  ;;  %v1128_v35 = vsel %vm1088_vm5, %v5752_v4, 0.0 }
 0x129   : > { %v5825_v17 = vpop.permute.xlu0 %1344 }
 0x12a   : > { %v5827_v8 = vpop.permute.xlu1 %1080  ;;  %2153 = vrot.lane.b32.xlu1 %v5816_v13, %s5172_s26 }
 0x12b   : > { %2115 = vrot.lane.b32.xlu0 %v5823_v21, %s5172_s26  ;;  %vm1089_vm4 = vcmp.eq.s32.totalorder %v5613_v38, %v5827_v8 }
 0x12d   : > { %v5836_v2 = vpop.permute.xlu0 %1347 }
 0x12e   : > { %v1108_v33 = vpop.permute.xlu1 %1107  ;;  %2181 = vrot.lane.b32.xlu1 %v2100_v24, %s5173_s25  ;;  %v5856_v24 = vsel %vm7284_vm15, 1, %v7323_v6  ;;  %vm2087_vm15 = vcmp.le.s32.totalorder %v5766_v25, 510 }
 0x12f   : > { %2271 = vrot.lane.b32.xlu0 %v5834_v42, %s5172_s26  ;;  %v1126_v34 = vsel %vm1086_vm14, %v1108_v33, 0.0  ;;  %v5887_v9 = vsel %vm2087_vm15, 1, %v7323_v6  ;;  %vm901_vm14 = vcmp.eq.s32.totalorder %v5618_v10, %v5541_v46 }
 0x131   : > { %v5842_v56 = vpop.permute.xlu0 %1419 }
 0x132   : > { %v5848_v18 = vpop.permute.xlu1 %1149  ;;  %2185 = vrot.lane.b32.xlu1 %v2102_v58, %s5173_s25  ;;  %v955_v58 = vsel %vm899_vm6, %v938_v22, 0.0  ;;  %vm996_vm6 = vcmp.eq.s32.totalorder %v5618_v10, %v5550_v48 }
 0x133   : > { %2636 = vrot.lane.b32.xlu0 %v5705_v1, %s5172_s26  ;;  %v1051_v32 = vadd.f32 %v1043_v62, %v955_v58  ;;  %v4857_v62 = vpack.c.bf16 %v1498_v52, %v1497_v0  ;;  %v5936_v52 = vsub.f32 %v5717_v57, %v2054_v7 }
 0x135   : > { %v5867_v63 = vpop.permute.xlu0 %1382  ;;  %4858 = vmatprep.subr.bf16.mxu1 %v4857_v62  ;;  %7327 = vst [vmem:[#allocation5_spill] sm:$0xff] %v5936_v52  ;;  %v5953_v7 = vsub.f32 1.0, %v5936_v52 }
 0x136   : > { %v1180_v19 = vpop.permute.xlu1 %1179  ;;  %2213 = vrot.lane.b32.xlu1 %v2140_v51, %s5173_s25  ;;  %v1215_v51 = vmul.f32 %v1207_v15, %v1051_v32  ;;  %4860 = vmatpush3.bf16.msra.mxu1 %v4857_v62  ;;  %v1500_v32 = vld [vmem:[%s7264_s5 + $0x18] sm:$0xff]  ;;  %v1502_v15 = vld [vmem:[%s7264_s5 + $0x28] sm:$0xff] }
 0x137   : > { %v1198_v22 = vsel %vm1158_vm10, %v1180_v19, 0.0  ;;  %2119 = vrot.lane.b32.xlu0 %v5856_v24, %s5172_s26  ;;  %vm7288_vm10 = vcmp.le.s32.totalorder %v5818_v5, 510 }
 0x138   : > { %v1206_v39 = vadd.f32 %v1198_v22, %v1126_v34  ;;  %v5910_v19 = vsel %vm7288_vm10, 1, %v7323_v6  ;;  %v1501_v22 = vld [vmem:[%s7264_s5 + $0x20] sm:$0xff]  ;;  %vm1160_vm10 = vcmp.eq.s32.totalorder %v5613_v38, %v5848_v18 }
 0x139   : > { %v5895_v31 = vpop.permute.xlu0 %1350  ;;  %v4865_v0 = vpack.c.bf16 %v1502_v15, %v1501_v22  ;;  %v7329_v22 = vfloor.f32 %v5720_v27 }
 0x13a   : > { %v1214_v33 = vmul.f32 %v1206_v39, %v1050_v29  ;;  %2293 = vrot.lane.b32.xlu1 %v5744_v53, %s5173_s25  ;;  %v1499_v39 = vld [vmem:[%s7264_s5 + $0x10] sm:$0xff] }
 0x13b   : > { %v5903_v44 = vpop.permute.xlu1 %942  ;;  %2155 = vrot.lane.b32.xlu0 %v5887_v9, %s5172_s26  ;;  %v4861_v47 = vpack.c.bf16 %v1500_v32, %v1499_v39  ;;  %v1505_v32 = vld [vmem:[%s7264_s5 + $0x40] sm:$0xff] }
 0x13c   : > { %v1220_v58 = vpack.c.bf16 %v1215_v51, %v1214_v33  ;;  %v1503_v51 = vld [vmem:[%s7264_s5 + $0x30] sm:$0xff]  ;;  %v1504_v33 = vld [vmem:[%s7264_s5 + $0x38] sm:$0xff] }
 0x13d   : > { %v5918_v11 = vpop.permute.xlu0 %1353  ;;  %4862 = vmatprep.subr.bf16.mxu1 %v4861_v47  ;;  %v4869_v57 = vpack.c.bf16 %v1504_v33, %v1503_v51  ;;  %v1201_v51 = vsel %vm1161_vm7, %v5768_v28, 0.0  ;;  %v1508_v28 = vld [vmem:[%s7264_s5 + $0x58] sm:$0xff] }
 0x13e   : > { %7325 = vst [vmem:[#allocation3_spill] sm:$0xff] %v5918_v11  ;;  %4589 = vmatprep.mubr.msk.bf16.mxu0 %vm1254_vm12, %v1220_v58  ;;  %2342 = vrot.lane.b32.xlu1 %v5901_v45, %s5172_s26 }
 0x13f   : > { %v1031_v34 = vpop.permute.xlu1 %1030  ;;  %2159 = vrot.lane.b32.xlu0 %v5910_v19, %s5172_s26  ;;  %4864 = vmatpush3.bf16.msra.mxu1 %v4861_v47  ;;  %v1506_v47 = vld [vmem:[%s7264_s5 + $0x48] sm:$0xff] }
 0x140   : > { %4866 = vmatprep.subr.bf16.mxu1 %v4865_v0  ;;  %v1044_v33 = vsel %vm996_vm6, %v1031_v34, 0.0  ;;  %vm2091_vm6 = vmand %vm2075_vm0, %vm2083_vm2 }
 0x141   : > { %v5931_v29 = vpop.permute.xlu0 %1425 }
 0x142   : > { %7326 = vst [vmem:[#allocation4_spill] sm:$0xff] %v5931_v29  ;;  %2217 = vrot.lane.b32.xlu1 %v5816_v13, %s5173_s25  ;;  %v5143_v13 = vld [vmem:[%s5309_s27 + $0x28] sm:$0xff] }
 0x143   : > { %v1036_v62 = vpop.permute.xlu1 %1035  ;;  %2187 = vrot.lane.b32.xlu0 %v5823_v21, %s5173_s25  ;;  %4868 = vmatpush3.bf16.msra.mxu1 %v4865_v0  ;;  %v5956_v21 = vmul.f32 20.0, %v5143_v13  ;;  %v4873_v0 = vpack.c.bf16 %v1506_v47, %v1505_v32  ;;  %v1510_v32 = vld [vmem:[%s7264_s5 + $0x68] sm:$0xff] }
 0x144   : > { %4870 = vmatprep.subr.bf16.mxu1 %v4869_v57 }
 0x145   : > { %v5948_v58 = vpop.permute.xlu0 %1390  ;;  %v7290_v8 = vfloor.f32 %v5956_v21 }
 0x146   : > { %7328 = vst [vmem:[#allocation6_spill] sm:$0xff] %v5948_v58  ;;  %2297 = vrot.lane.b32.xlu1 %v5772_v36, %s5173_s25 }
 0x147   : > { %2191 = vrot.lane.b32.xlu0 %v5856_v24, %s5173_s25  ;;  %4872 = vmatpush3.bf16.msra.mxu1 %v4869_v57  ;;  %v5973_v24 = vsub.f32 %v5720_v27, %v7329_v22  ;;  %v957_v27 = vsel %vm901_vm14, %v5569_v54, 0.0  ;;  %v1045_v57 = vsel %vm997_vm8, %v1036_v62, 0.0  ;;  %v1507_v54 = vld [vmem:[%s7264_s5 + $0x50] sm:$0xff]  ;;  %v5077_v62 = vtrunc.f32 %v7290_v8 }
 0x148   : > { %v1120_v39 = vpop.permute.xlu1 %1119  ;;  %4874 = vmatprep.subr.bf16.mxu1 %v4873_v0  ;;  %v1053_v18 = vadd.f32 %v1045_v57, %v957_v27  ;;  %v1511_v57 = vld [vmem:[%s7264_s5 + $0x70] sm:$0xff] }
 0x149   : > { %7330 = vst [vmem:[#allocation7_spill] sm:$0xff] %v5973_v24  ;;  %v1129_v15 = vsel %vm1089_vm4, %v1120_v39, 0.0  ;;  %v5975_v46 = vpop.permute.xlu0 %1356  ;;  %vm900_vm4 = vcmp.eq.s32.totalorder %v5618_v10, %v5755_v37  ;;  %v4877_v37 = vpack.c.bf16 %v1508_v28, %v1507_v54  ;;  %v6013_v4 = vsub.f32 1.0, %v5973_v24  ;;  %v1509_v39 = vld [vmem:[%s7264_s5 + $0x60] sm:$0xff]  ;;  %v5144_v54 = vld [vmem:[%s5309_s27 + $0x38] sm:$0xff] }
 0x14a   : > { %7331 = vst [vmem:[#allocation8_spill] sm:$0xff] %v5975_v46  ;;  %2346 = vrot.lane.b32.xlu1 %v5953_v7, %s5172_s26  ;;  %v1209_v48 = vadd.f32 %v1201_v51, %v1129_v15  ;;  %v956_v59 = vsel %vm900_vm4, %v5903_v44, 0.0  ;;  %v4881_v15 = vpack.c.bf16 %v1510_v32, %v1509_v39  ;;  %v6027_v27 = vcvt.f32.s32 %v5077_v62 }
 0x14b   : > { %2219 = vrot.lane.b32.xlu0 %v5887_v9, %s5173_s25  ;;  %4876 = vmatpush3.bf16.msra.mxu1 %v4873_v0  ;;  %v1052_v38 = vadd.f32 %v1044_v33, %v956_v59  ;;  %v6048_v28 = vmul.f32 20.0, %v5144_v54  ;;  %v7335_v59 = vfloor.f32 %v5780_v23 }
 0x14c   : > { %v1188_v50 = vpop.permute.xlu1 %1187  ;;  %4878 = vmatprep.subr.bf16.mxu1 %v4877_v37  ;;  %v1217_v44 = vmul.f32 %v1209_v48, %v1053_v18  ;;  %v1512_v48 = vld [vmem:[%s7264_s5 + $0x78] sm:$0xff]  ;;  %vm2088_vm14 = vcmp.le.s32.totalorder %v6027_v27, 510 }
 0x14d   : > { %v1200_v9 = vsel %vm1160_vm10, %v1188_v50, 0.0  ;;  %v6004_v10 = vpop.permute.xlu0 %1359  ;;  %v6045_v50 = vadd.s32 512, %v6027_v27  ;;  %v7289_v18 = vfloor.f32 %v6048_v28 }
 0x14e   : > { %7332 = vst [vmem:[#allocation9_spill] sm:$0xff] %v6004_v10  ;;  %v1208_v34 = vadd.f32 %v1200_v9, %v1128_v35  ;;  %2374 = vrot.lane.b32.xlu1 %v5901_v45, %s5173_s25  ;;  %v4885_v35 = vpack.c.bf16 %v1512_v48, %v1511_v57  ;;  %v6053_v9 = vsub.f32 %v5780_v23, %v7335_v59 }
 0x14f   : > { %2299 = vrot.lane.b32.xlu0 %v5777_v40, %s5173_s25  ;;  %4880 = vmatpush3.bf16.msra.mxu1 %v4877_v37 }
 0x150   : > { %v1216_v13 = vmul.f32 %v1208_v34, %v1052_v38  ;;  %4882 = vmatprep.subr.bf16.mxu1 %v4881_v15  ;;  %7336 = vst [vmem:[#allocation12_spill] sm:$0xff] %v6053_v9  ;;  %v6065_v34 = vsub.f32 1.0, %v6053_v9 }
 0x151   : > { %v6021_v47 = vpop.permute.xlu0 %1431  ;;  %v6023_v22 = vpop.permute.xlu1 %1338 }
 0x152   : > { %7333 = vst [vmem:[#allocation10_spill] sm:$0xff] %v6021_v47  ;;  %v1221_v0 = vpack.c.bf16 %v1217_v44, %v1216_v13  ;;  %2378 = vrot.lane.b32.xlu1 %v5953_v7, %s5173_s25 }
 0x153   : > { %2348 = vrot.lane.b32.xlu0 %v6013_v4, %s5172_s26  ;;  %4884 = vmatpush3.bf16.msra.mxu1 %v4881_v15 }
 0x154   : > { %4590 = vmatmul.mubr.msk.bf16.gmra.mrb[4].mxu0 %vm1254_vm12, %v1221_v0  ;;  %4886 = vmatprep.subr.bf16.mxu1 %v4885_v35  ;;  %vm2080_vm12 = vcmp.ge.s32.totalorder %v6027_v27, 4294966784 }
 0x155   : > { %v6032_v51 = vpop.permute.xlu0 %1398  ;;  %v6034_v33 = vpop.permute.xlu1 %1341  ;;  %v2104_v32 = vsel %vm2080_vm12, 1, %v7323_v6 }
 0x156   : > { %7334 = vst [vmem:[#allocation11_spill] sm:$0xff] %v6032_v51  ;;  %2506 = vrot.lane.b32.xlu1 %v5877_v43, %s5173_s25 }
 0x157   : > { %2223 = vrot.lane.b32.xlu0 %v5910_v19, %s5173_s25  ;;  %4888 = vmatpush3.bf16.msra.mxu1 %v4885_v35  ;;  %v5081_v19 = vtrunc.f32 %v7289_v18 }
 0x159   : > { %v2260_v37 = vpop.permute.xlu0 %2259  ;;  %v6057_v38 = vpop.permute.xlu1 %1370  ;;  %v6080_v39 = vcvt.f32.s32 %v5081_v19 }
 0x15a   : > { %2269 = vrot.lane.b32.xlu1 %v6045_v50, %s5172_s26 }
 0x15b   : > { %2303 = vrot.lane.b32.xlu0 %v5834_v42, %s5173_s25  ;;  %v6091_v57 = vadd.s32 512, %v6080_v39  ;;  %vm7297_vm10 = vcmp.ge.s32.totalorder %v6080_v39, 4294966784  ;;  %vm7298_vm4 = vcmp.le.s32.totalorder %v6080_v39, 510 }
 0x15c   : > { %v2106_v19 = vsel %vm7297_vm10, 1, %v7323_v6 }
 0x15d   : > { %v2108_v23 = vpop.permute.xlu0 %2107  ;;  %v6067_v62 = vpop.permute.xlu1 %1442 }
 0x15e   : > { %2510 = vrot.lane.b32.xlu1 %v5936_v52, %s5173_s25  ;;  %vm2123_vm7 = vcmp.ne.s32.totalorder %v2108_v23, 0 }
 0x15f   : > { %2352 = vrot.lane.b32.xlu0 %v6065_v34, %s5172_s26  ;;  %vm2131_vm8 = vmand %vm2091_vm6, %vm2123_vm7 }
 0x161   : > { %v2264_v44 = vpop.permute.xlu0 %2263  ;;  %v6076_v13 = vpop.permute.xlu1 %1446 }
 0x162   : > { %2634 = vrot.lane.b32.xlu1 %v5877_v43, %s5172_s26  ;;  %v2144_v43 = vsel %vm2088_vm14, 1, %v7323_v6 }
 0x163   : > { %2380 = vrot.lane.b32.xlu0 %v6013_v4, %s5173_s25 }
 0x165   : > { %v2112_v15 = vpop.permute.xlu0 %2111  ;;  %v6087_v0 = vpop.permute.xlu1 %1416 }
 0x166   : > { %2117 = vrot.lane.b32.xlu1 %v2104_v32, %s5172_s26 }
 0x167   : > { %2384 = vrot.lane.b32.xlu0 %v6065_v34, %s5173_s25 }
 0x169   : > { %v2148_v48 = vpop.permute.xlu0 %2147  ;;  %v6095_v54 = vpop.permute.xlu1 %1378 }
 0x16a   : > { %2273 = vrot.lane.b32.xlu1 %v6091_v57, %s5172_s26  ;;  %vm2163_vm5 = vcmp.ne.s32.totalorder %v2148_v48, 0 }
 0x16b   : > { %2512 = vrot.lane.b32.xlu0 %v5973_v24, %s5173_s25  ;;  %vm2171_vm0 = vmand %vm2131_vm8, %vm2163_vm5  ;;  %vm2125_vm5 = vcmp.ne.s32.totalorder %v2112_v15, 0 }
 0x16c   : > { %vm2093_vm8 = vmand %vm2077_vm1, %vm2085_vm3 }
 0x16d   : > { %v2152_v35 = vpop.permute.xlu0 %2151  ;;  %v6102_v59 = vpop.permute.xlu1 %1450 }
 0x16e   : > { %2638 = vrot.lane.b32.xlu1 %v5936_v52, %s5172_s26  ;;  %v2251_v52 = vmul.u32 1024, %v5565_v3  ;;  %v2146_v3 = vsel %vm7298_vm4, 1, %v7323_v6  ;;  %v2253_v6 = vmul.u32 1024, %v5585_v60  ;;  %vm2133_vm4 = vmand %vm2093_vm8, %vm2125_vm5 }
 0x16f   : > { %2516 = vrot.lane.b32.xlu0 %v6053_v9, %s5173_s25 }
 0x170   : > { %v2275_v51 = vadd.s32 %v2260_v37, %v2251_v52  ;;  %v2277_v15 = vadd.s32 %v2264_v44, %v2253_v6 }
 0x171   : > { %v2180_v18 = vpop.permute.xlu0 %2179  ;;  %v6116_v8 = vpop.permute.xlu1 %1454 }
 0x172   : > { %2121 = vrot.lane.b32.xlu1 %v2106_v19, %s5172_s26  ;;  %vm2195_vm2 = vcmp.ne.s32.totalorder %v2180_v18, 0  ;;  %v2283_v48 = vmul.u32 1024, %v2275_v51 }
 0x173   : > { %2640 = vrot.lane.b32.xlu0 %v5973_v24, %s5172_s26  ;;  %vm2203_vm6 = vmand %vm2171_vm0, %vm2195_vm2  ;;  %vm2165_vm0 = vcmp.ne.s32.totalorder %v2152_v35, 0 }
 0x174   : > { %vm2173_vm1 = vmand %vm2133_vm4, %vm2165_vm0 }
 0x175   : > { %v2184_v49 = vpop.permute.xlu0 %2183  ;;  %v6126_v23 = vpop.permute.xlu1 %1422  ;;  %vm2092_vm4 = vmand %vm2076_vm9, %vm2084_vm11 }
 0x176   : > { %2157 = vrot.lane.b32.xlu1 %v2144_v43, %s5172_s26  ;;  %vm2197_vm3 = vcmp.ne.s32.totalorder %v2184_v49, 0 }
 0x177   : > { %2644 = vrot.lane.b32.xlu0 %v6053_v9, %s5172_s26 }
 0x179   : > { %v2212_v24 = vpop.permute.xlu0 %2211  ;;  %v6134_v47 = vpop.permute.xlu1 %1386 }
 0x17a   : > { %7337 = vst [vmem:[#allocation13_spill] sm:$0xff] %v6134_v47  ;;  %vm2227_vm7 = vcmp.ne.s32.totalorder %v2212_v24, 0  ;;  %2161 = vrot.lane.b32.xlu1 %v2146_v3, %s5172_s26 }
 0x17b   : > { %vm2235_vm10 = vmand %vm2203_vm6, %vm2227_vm7 }
 0x17d   : > { %v2292_v52 = vpop.permute.xlu0 %2291  ;;  %v6141_v37 = vpop.permute.xlu1 %1458 }
 0x17e   : > { %7338 = vst [vmem:[#allocation14_spill] sm:$0xff] %v6141_v37  ;;  %v2307_v18 = vadd.s32 %v2292_v52, %v2283_v48  ;;  %2189 = vrot.lane.b32.xlu1 %v2104_v32, %s5173_s25  ;;  %v2285_v48 = vmul.u32 1024, %v2277_v15  ;;  %v7341_v32 = vfloor.f32 %v5956_v21 }
 0x180   : > { %v6145_v24 = vsel %vm2235_vm10, %v2307_v18, 3221225472  ;;  %v6158_v35 = vsub.f32 %v5956_v21, %v7341_v32  ;;  %vm2205_vm10 = vmand %vm2173_vm1, %vm2197_vm3  ;;  %vm7350_vm3 = vcmp.ge.s32.totalorder %v5759_v61, 4294966784 }
 0x181   : > { %2405 = vperm.xlu0 %5130, %v6145_v24   ;;  %v6148_v51 = vpop.permute.xlu0 %2340  ;;  %v6150_v55 = vpop.permute.xlu1 %1462 }
 0x182   : > { %7339 = vst [vmem:[#allocation15_spill] sm:$0xff] %v6150_v55  ;;  %2193 = vrot.lane.b32.xlu1 %v2106_v19, %s5173_s25  ;;  %7342 = vst [vmem:[#allocation17_spill] sm:$0xff] %v6158_v35  ;;  %v6166_v49 = vsub.f32 1.0, %v6158_v35 }
 0x185   : > { %v2216_v9 = vpop.permute.xlu0 %2215  ;;  %v6153_v60 = vpop.permute.xlu1 %1428 }
 0x186   : > { %7340 = vst [vmem:[#allocation16_spill] sm:$0xff] %v6153_v60  ;;  %vm2229_vm2 = vcmp.ne.s32.totalorder %v2216_v9, 0  ;;  %2221 = vrot.lane.b32.xlu1 %v2144_v43, %s5173_s25  ;;  %v2364_v43 = vmul.f32 %v6148_v51, %v5685_v41 }
 0x187   : > { %vm2237_vm6 = vmand %vm2205_vm10, %vm2229_vm2 }
 0x188   : > { %vm2094_vm10 = vmand %vm7350_vm3, %vm2086_vm13 }
 0x189   : > { %v2296_v52 = vpop.permute.xlu0 %2295  ;;  %v6161_v44 = vpop.permute.xlu1 %1394 }
 0x18a   : > { %7343 = vst [vmem:[#allocation18_spill] sm:$0xff] %v6161_v44  ;;  %v2309_v19 = vadd.s32 %v2296_v52, %v2285_v48  ;;  %2301 = vrot.lane.b32.xlu1 %v6045_v50, %s5173_s25  ;;  %v7346_v48 = vfloor.f32 %v6048_v28 }
 0x18c   : > { %v6168_v6 = vsel %vm2237_vm6, %v2309_v19, 3221225472  ;;  %v6186_v32 = vsub.f32 %v6048_v28, %v7346_v48 }
 0x18d   : > { %2411 = vperm.xlu0 %5130, %v6168_v6   ;;  %v6171_v21 = vpop.permute.xlu0 %2344  ;;  %v6173_v9 = vpop.permute.xlu1 %1466 }
 0x18e   : > { %7344 = vst [vmem:[#allocation19_spill] sm:$0xff] %v6173_v9  ;;  %2350 = vrot.lane.b32.xlu1 %v6166_v49, %s5172_s26  ;;  %7347 = vst [vmem:[#allocation21_spill] sm:$0xff] %v6186_v32  ;;  %v2366_v52 = vmul.f32 %v6171_v21, %v5725_v26 }
 0x191   : > { %v6179_v18 = vpop.permute.xlu0 %2372  ;;  %v6181_v15 = vpop.permute.xlu1 %1470 }
 0x192   : > { %7345 = vst [vmem:[#allocation20_spill] sm:$0xff] %v6181_v15  ;;  %v2396_v19 = vmul.f32 %v6179_v18, %v2364_v43  ;;  %2225 = vrot.lane.b32.xlu1 %v2146_v3, %s5173_s25  ;;  %v6198_v15 = vsub.f32 1.0, %v6186_v32  ;;  %v2536_v3 = vadd.s32 1, %v6145_v24 }
 0x194   : > { %2442 = vperm.xlu0 %5130, %v2396_v19   ;;  %7348 = vst [vmem:[#allocation22_spill] sm:$0xff] %v6198_v15 }
 0x195   : > { %v6192_v9 = vpop.permute.xlu0 %2376  ;;  %v2262_v44 = vpop.permute.xlu1 %2261 }
 0x196   : > { %v2398_v55 = vmul.f32 %v6192_v9, %v2366_v52  ;;  %2305 = vrot.lane.b32.xlu1 %v6091_v57, %s5173_s25 }
 0x198   : > { %2452 = vperm.xlu0 %5130, %v2398_v55  }
 0x199   : > { %v6200_v28 = vpop.permute.xlu0 %2504  ;;  %v2110_v48 = vpop.permute.xlu1 %2109 }
 0x19a   : > { %v2528_v10 = vmul.f32 %v6200_v28, %v2364_v43  ;;  %2354 = vrot.lane.b32.xlu1 %v6198_v15, %s5172_s26  ;;  %vm2124_vm7 = vcmp.ne.s32.totalorder %v2110_v48, 0 }
 0x19b   : > { %vm2132_vm8 = vmand %vm2092_vm4, %vm2124_vm7 }
 0x19c   : > { %2578 = vperm.xlu0 %5130, %v2528_v10   ;;  %v2538_v10 = vadd.s32 1, %v6168_v6 }
 0x19d   : > { %v6206_v19 = vpop.permute.xlu0 %2267  ;;  %v2266_v58 = vpop.permute.xlu1 %2265 }
 0x19e   : > { %2382 = vrot.lane.b32.xlu1 %v6166_v49, %s5173_s25 }
 0x1a0   : > { %2545 = vperm.xlu0 %5130, %v2536_v3  }
 0x1a1   : > { %v6210_v60 = vpop.permute.xlu0 %2508  ;;  %v2114_v55 = vpop.permute.xlu1 %2113 }
 0x1a2   : > { %v2530_v37 = vmul.f32 %v6210_v60, %v2366_v52  ;;  %2386 = vrot.lane.b32.xlu1 %v6198_v15, %s5173_s25  ;;  %v2252_v15 = vmul.u32 1024, %v5744_v53  ;;  %vm2126_vm2 = vcmp.ne.s32.totalorder %v2114_v55, 0 }
 0x1a3   : > { %vm2134_vm4 = vmand %vm2094_vm10, %vm2126_vm2 }
 0x1a4   : > { %2588 = vperm.xlu0 %5130, %v2530_v37   ;;  %v2672_v37 = vadd.s32 1024, %v6145_v24  ;;  %v2276_v11 = vadd.s32 %v2262_v44, %v2252_v15  ;;  %v2674_v44 = vadd.s32 1024, %v6168_v6 }
 0x1a5   : > { %v6216_v43 = vpop.permute.xlu0 %2632  ;;  %v2150_v47 = vpop.permute.xlu1 %2149 }
 0x1a6   : > { %7349 = vst [vmem:[#allocation23_spill] sm:$0xff] %v6216_v43  ;;  %v6220_v46 = vmul.f32 %v6216_v43, %v5685_v41  ;;  %2514 = vrot.lane.b32.xlu1 %v6158_v35, %s5173_s25  ;;  %vm2164_vm5 = vcmp.ne.s32.totalorder %v2150_v47, 0  ;;  %v2284_v47 = vmul.u32 1024, %v2276_v11 }
 0x1a7   : > { %vm2172_vm9 = vmand %vm2132_vm8, %vm2164_vm5  ;;  %vm7351_vm5 = vcmp.ge.s32.totalorder %v5766_v25, 4294966784 }
 0x1a8   : > { %v2664_v3 = vmul.f32 %v6220_v46, %v6179_v18  ;;  %2551 = vperm.xlu0 %5130, %v2538_v10  }
 0x1a9   : > { %v2116_v52 = vpop.permute.xlu0 %2115  ;;  %v2154_v29 = vpop.permute.xlu1 %2153 }
 0x1aa   : > { %2518 = vrot.lane.b32.xlu1 %v6186_v32, %s5173_s25  ;;  %vm2166_vm7 = vcmp.ne.s32.totalorder %v2154_v29, 0  ;;  %v2255_v29 = vmul.u32 1024, %v5777_v40  ;;  %s7352_s25 = sld [smem:[#allocation34_spill]] }
 0x1ab   : > { %vm2174_vm8 = vmand %vm2134_vm4, %vm2166_vm7 }
 0x1ac   : > { %2714 = vperm.xlu0 %5130, %v2664_v3  }
 0x1ad   : > { %v6233_v41 = vpop.permute.xlu0 %2271  ;;  %v2182_v43 = vpop.permute.xlu1 %2181 }
 0x1ae   : > { %2642 = vrot.lane.b32.xlu1 %v6158_v35, %s5172_s26  ;;  %vm2196_vm11 = vcmp.ne.s32.totalorder %v2182_v43, 0  ;;  %v2254_v43 = vmul.u32 1024, %v5772_v36 }
 0x1af   : > { %vm2204_vm0 = vmand %vm2172_vm9, %vm2196_vm11  ;;  %vm2127_vm11 = vcmp.ne.s32.totalorder %v2116_v52, 0 }
 0x1b0   : > { %2681 = vperm.xlu0 %5130, %v2672_v37   ;;  %vm2095_vm9 = vmand %vm7351_vm5, %vm2087_vm15 }
 0x1b1   : > { %v6238_v10 = vpop.permute.xlu0 %2636  ;;  %v2186_v3 = vpop.permute.xlu1 %2185  ;;  %vm2135_vm3 = vmand %vm2095_vm9, %vm2127_vm11 }
 0x1b2   : > { %v6242_v20 = vmul.f32 %v6238_v10, %v5725_v26  ;;  %2646 = vrot.lane.b32.xlu1 %v6186_v32, %s5172_s26  ;;  %v2278_v32 = vadd.s32 %v2266_v58, %v2254_v43  ;;  %vm2198_vm13 = vcmp.ne.s32.totalorder %v2186_v3, 0  ;;  %v2279_v3 = vadd.s32 %v6206_v19, %v2255_v29  ;;  %v6275_v19 = vld [vmem:[%s7352_s25] ss:$0 sm:$0xff]  ;;  %s743_s26 = scalar_lea.vmem %s7265_s6, %s7399_s1  ;;  %s7234_s1 = scalar_lea.vmem %s7279_s20, %s5303_s2 }
 0x1b4   : > { %v2666_v53 = vmul.f32 %v6242_v20, %v6192_v9  ;;  %v2286_v55 = vmul.u32 1024, %v2278_v32  ;;  %v2287_v40 = vmul.u32 1024, %v2279_v3 }
 0x1b5   : > { %v2120_v48 = vpop.permute.xlu0 %2119  ;;  %v2214_v35 = vpop.permute.xlu1 %2213 }
 0x1b6   : > { %vm2228_vm1 = vcmp.ne.s32.totalorder %v2214_v35, 0  ;;  %2724 = vperm.xlu0 %5130, %v2666_v53   ;;  %vm2129_vm9 = vcmp.ne.s32.totalorder %v2120_v48, 0 }
 0x1b7   : > { %vm2236_vm6 = vmand %vm2204_vm0, %vm2228_vm1 }
 0x1b8   : > { %vm2206_vm0 = vmand %vm2174_vm8, %vm2198_vm13  ;;  %vm7353_vm8 = vcmp.le.s32.totalorder %v5818_v5, 510  ;;  %vm7354_vm13 = vcmp.ge.s32.totalorder %v5818_v5, 4294966784 }
 0x1b9   : > { %v2156_v26 = vpop.permute.xlu0 %2155  ;;  %v2294_v15 = vpop.permute.xlu1 %2293  ;;  %vm2097_vm5 = vmand %vm7354_vm13, %vm7353_vm8  ;;  %vm1364_vm13 = vcmp.eq.s32.totalorder %v6275_v19, %v5836_v2 }
 0x1ba   : > { %v2308_v37 = vadd.s32 %v2294_v15, %v2284_v47  ;;  %2687 = vperm.xlu0 %5130, %v2674_v44   ;;  %vm2167_vm10 = vcmp.ne.s32.totalorder %v2156_v26, 0  ;;  %v2257_v26 = vmul.u32 1024, %v5834_v42 }
 0x1bc   : > { %v6254_v11 = vsel %vm2236_vm6, %v2308_v37, 3221225472  ;;  %vm2175_vm6 = vmand %vm2135_vm3, %vm2167_vm10  ;;  %vm1434_vm3 = vcmp.eq.s32.totalorder %v6275_v19, %v5794_v12 }
 0x1bd   : > { %v2160_v35 = vpop.permute.xlu0 %2159  ;;  %2408 = vperm.xlu1 %5129, %v6254_v11   ;;  %v6257_v53 = vpop.permute.xlu1 %2342  ;;  %vm6295_vm10 = vmand %vm2097_vm5, %vm2129_vm9  ;;  %vm1436_vm5 = vcmp.eq.s32.totalorder %v6275_v19, %v5842_v56 }
 0x1be   : > { %v2365_v32 = vmul.f32 %v6257_v53, %v5901_v45 }
 0x1c1   : > { %v2188_v61 = vpop.permute.xlu0 %2187  ;;  %v2218_v36 = vpop.permute.xlu1 %2217 }
 0x1c2   : > { %vm2230_vm1 = vcmp.ne.s32.totalorder %v2218_v36, 0  ;;  %vm2199_vm4 = vcmp.ne.s32.totalorder %v2188_v61, 0 }
 0x1c3   : > { %vm2238_vm2 = vmand %vm2206_vm0, %vm2230_vm1  ;;  %vm1361_vm0 = vcmp.eq.s32.totalorder %v6275_v19, %v6023_v22  ;;  %vm1433_vm1 = vcmp.eq.s32.totalorder %v6275_v19, %v5783_v16  ;;  %v2768_v16 = vmul.f32 %v6220_v46, %v6200_v28 }
 0x1c4   : > { %vm2207_vm15 = vmand %vm2175_vm6, %vm2199_vm4  ;;  %vm1363_vm6 = vcmp.eq.s32.totalorder %v6275_v19, %v5825_v17  ;;  %vm1362_vm4 = vcmp.eq.s32.totalorder %v6275_v19, %v6034_v33  ;;  %v1401_v22 = vsel %vm1361_vm0, %v6057_v38, 0.0  ;;  %v1474_v38 = vsel %vm1434_vm3, %v6076_v13, 0.0 }
 0x1c5   : > { %v2192_v47 = vpop.permute.xlu0 %2191  ;;  %v2298_v58 = vpop.permute.xlu1 %2297  ;;  %v1402_v46 = vsel %vm1362_vm4, %v5807_v30, 0.0  ;;  %v1404_v17 = vsel %vm1364_vm13, %v5867_v63, 0.0 }
 0x1c6   : > { %v2310_v44 = vadd.s32 %v2298_v58, %v2286_v55  ;;  %v2281_v58 = vadd.s32 %v6233_v41, %v2257_v26  ;;  %vm2201_vm8 = vcmp.ne.s32.totalorder %v2192_v47, 0 }
 0x1c8   : > { %v6265_v25 = vsel %vm2238_vm2, %v2310_v44, 3221225472  ;;  %vm2169_vm2 = vcmp.ne.s32.totalorder %v2160_v35, 0  ;;  %v1473_v35 = vsel %vm1433_vm1, %v6067_v62, 0.0  ;;  %v1403_v62 = vsel %vm1363_vm6, %v6095_v54, 0.0  ;;  %vm2096_vm1 = vmand %vm2080_vm12, %vm2088_vm14 }
 0x1c9   : > { %v2220_v52 = vpop.permute.xlu0 %2219  ;;  %2414 = vperm.xlu1 %5129, %v6265_v25   ;;  %v6268_v15 = vpop.permute.xlu1 %2346  ;;  %v1481_v30 = vadd.f32 %v1473_v35, %v1401_v22  ;;  %v2289_v3 = vmul.u32 1024, %v2281_v58  ;;  %v1476_v54 = vsel %vm1436_vm5, %v6116_v8, 0.0 }
 0x1ca   : > { %vm2231_vm7 = vcmp.ne.s32.totalorder %v2220_v52, 0  ;;  %v6288_v61 = vmul.f32 %v6268_v15, %v5953_v7  ;;  %v1482_v52 = vadd.f32 %v1474_v38, %v1402_v46  ;;  %v1484_v2 = vadd.f32 %v1476_v54, %v1404_v17 }
 0x1cb   : > { %vm2239_vm11 = vmand %vm2207_vm15, %vm2231_vm7  ;;  %vm1435_vm15 = vcmp.eq.s32.totalorder %v6275_v19, %v6087_v0  ;;  %v2539_v38 = vadd.s32 1, %v6265_v25 }
 0x1cc   : > { %vm2177_vm7 = vmand %vm6295_vm10, %vm2169_vm2  ;;  %v1475_v0 = vsel %vm1435_vm15, %v6102_v59, 0.0  ;;  %vm7359_vm15 = vcmp.le.s32.totalorder %v6080_v39, 510 }
 0x1cd   : > { %v2300_v43 = vpop.permute.xlu0 %2299  ;;  %v6282_v37 = vpop.permute.xlu1 %2374  ;;  %vm2209_vm9 = vmand %vm2177_vm7, %vm2201_vm8  ;;  %v1483_v59 = vadd.f32 %v1475_v0, %v1403_v62  ;;  %vm7360_vm7 = vcmp.ge.s32.totalorder %v6080_v39, 4294966784 }
 0x1ce   : > { %v2311_v36 = vadd.s32 %v2300_v43, %v2287_v40  ;;  %v2397_v29 = vmul.f32 %v6282_v37, %v2365_v32  ;;  %vm2098_vm8 = vmand %vm7360_vm7, %vm7359_vm15 }
 0x1d0   : > { %v6299_v42 = vsel %vm2239_vm11, %v2311_v36, 3221225472  ;;  %2447 = vperm.xlu1 %5129, %v2397_v29  }
 0x1d1   : > { %2417 = vperm.xlu0 %5130, %v6299_v42   ;;  %v6309_v48 = vpop.permute.xlu0 %2348  ;;  %v6311_v55 = vpop.permute.xlu1 %2378 }
 0x1d2   : > { %v2399_v33 = vmul.f32 %v6311_v55, %v6288_v61  ;;  %v2368_v35 = vmul.f32 %v6309_v48, %v6013_v4 }
 0x1d4   : > { %2457 = vperm.xlu1 %5129, %v2399_v33  }
 0x1d5   : > { %2818 = vperm.xlu0 %5130, %v2768_v16   ;;  %v2224_v41 = vpop.permute.xlu0 %2223  ;;  %v4587_v47 = vpop.f32.mrb[0].mxu0 }
 0x1d6   : > { %vm2233_vm11 = vcmp.ne.s32.totalorder %v2224_v41, 0  ;;  %v6335_v12 = vpop.permute.xlu1 %2506  ;;  %v1301_v13 = vpop.f32.mrb[1].mxu0  ;;  %v1491_v5 = vmul.f32 %v4587_v47, %v1483_v59  ;;  %v2776_v47 = vadd.s32 1025, %v6145_v24 }
 0x1d7   : > { %v4588_v44 = vpop.f32.mrb[2].mxu0  ;;  %v2529_v40 = vmul.f32 %v6335_v12, %v2365_v32  ;;  %v1489_v26 = vmul.f32 %v1481_v30, %v1301_v13  ;;  %vm2241_vm0 = vmand %vm2209_vm9, %vm2233_vm11  ;;  %v2537_v32 = vadd.s32 1, %v6254_v11  ;;  %v2770_v13 = vmul.f32 %v6242_v20, %v6210_v60 }
 0x1d8   : > { %v1304_v43 = vpop.f32.mrb[3].mxu0  ;;  %v1492_v56 = vmul.f32 %v4588_v44, %v1484_v2  ;;  %v6399_v2 = vmul.f32 %v6148_v51, %v5674_v14 }
 0x1d9   : > { %v1490_v36 = vmul.f32 %v1482_v52, %v1304_v43  ;;  %2583 = vperm.xlu1 %5129, %v2529_v40   ;;  %v2304_v29 = vpop.permute.xlu0 %2303  ;;  %4625 = vmatprep.mubr.f32.mxu1 %v1489_v26 }
 0x1da   : > { %v2313_v22 = vadd.s32 %v2304_v29, %v2289_v3  ;;  %v6347_v16 = vpop.permute.xlu1 %2269  ;;  %v2778_v29 = vadd.s32 1025, %v6168_v6 }
 0x1db   : > { %4626 = vmatmul.mubr.f32.vlgmr.msra.gmra.mrb[0].mxu1 %v1490_v36  ;;  %v2675_v36 = vadd.s32 1024, %v6265_v25 }
 0x1dc   : > { %v6349_v63 = vsel %vm2241_vm0, %v2313_v22, 3221225472  ;;  %4628 = vmatprep.mubr.f32.mxu1 %v1491_v5  ;;  %v2540_v5 = vadd.s32 1, %v6299_v42 }
 0x1dd   : > { %2548 = vperm.xlu1 %5129, %v2537_v32   ;;  %2423 = vperm.xlu0 %5130, %v6349_v63   ;;  %v6352_v8 = vpop.permute.xlu0 %2352 }
 0x1de   : > { %v6356_v58 = vpop.permute.xlu1 %2510  ;;  %v2370_v44 = vmul.f32 %v6352_v8, %v6065_v34 }
 0x1df   : > { %4629 = vmatmul.mubr.f32.gmra.mrb[2].mxu1 %v1492_v56  ;;  %v2531_v33 = vmul.f32 %v6356_v58, %v6288_v61 }
 0x1e1   : > { %2593 = vperm.xlu1 %5129, %v2531_v33   ;;  %v6360_v46 = vpop.permute.xlu0 %2380  ;;  %v2256_v33 = vmul.u32 1024, %v6045_v50  ;;  %v6413_v50 = vmul.f32 %v6171_v21, %v5705_v1 }
 0x1e2   : > { %v6363_v62 = vpop.permute.xlu1 %2634  ;;  %v2400_v0 = vmul.f32 %v6360_v46, %v2368_v35 }
 0x1e3   : > { %7357 = vst [vmem:[#allocation24_spill] sm:$0xff] %v6363_v62  ;;  %v6368_v41 = vmul.f32 %v6363_v62, %v5901_v45  ;;  %v2673_v45 = vadd.s32 1024, %v6254_v11 }
 0x1e4   : > { %2462 = vperm.xlu0 %5130, %v2400_v0   ;;  %v2280_v0 = vadd.s32 %v6347_v16, %v2256_v33 }
 0x1e5   : > { %v2665_v30 = vmul.f32 %v6368_v41, %v6282_v37  ;;  %2554 = vperm.xlu1 %5129, %v2539_v38   ;;  %v6373_v3 = vpop.permute.xlu0 %2384  ;;  %v2880_v38 = vmul.f32 %v6399_v2, %v6179_v18 }
 0x1e6   : > { %v2118_v61 = vpop.permute.xlu1 %2117  ;;  %v2402_v40 = vmul.f32 %v6373_v3, %v2370_v44 }
 0x1e7   : > { %vm2128_vm3 = vcmp.ne.s32.totalorder %v2118_v61, 0  ;;  %v2888_v61 = vadd.s32 1048576, %v6145_v24 }
 0x1e8   : > { %2785 = vperm.xlu0 %5130, %v2776_v47   ;;  %vm2136_vm10 = vmand %vm2096_vm1, %vm2128_vm3  ;;  %v2542_v47 = vadd.s32 1, %v6349_v63 }
 0x1e9   : > { %2719 = vperm.xlu1 %5129, %v2665_v30   ;;  %v6381_v26 = vpop.permute.xlu0 %2512  ;;  %v2288_v30 = vmul.u32 1024, %v2280_v0 }
 0x1ea   : > { %v2274_v52 = vpop.permute.xlu1 %2273  ;;  %v2532_v20 = vmul.f32 %v6381_v26, %v2368_v35 }
 0x1ec   : > { %2828 = vperm.xlu0 %5130, %v2770_v13  }
 0x1ed   : > { %2684 = vperm.xlu1 %5129, %v2673_v45   ;;  %v6395_v22 = vpop.permute.xlu0 %2516 }
 0x1ee   : > { %v6383_v17 = vpop.permute.xlu1 %2638  ;;  %v2534_v56 = vmul.f32 %v6395_v22, %v2370_v44  ;;  %v2258_v44 = vmul.u32 1024, %v6091_v57 }
 0x1ef   : > { %7358 = vst [vmem:[#allocation25_spill] sm:$0xff] %v6383_v17  ;;  %v6387_v54 = vmul.f32 %v6383_v17, %v5953_v7 }
 0x1f0   : > { %2472 = vperm.xlu0 %5130, %v2402_v40   ;;  %v2882_v40 = vmul.f32 %v6413_v50, %v6192_v9  ;;  %v2282_v57 = vadd.s32 %v2274_v52, %v2258_v44  ;;  %v7367_v44 = vld [vmem:[#allocation8_spill] sm:$0xff] }
 0x1f1   : > { %v2667_v59 = vmul.f32 %v6387_v54, %v6311_v55  ;;  %v6420_v16 = vpop.permute.xlu0 %2640  ;;  %vm1367_vm15 = vcmp.eq.s32.totalorder %v6275_v19, %v7367_v44 }
 0x1f2   : > { %v2122_v43 = vpop.permute.xlu1 %2121  ;;  %7361 = vst [vmem:[#allocation26_spill] sm:$0xff] %v6420_v16  ;;  %v6425_v21 = vmul.f32 %v6420_v16, %v6013_v4  ;;  %v7379_v16 = vld [vmem:[#allocation20_spill] sm:$0xff] }
 0x1f3   : > { %2729 = vperm.xlu1 %5129, %v2667_v59   ;;  %vm2130_vm13 = vcmp.ne.s32.totalorder %v2122_v43, 0 }
 0x1f4   : > { %2598 = vperm.xlu0 %5130, %v2532_v20   ;;  %vm2138_vm9 = vmand %vm2098_vm8, %vm2130_vm13  ;;  %v2769_v20 = vmul.f32 %v6368_v41, %v6335_v12  ;;  %v2668_v4 = vmul.f32 %v6425_v21, %v6360_v46  ;;  %v2890_v41 = vadd.s32 1048576, %v6168_v6 }
 0x1f5   : > { %v6436_v43 = vpop.permute.xlu0 %2644 }
 0x1f6   : > { %v2158_v32 = vpop.permute.xlu1 %2157  ;;  %7363 = vst [vmem:[#allocation28_spill] sm:$0xff] %v6436_v43 }
 0x1f7   : > { %2690 = vperm.xlu1 %5129, %v2675_v36   ;;  %vm2168_vm2 = vcmp.ne.s32.totalorder %v2158_v32, 0 }
 0x1f8   : > { %2791 = vperm.xlu0 %5130, %v2778_v29   ;;  %vm2176_vm6 = vmand %vm2136_vm10, %vm2168_vm2  ;;  %v2290_v29 = vmul.u32 1024, %v2282_v57 }
 0x1fa   : > { %v2162_v7 = vpop.permute.xlu1 %2161 }
 0x1fb   : > { %vm2170_vm11 = vcmp.ne.s32.totalorder %v2162_v7, 0  ;;  %v6445_v7 = vmul.f32 %v6436_v43, %v6065_v34 }
 0x1fc   : > { %2557 = vperm.xlu0 %5130, %v2540_v5   ;;  %vm2178_vm0 = vmand %vm2138_vm9, %vm2170_vm11 }
 0x1fd   : > { %v2670_v0 = vmul.f32 %v6445_v7, %v6373_v3 }
 0x1fe   : > { %v2190_v35 = vpop.permute.xlu1 %2189 }
 0x1ff   : > { %vm2200_vm4 = vcmp.ne.s32.totalorder %v2190_v35, 0 }
 0x200   : > { %2608 = vperm.xlu0 %5130, %v2534_v56   ;;  %vm2208_vm12 = vmand %vm2176_vm6, %vm2200_vm4  ;;  %v6441_v32 = vpop.permute.xlu0 %2405  ;;  %v2676_v56 = vadd.s32 1024, %v6299_v42  ;;  %vm1365_vm6 = vcmp.eq.s32.totalorder %v6275_v19, %v5895_v31  ;;  %vm1437_vm4 = vcmp.eq.s32.totalorder %v6275_v19, %v6126_v23  ;;  %v7369_v31 = vld [vmem:[#allocation14_spill] sm:$0xff]  ;;  %v2678_v23 = vadd.s32 1024, %v6349_v63 }
 0x201   : > { %v1477_v57 = vsel %vm1437_vm4, %v7369_v31, 0.0 }
 0x202   : > { %v2194_v51 = vpop.permute.xlu1 %2193 }
 0x203   : > { %vm2202_vm1 = vcmp.ne.s32.totalorder %v2194_v51, 0 }
 0x204   : > { %2930 = vperm.xlu0 %5130, %v2880_v38   ;;  %vm2210_vm3 = vmand %vm2178_vm0, %vm2202_vm1 }
 0x206   : > { %v2222_v27 = vpop.permute.xlu1 %2221 }
 0x207   : > { %vm2232_vm14 = vcmp.ne.s32.totalorder %v2222_v27, 0 }
 0x208   : > { %2563 = vperm.xlu0 %5130, %v2542_v47   ;;  %vm2240_vm5 = vmand %vm2208_vm12, %vm2232_vm14 }
 0x20a   : > { %v2302_v13 = vpop.permute.xlu1 %2301 }
 0x20b   : > { %v2312_v45 = vadd.s32 %v2302_v13, %v2288_v30  ;;  %v2984_v30 = vmul.f32 %v6399_v2, %v6200_v28  ;;  %v7366_v13 = vld [vmem:[#allocation4_spill] sm:$0xff]  ;;  %v2777_v2 = vadd.s32 1025, %v6254_v11 }
 0x20c   : > { %2897 = vperm.xlu0 %5130, %v2888_v61   ;;  %v6448_v35 = vpop.permute.xlu0 %2411  ;;  %v7365_v61 = vld [vmem:[#allocation3_spill] sm:$0xff]  ;;  %vm1438_vm14 = vcmp.eq.s32.totalorder %v6275_v19, %v7366_v13  ;;  %v7375_v13 = vld [vmem:[#allocation10_spill] sm:$0xff] }
 0x20d   : > { %v6429_v39 = vsel %vm2240_vm5, %v2312_v45, 3221225472  ;;  %vm1366_vm12 = vcmp.eq.s32.totalorder %v6275_v19, %v7365_v61  ;;  %vm1440_vm13 = vcmp.eq.s32.totalorder %v6275_v19, %v7375_v13  ;;  %v7378_v13 = vld [vmem:[#allocation11_spill] sm:$0xff] }
 0x20e   : > { %2420 = vperm.xlu1 %5129, %v6429_v39   ;;  %v6434_v59 = vpop.permute.xlu1 %2350  ;;  %v1480_v62 = vsel %vm1440_vm13, %v7379_v16, 0.0  ;;  %v1626_v16 = vld [vmem:[%s7267_s8] sm:$0xff] }
 0x20f   : > { %7362 = vst [vmem:[#allocation27_spill] sm:$0xff] %v6434_v59  ;;  %v2369_v51 = vmul.f32 %v6434_v59, %v6166_v49 }
 0x210   : > { %2940 = vperm.xlu0 %5130, %v2882_v40   ;;  %v7368_v40 = vld [vmem:[#allocation13_spill] sm:$0xff] }
 0x212   : > { %2823 = vperm.xlu1 %5129, %v2769_v20   ;;  %v2226_v36 = vpop.permute.xlu1 %2225  ;;  %v1405_v20 = vsel %vm1365_vm6, %v7368_v40, 0.0 }
 0x213   : > { %vm2234_vm10 = vcmp.ne.s32.totalorder %v2226_v36, 0  ;;  %v6459_v34 = vpop.permute.xlu0 %2442 }
 0x214   : > { %2734 = vperm.xlu0 %5130, %v2668_v4   ;;  %vm2242_vm2 = vmand %vm2210_vm3, %vm2234_vm10  ;;  %v7370_v4 = vld [vmem:[#allocation16_spill] sm:$0xff] }
 0x215   : > { %vm1439_vm7 = vcmp.eq.s32.totalorder %v6275_v19, %v7370_v4 }
 0x216   : > { %v2306_v52 = vpop.permute.xlu1 %2305 }
 0x217   : > { %v2314_v5 = vadd.s32 %v2306_v52, %v2290_v29  ;;  %v6476_v45 = vpop.permute.xlu0 %2452  ;;  %v2771_v29 = vmul.f32 %v6387_v54, %v6356_v58  ;;  %v7377_v54 = vld [vmem:[#allocation19_spill] sm:$0xff] }
 0x218   : > { %2903 = vperm.xlu0 %5130, %v2890_v41   ;;  %v7371_v41 = vld [vmem:[#allocation22_spill] sm:$0xff]  ;;  %v1479_v31 = vsel %vm1439_vm7, %v7377_v54, 0.0 }
 0x219   : > { %v6450_v33 = vsel %vm2242_vm2, %v2314_v5, 3221225472  ;;  %v7372_v5 = vld [vmem:[#allocation6_spill] sm:$0xff] }
 0x21a   : > { %2426 = vperm.xlu1 %5129, %v6450_v33   ;;  %v6453_v38 = vpop.permute.xlu1 %2354 }
 0x21b   : > { %7364 = vst [vmem:[#allocation29_spill] sm:$0xff] %v6453_v38  ;;  %v2371_v52 = vmul.f32 %v6453_v38, %v7371_v41  ;;  %v1485_v38 = vadd.f32 %v1477_v57, %v1405_v20 }
 0x21c   : > { %2693 = vperm.xlu0 %5130, %v2676_v56   ;;  %v1406_v56 = vsel %vm1366_vm12, %v7372_v5, 0.0  ;;  %v6501_v5 = vpop.permute.xlu0 %2578 }
 0x21e   : > { %v6461_v47 = vpop.permute.xlu1 %2382 }
 0x21f   : > { %v2401_v27 = vmul.f32 %v6461_v47, %v2369_v51 }
 0x220   : > { %2744 = vperm.xlu0 %5130, %v2670_v0   ;;  %v7373_v0 = vld [vmem:[#allocation9_spill] sm:$0xff] }
 0x221   : > { %2467 = vperm.xlu1 %5129, %v2401_v27   ;;  %vm1368_vm8 = vcmp.eq.s32.totalorder %v6275_v19, %v7373_v0  ;;  %v7374_v27 = vld [vmem:[#allocation15_spill] sm:$0xff] }
 0x222   : > { %v6484_v36 = vpop.permute.xlu1 %2386  ;;  %v1478_v61 = vsel %vm1438_vm14, %v7374_v27, 0.0  ;;  %v1408_v17 = vsel %vm1368_vm8, %v7378_v13, 0.0  ;;  %v7381_v13 = vld [vmem:[#allocation23_spill] sm:$0xff] }
 0x223   : > { %v1486_v27 = vadd.f32 %v1478_v61, %v1406_v56  ;;  %v2403_v43 = vmul.f32 %v6484_v36, %v2371_v52  ;;  %v1627_v56 = vld [vmem:[%s7267_s8 + $0x8] sm:$0xff]  ;;  %v6518_v61 = vpop.permute.xlu0 %2545 }
 0x224   : > { %3034 = vperm.xlu0 %5130, %v2984_v30   ;;  %v7376_v30 = vld [vmem:[#allocation18_spill] sm:$0xff] }
 0x225   : > { %2788 = vperm.xlu1 %5129, %v2777_v2   ;;  %v1407_v40 = vsel %vm1367_vm15, %v7376_v30, 0.0  ;;  %v2992_v30 = vadd.s32 1048577, %v6145_v24 }
 0x226   : > { %v1487_v19 = vadd.f32 %v1479_v31, %v1407_v40  ;;  %v6507_v54 = vpop.permute.xlu1 %2514 }
 0x227   : > { %v4591_v4 = vpop.f32.mrb[4].mxu0 }
 0x228   : > { %2699 = vperm.xlu0 %5130, %v2678_v23   ;;  %v1317_v2 = vpop.f32.mrb[5].mxu0  ;;  %v1495_v57 = vmul.f32 %v4591_v4, %v1487_v19  ;;  %v1488_v23 = vadd.f32 %v1480_v62, %v1408_v17  ;;  %v2772_v62 = vmul.f32 %v6425_v21, %v6381_v26  ;;  %v2779_v17 = vadd.s32 1025, %v6265_v25 }
 0x229   : > { %v1493_v59 = vmul.f32 %v1485_v38, %v1317_v2  ;;  %2833 = vperm.xlu1 %5129, %v2771_v29   ;;  %v4592_v0 = vpop.f32.mrb[6].mxu0  ;;  %v2986_v38 = vmul.f32 %v6413_v50, %v6210_v60  ;;  %v2533_v29 = vmul.f32 %v6507_v54, %v2369_v51  ;;  %v6523_v50 = vpop.permute.xlu0 %2588  ;;  %v2994_v51 = vadd.s32 1048577, %v6168_v6  ;;  %v7380_v2 = vld [vmem:[#allocation2_spill] sm:$0xff] }
 0x22a   : > { %v1320_v44 = vpop.f32.mrb[7].mxu0  ;;  %v1496_v40 = vmul.f32 %v4592_v0, %v1488_v23  ;;  %v6527_v31 = vpop.permute.xlu1 %2518  ;;  %v2780_v21 = vadd.s32 1025, %v6299_v42  ;;  %v2873_v0 = vmul.f32 %v6257_v53, %v7380_v2  ;;  %v3088_v19 = vmul.f32 %v7381_v13, %v5674_v14 }
 0x22b   : > { %v1494_v20 = vmul.f32 %v1486_v27, %v1320_v44  ;;  %4631 = vmatprep.mubr.f32.mxu1 %v1493_v59  ;;  %v4889_v59 = vpack.c.bf16 %v1627_v56, %v1626_v16  ;;  %v2535_v4 = vmul.f32 %v6527_v31, %v2371_v52  ;;  %v2774_v44 = vmul.f32 %v6445_v7, %v6395_v22 }
 0x22c   : > { %3001 = vperm.xlu0 %5130, %v2992_v30   ;;  %v2881_v30 = vmul.f32 %v2873_v0, %v6282_v37  ;;  %v2543_v53 = vadd.s32 1, %v6450_v33  ;;  %v2782_v52 = vadd.s32 1025, %v6349_v63  ;;  %v3104_v56 = vadd.s32 1049600, %v6145_v24 }
 0x22d   : > { %2477 = vperm.xlu1 %5129, %v2403_v43   ;;  %4632 = vmatmul.mubr.f32.gmra.mrb[4].mxu1 %v1494_v20  ;;  %v2541_v43 = vadd.s32 1, %v6429_v39  ;;  %v6533_v27 = vpop.permute.xlu0 %2551  ;;  %v3096_v20 = vmul.f32 %v3088_v19, %v6179_v18  ;;  %v3090_v18 = vmul.f32 %v6238_v10, %v5705_v1 }
 0x22e   : > { %4634 = vmatprep.mubr.f32.mxu1 %v1495_v57  ;;  %4890 = vmatprep.subr.bf16.mxu0 %v4889_v59  ;;  %v6545_v14 = vpop.permute.xlu1 %2642 }
 0x22f   : > { %4892 = vmatpush3.bf16.msra.mxu0 %v4889_v59  ;;  %v2661_v16 = vmul.f32 %v6545_v14, %v6166_v49 }
 0x230   : > { %3044 = vperm.xlu0 %5130, %v2986_v38   ;;  %v7382_v38 = vld [vmem:[#allocation5_spill] sm:$0xff] }
 0x231   : > { %2603 = vperm.xlu1 %5129, %v2533_v29   ;;  %4635 = vmatmul.mubr.f32.gmra.mrb[6].mxu1 %v1496_v40  ;;  %v6541_v57 = vpop.permute.xlu0 %2714  ;;  %v2875_v7 = vmul.f32 %v6268_v15, %v7382_v38  ;;  %v2889_v29 = vadd.s32 1048576, %v6254_v11  ;;  %v3098_v15 = vmul.f32 %v3090_v18, %v6192_v9  ;;  %v2669_v1 = vmul.f32 %v2661_v16, %v6461_v47 }
 0x233   : > { %v2883_v40 = vmul.f32 %v2875_v7, %v6311_v55 }
 0x234   : > { %2838 = vperm.xlu0 %5130, %v2772_v62   ;;  %v7383_v62 = vld [vmem:[#allocation7_spill] sm:$0xff] }
 0x235   : > { %2794 = vperm.xlu1 %5129, %v2779_v17   ;;  %v6549_v23 = vpop.permute.xlu0 %2681  ;;  %v2876_v17 = vmul.f32 %v6309_v48, %v7383_v62 }
 0x237   : > { %v2884_v49 = vmul.f32 %v2876_v17, %v6360_v46 }
 0x238   : > { %3007 = vperm.xlu0 %5130, %v2994_v51  }
 0x239   : > { %2560 = vperm.xlu1 %5129, %v2541_v43   ;;  %v6557_v59 = vpop.permute.xlu0 %2724  ;;  %v6563_v43 = vpop.permute.xlu1 %2646 }
 0x23a   : > { %v6574_v9 = vmul.f32 %v6563_v43, %v7371_v41 }
 0x23c   : > { %2797 = vperm.xlu0 %5130, %v2780_v21   ;;  %v2891_v21 = vadd.s32 1048576, %v6265_v25 }
 0x23d   : > { %2613 = vperm.xlu1 %5129, %v2535_v4   ;;  %v6567_v10 = vpop.permute.xlu0 %2687  ;;  %v6569_v51 = vpop.permute.xlu1 %2408  ;;  %v2677_v4 = vadd.s32 1024, %v6429_v39 }
 0x240   : > { %2848 = vperm.xlu0 %5130, %v2774_v44   ;;  %v3106_v44 = vadd.s32 1049600, %v6168_v6 }
 0x241   : > { %2935 = vperm.xlu1 %5129, %v2881_v30   ;;  %v7384_v30 = vld [vmem:[#allocation12_spill] sm:$0xff] }
 0x244   : > { %3146 = vperm.xlu0 %5130, %v3096_v20   ;;  %v6582_v20 = vmul.f32 %v6352_v8, %v7384_v30  ;;  %v2985_v8 = vmul.f32 %v2873_v0, %v6335_v12  ;;  %v2993_v0 = vadd.s32 1048577, %v6254_v11 }
 0x245   : > { %2566 = vperm.xlu1 %5129, %v2543_v53   ;;  %v2892_v53 = vadd.s32 1048576, %v6299_v42 }
 0x248   : > { %2803 = vperm.xlu0 %5130, %v2782_v52   ;;  %v6577_v13 = vpop.permute.xlu1 %2414  ;;  %v2671_v52 = vmul.f32 %v6574_v9, %v6484_v36 }
 0x249   : > { %2900 = vperm.xlu1 %5129, %v2889_v29  }
 0x24c   : > { %3113 = vperm.xlu0 %5130, %v3104_v56   ;;  %v2886_v56 = vmul.f32 %v6582_v20, %v6373_v3 }
 0x24d   : > { %2945 = vperm.xlu1 %5129, %v2883_v40  }
 0x24f   : > { %v6587_v41 = vpop.permute.xlu1 %2447 }
 0x250   : > { %3156 = vperm.xlu0 %5130, %v3098_v15   ;;  %v2418_v48 = vpop.permute.xlu0 %2417 }
 0x251   : > { %2739 = vperm.xlu1 %5129, %v2669_v1   ;;  %v2679_v1 = vadd.s32 1024, %v6450_v33 }
 0x253   : > { %v6596_v15 = vpop.permute.xlu1 %2457 }
 0x254   : > { %2950 = vperm.xlu0 %5130, %v2884_v49   ;;  %v6589_v29 = vpop.permute.xlu0 %2818  ;;  %v3200_v49 = vmul.f32 %v3088_v19, %v6200_v28  ;;  %v2987_v19 = vmul.f32 %v2875_v7, %v6356_v58  ;;  %v2988_v7 = vmul.f32 %v2876_v17, %v6381_v26 }
 0x255   : > { %2906 = vperm.xlu1 %5129, %v2891_v21  }
 0x258   : > { %3119 = vperm.xlu0 %5130, %v3106_v44   ;;  %v6601_v44 = vpop.permute.xlu1 %2583 }
 0x259   : > { %2696 = vperm.xlu1 %5129, %v2677_v4   ;;  %v2894_v4 = vadd.s32 1048576, %v6349_v63 }
 0x25c   : > { %2909 = vperm.xlu0 %5130, %v2892_v53   ;;  %v6593_v40 = vpop.permute.xlu0 %2423 }
 0x25d   : > { %2749 = vperm.xlu1 %5129, %v2671_v52   ;;  %v3208_v52 = vadd.s32 1049601, %v6145_v24 }
 0x260   : > { %2960 = vperm.xlu0 %5130, %v2886_v56   ;;  %v6612_v56 = vpop.permute.xlu1 %2548 }
 0x261   : > { %3039 = vperm.xlu1 %5129, %v2985_v8   ;;  %v2773_v8 = vmul.f32 %v2661_v16, %v6507_v54 }
 0x263   : > { %v2463_v21 = vpop.permute.xlu0 %2462 }
 0x264   : > { %3250 = vperm.xlu0 %5130, %v3200_v49   ;;  %v3202_v49 = vmul.f32 %v3090_v18, %v6210_v60  ;;  %v6625_v16 = vpop.permute.xlu1 %2593 }
 0x265   : > { %2702 = vperm.xlu1 %5129, %v2679_v1   ;;  %v6615_v1 = vld [vmem:[%s743_s26] ss:$0 sm:$0xff] }
 0x266   : > { %vm2434_vm5 = vcmp.eq.s32.totalorder %v6448_v35, %v6615_v1  ;;  %vm2570_vm9 = vcmp.eq.s32.totalorder %v6533_v27, %v6615_v1  ;;  %vm2436_vm11 = vcmp.eq.s32.totalorder %v2418_v48, %v6615_v1  ;;  %vm2706_vm0 = vcmp.eq.s32.totalorder %v6567_v10, %v6615_v1 }
 0x267   : > { %v6603_v53 = vpop.permute.xlu0 %2785  ;;  %v2492_v35 = vsel %vm2436_vm11, %v2463_v21, 0.0  ;;  %v2781_v48 = vadd.s32 1025, %v6429_v39  ;;  %vm2432_vm3 = vcmp.eq.s32.totalorder %v6441_v32, %v6615_v1  ;;  %vm2568_vm10 = vcmp.eq.s32.totalorder %v6518_v61, %v6615_v1 }
 0x268   : > { %2915 = vperm.xlu0 %5130, %v2894_v4   ;;  %v2490_v4 = vsel %vm2434_vm5, %v6476_v45, 0.0  ;;  %v2995_v45 = vadd.s32 1048577, %v6265_v25  ;;  %v2996_v21 = vadd.s32 1048577, %v6299_v42  ;;  %vm2704_vm6 = vcmp.eq.s32.totalorder %v6549_v23, %v6615_v1 }
 0x269   : > { %3004 = vperm.xlu1 %5129, %v2993_v0   ;;  %v2618_v0 = vadd.f32 %v6523_v50, %v2490_v4  ;;  %v3210_v50 = vadd.s32 1049601, %v6168_v6  ;;  %v2488_v6 = vsel %vm2432_vm3, %v6459_v34, 0.0  ;;  %vm2438_vm4 = vcmp.eq.s32.totalorder %v6593_v40, %v6615_v1 }
 0x26a   : > { %vm2808_vm12 = vcmp.eq.s32.totalorder %v6603_v53, %v6615_v1  ;;  %v7387_v53 = vld [vmem:[#allocation25_spill] sm:$0xff]  ;;  %vm2435_vm5 = vcmp.eq.s32.totalorder %v6577_v13, %v6615_v1 }
 0x26b   : > { %v2829_v28 = vpop.permute.xlu0 %2828  ;;  %v2626_v60 = vsel %vm2570_vm9, %v2618_v0, %v2490_v4 }
 0x26c   : > { %3217 = vperm.xlu0 %5130, %v3208_v52   ;;  %v2754_v27 = vadd.f32 %v6557_v59, %v2626_v60  ;;  %v2775_v59 = vmul.f32 %v6574_v9, %v6527_v31  ;;  %v2990_v9 = vmul.f32 %v6582_v20, %v6395_v22  ;;  %v7386_v20 = vld [vmem:[#allocation26_spill] sm:$0xff] }
 0x26d   : > { %3049 = vperm.xlu1 %5129, %v2987_v19  }
 0x26e   : > { %v2762_v17 = vsel %vm2706_vm0, %v2754_v27, %v2626_v60 }
 0x26f   : > { %v2473_v24 = vpop.permute.xlu0 %2472  ;;  %v2858_v19 = vadd.f32 %v2829_v28, %v2762_v17  ;;  %v7385_v28 = vld [vmem:[#allocation24_spill] sm:$0xff] }
 0x270   : > { %3260 = vperm.xlu0 %5130, %v3202_v49   ;;  %v6634_v49 = vpop.permute.xlu1 %2554  ;;  %v6649_v4 = vmul.f32 %v7385_v28, %v7380_v2  ;;  %v2494_v60 = vsel %vm2438_vm4, %v2473_v24, 0.0  ;;  %v7390_v28 = vld [vmem:[#allocation27_spill] sm:$0xff] }
 0x271   : > { %2843 = vperm.xlu1 %5129, %v2773_v8   ;;  %vm2571_vm9 = vcmp.eq.s32.totalorder %v6634_v49, %v6615_v1 }
 0x273   : > { %v2599_v18 = vpop.permute.xlu0 %2598 }
 0x274   : > { %v2620_v52 = vadd.f32 %v2599_v18, %v2492_v35  ;;  %3054 = vperm.xlu0 %5130, %v2988_v7   ;;  %v2616_v7 = vadd.f32 %v6501_v5, %v2488_v6  ;;  %v6660_v2 = vpop.permute.xlu1 %2719  ;;  %v3097_v5 = vmul.f32 %v6649_v4, %v6282_v37  ;;  %v2783_v37 = vadd.s32 1025, %v6450_v33 }
 0x275   : > { %3010 = vperm.xlu1 %5129, %v2995_v45   ;;  %v3092_v45 = vmul.f32 %v7386_v20, %v7383_v62  ;;  %v3107_v20 = vadd.s32 1049600, %v6265_v25 }
 0x276   : > { %v2624_v0 = vsel %vm2568_vm10, %v2616_v7, %v2488_v6  ;;  %v3108_v6 = vadd.s32 1049600, %v6299_v42 }
 0x277   : > { %v2792_v8 = vpop.permute.xlu0 %2791  ;;  %v2752_v61 = vadd.f32 %v6541_v57, %v2624_v0  ;;  %v3100_v24 = vmul.f32 %v3092_v45, %v6360_v46 }
 0x278   : > { %vm2810_vm1 = vcmp.eq.s32.totalorder %v2792_v8, %v6615_v1  ;;  %3223 = vperm.xlu0 %5130, %v3210_v50   ;;  %v6678_v50 = vmul.f32 %v7387_v53, %v7382_v38  ;;  %v7388_v8 = vld [vmem:[#allocation28_spill] sm:$0xff] }
 0x279   : > { %2800 = vperm.xlu1 %5129, %v2781_v48   ;;  %v6641_v10 = vsel %vm2810_vm1, %v2858_v19, %v2762_v17  ;;  %v2760_v27 = vsel %vm2704_vm6, %v2752_v61, %v2624_v0  ;;  %v6674_v17 = vpop.permute.xlu1 %2684  ;;  %v3094_v48 = vmul.f32 %v7388_v8, %v7384_v30  ;;  %vm1635_vm1 = vcmask 130048  }
 0x27a   : > { %v2856_v57 = vadd.f32 %v6589_v29, %v2760_v27  ;;  %v3105_v29 = vadd.s32 1049600, %v6254_v11  ;;  %v3099_v38 = vmul.f32 %v6678_v50, %v6311_v55  ;;  %vm2569_vm6 = vcmp.eq.s32.totalorder %v6612_v56, %v6615_v1 }
 0x27b   : > { %v2558_v32 = vpop.permute.xlu0 %2557  ;;  %v3102_v30 = vmul.f32 %v3094_v48, %v6373_v3  ;;  %v3110_v3 = vadd.s32 1049600, %v6349_v63  ;;  %v3206_v8 = vmul.f32 %v3094_v48, %v6395_v22  ;;  %v3214_v48 = vadd.s32 1049601, %v6349_v63 }
 0x27c   : > { %vm2572_vm2 = vcmp.eq.s32.totalorder %v2558_v32, %v6615_v1  ;;  %3013 = vperm.xlu0 %5130, %v2996_v21   ;;  %v2864_v40 = vsel %vm2808_vm12, %v2856_v57, %v2760_v27  ;;  %v7389_v21 = vld [vmem:[#allocation17_spill] sm:$0xff]  ;;  %v3204_v27 = vmul.f32 %v3092_v45, %v6381_v26  ;;  %v3212_v45 = vadd.s32 1049601, %v6299_v42 }
 0x27d   : > { %2853 = vperm.xlu1 %5129, %v2775_v59   ;;  %v6657_v34 = vsel %vm2572_vm2, %v2620_v52, %v2492_v35  ;;  %v2998_v35 = vadd.s32 1048577, %v6349_v63  ;;  %v6683_v59 = vpop.permute.xlu1 %2729  ;;  %v6693_v7 = vmul.f32 %v7390_v28, %v7389_v21  ;;  %v7391_v57 = vld [vmem:[#allocation21_spill] sm:$0xff]  ;;  %v3201_v42 = vmul.f32 %v6649_v4, %v6335_v12  ;;  %v5137_v28 = vld [vmem:[%s5331_s29 + $0x10] sm:$0xff]  }
 0x27e   : > { %v3209_v4 = vadd.s32 1049601, %v6254_v11  ;;  %v2491_v11 = vsel %vm2435_vm5, %v6596_v15, 0.0  ;;  %vm2433_vm2 = vcmp.eq.s32.totalorder %v6569_v51, %v6615_v1 }
 0x27f   : > { %v2609_v18 = vpop.permute.xlu0 %2608  ;;  %v2885_v55 = vmul.f32 %v6693_v7, %v6461_v47 }
 0x280   : > { %v2622_v23 = vadd.f32 %v2609_v18, %v2494_v60  ;;  %3064 = vperm.xlu0 %5130, %v2990_v9  }
 0x281   : > { %3151 = vperm.xlu1 %5129, %v3097_v5   ;;  %v6699_v0 = vpop.permute.xlu1 %2690 }
 0x282   : > { %vm2707_vm3 = vcmp.eq.s32.totalorder %v6699_v0, %v6615_v1 }
 0x283   : > { %v2931_v52 = vpop.permute.xlu0 %2930 }
 0x284   : > { %v2968_v62 = vadd.f32 %v2931_v52, %v2864_v40  ;;  %3019 = vperm.xlu0 %5130, %v2998_v35   ;;  %v7392_v35 = vld [vmem:[#allocation29_spill] sm:$0xff] }
 0x285   : > { %2806 = vperm.xlu1 %5129, %v2783_v37   ;;  %v2893_v37 = vadd.s32 1048576, %v6429_v39 }
 0x287   : > { %v2564_v19 = vpop.permute.xlu0 %2563 }
 0x288   : > { %vm2574_vm14 = vcmp.eq.s32.totalorder %v2564_v19, %v6615_v1  ;;  %3166 = vperm.xlu0 %5130, %v3100_v24   ;;  %v5135_v24 = vld [vmem:[%s5331_s29] sm:$0xff]  }
 0x289   : > { %3116 = vperm.xlu1 %5129, %v3105_v29   ;;  %v6686_v46 = vsel %vm2574_vm14, %v2622_v23, %v2494_v60  ;;  %4685 = vmatprep.subr.bf16.mxu1 %v5135_v24  ;;  %v5136_v29 = vld [vmem:[%s5331_s29 + $0x8] sm:$0xff]   ;;  %vm2705_vm14 = vcmp.eq.s32.totalorder %v6674_v17, %v6615_v1 }
 0x28a   : > { %4686 = vmatpush3.bf16.msra.mxu1 %v5135_v24 }
 0x28b   : > { %v2898_v32 = vpop.permute.xlu0 %2897  ;;  %4687 = vmatprep.subr.bf16.mxu1 %v5136_v29 }
 0x28c   : > { %vm2920_vm15 = vcmp.eq.s32.totalorder %v2898_v32, %v6615_v1  ;;  %3125 = vperm.xlu0 %5130, %v3108_v6  }
 0x28d   : > { %3161 = vperm.xlu1 %5129, %v3099_v38   ;;  %v6697_v9 = vsel %vm2920_vm15, %v2968_v62, %v2864_v40  ;;  %v6704_v60 = vpop.permute.xlu1 %2420  ;;  %v6712_v40 = vmul.f32 %v7392_v35, %v7391_v57  ;;  %v2619_v35 = vadd.f32 %v6625_v16, %v2491_v11  ;;  %v5141_v16 = vld [vmem:[%s5331_s29 + $0x30] sm:$0xff]  }
 0x28e   : > { %4688 = vmatpush3.bf16.msra.mxu1 %v5136_v29  ;;  %vm2437_vm0 = vcmp.eq.s32.totalorder %v6704_v60, %v6615_v1 }
 0x28f   : > { %v2941_v61 = vpop.permute.xlu0 %2940  ;;  %v2887_v19 = vmul.f32 %v6712_v40, %v6484_v36  ;;  %4689 = vmatprep.subr.bf16.mxu1 %v5137_v28 }
 0x290   : > { %v2970_v5 = vadd.f32 %v2941_v61, %v6641_v10  ;;  %3176 = vperm.xlu0 %5130, %v3102_v30   ;;  %v5138_v61 = vld [vmem:[%s5331_s29 + $0x18] sm:$0xff]  }
 0x291   : > { %2955 = vperm.xlu1 %5129, %v2885_v55   ;;  %v6716_v62 = vpop.permute.xlu1 %2823 }
 0x292   : > { %4690 = vmatpush3.bf16.msra.mxu1 %v5137_v28 }
 0x293   : > { %v2735_v18 = vpop.permute.xlu0 %2734  ;;  %4691 = vmatprep.subr.bf16.mxu1 %v5138_v61 }
 0x294   : > { %v2756_v23 = vadd.f32 %v2735_v18, %v6657_v34  ;;  %3131 = vperm.xlu0 %5130, %v3110_v3   ;;  %v5139_v3 = vld [vmem:[%s5331_s29 + $0x20] sm:$0xff]  }
 0x295   : > { %3122 = vperm.xlu1 %5129, %v3107_v20   ;;  %v3203_v20 = vmul.f32 %v6678_v50, %v6356_v58  ;;  %v2627_v50 = vsel %vm2571_vm9, %v2619_v35, %v2491_v11 }
 0x296   : > { %4692 = vmatpush3.bf16.msra.mxu1 %v5138_v61  ;;  %v2755_v60 = vadd.f32 %v6683_v59, %v2627_v50  ;;  %v2997_v61 = vadd.s32 1048577, %v6429_v39 }
 0x297   : > { %v2904_v52 = vpop.permute.xlu0 %2903  ;;  %4693 = vmatprep.subr.bf16.mxu1 %v5139_v3 }
 0x298   : > { %vm2922_vm7 = vcmp.eq.s32.totalorder %v2904_v52, %v6615_v1  ;;  %3270 = vperm.xlu0 %5130, %v3204_v27   ;;  %v2989_v52 = vmul.f32 %v6693_v7, %v6507_v54  ;;  %v2763_v0 = vsel %vm2707_vm3, %v2755_v60, %v2627_v50 }
 0x299   : > { %2912 = vperm.xlu1 %5129, %v2893_v37   ;;  %v6720_v26 = vsel %vm2922_vm7, %v2970_v5, %v6641_v10  ;;  %v6727_v6 = vpop.permute.xlu1 %2426 }
 0x29a   : > { %4694 = vmatpush3.bf16.msra.mxu1 %v5139_v3  ;;  %vm2439_vm15 = vcmp.eq.s32.totalorder %v6727_v6, %v6615_v1  ;;  %v2991_v3 = vmul.f32 %v6712_v40, %v6527_v31 }
 0x29b   : > { %v2694_v53 = vpop.permute.xlu0 %2693 }
 0x29c   : > { %vm2708_vm8 = vcmp.eq.s32.totalorder %v2694_v53, %v6615_v1  ;;  %3229 = vperm.xlu0 %5130, %v3212_v45  }
 0x29d   : > { %2965 = vperm.xlu1 %5129, %v2887_v19   ;;  %v6731_v10 = vsel %vm2708_vm8, %v2756_v23, %v6657_v34  ;;  %v2895_v34 = vadd.s32 1048576, %v6450_v33  ;;  %v5140_v23 = vld [vmem:[%s5331_s29 + $0x28] sm:$0xff]  }
 0x29e   : > { %4695 = vmatprep.subr.bf16.mxu1 %v5140_v23 }
 0x29f   : > { %v2745_v38 = vpop.permute.xlu0 %2744  ;;  %4696 = vmatpush3.bf16.msra.mxu1 %v5140_v23  ;;  %v2999_v23 = vadd.s32 1048577, %v6450_v33 }
 0x2a0   : > { %v2758_v32 = vadd.f32 %v2745_v38, %v6686_v46  ;;  %v2468_v22 = vpop.permute.xlu1 %2467  ;;  %3280 = vperm.xlu0 %5130, %v3206_v8   ;;  %4697 = vmatprep.subr.bf16.mxu1 %v5141_v16  ;;  %v5142_v38 = vld [vmem:[%s5331_s29 + $0x38] sm:$0xff]  }
 0x2a1   : > { %3255 = vperm.xlu1 %5129, %v3201_v42   ;;  %v3211_v42 = vadd.s32 1049601, %v6265_v25  ;;  %v2489_v25 = vsel %vm2433_vm2, %v6587_v41, 0.0 }
 0x2a3   : > { %v3035_v30 = vpop.permute.xlu0 %3034  ;;  %4698 = vmatpush3.bf16.msra.mxu1 %v5141_v16 }
 0x2a4   : > { %v3072_v55 = vadd.f32 %v3035_v30, %v6697_v9  ;;  %v6741_v5 = vpop.permute.xlu1 %2788  ;;  %3235 = vperm.xlu0 %5130, %v3214_v48   ;;  %4699 = vmatprep.subr.bf16.mxu1 %v5142_v38 }
 0x2a5   : > { %2918 = vperm.xlu1 %5129, %v2895_v34   ;;  %vm2809_vm8 = vcmp.eq.s32.totalorder %v6741_v5, %v6615_v1 }
 0x2a7   : > { %v2700_v12 = vpop.permute.xlu0 %2699  ;;  %4700 = vmatpush3.bf16.msra.mxu1 %v5142_v38 }
 0x2a8   : > { %vm2710_vm13 = vcmp.eq.s32.totalorder %v2700_v12, %v6615_v1  ;;  %v2834_v63 = vpop.permute.xlu1 %2833 }
 0x2a9   : > { %3220 = vperm.xlu1 %5129, %v3209_v4   ;;  %v6747_v18 = vsel %vm2710_vm13, %v2758_v32, %v6686_v46  ;;  %v2859_v59 = vadd.f32 %v2834_v63, %v2763_v0 }
 0x2ab   : > { %v3002_v27 = vpop.permute.xlu0 %3001 }
 0x2ac   : > { %vm3024_vm11 = vcmp.eq.s32.totalorder %v3002_v27, %v6615_v1  ;;  %v6758_v46 = vpop.permute.xlu1 %2477  ;;  %v3093_v27 = vmul.f32 %v6545_v14, %v7389_v21  ;;  %v3095_v14 = vmul.f32 %v6563_v43, %v7391_v57  ;;  %v3111_v43 = vadd.s32 1049600, %v6450_v33 }
 0x2ad   : > { %3265 = vperm.xlu1 %5129, %v3203_v20   ;;  %v6762_v58 = vsel %vm3024_vm11, %v3072_v55, %v6697_v9  ;;  %v2493_v9 = vsel %vm2437_vm0, %v2468_v22, 0.0  ;;  %v2617_v55 = vadd.f32 %v6601_v44, %v2489_v25  ;;  %v2495_v63 = vsel %vm2439_vm15, %v6758_v46, 0.0 }
 0x2ae   : > { %v6764_v13 = vpop.f32.mrb[0].mxu1  ;;  %v3101_v5 = vmul.f32 %v3093_v27, %v6461_v47  ;;  %v3207_v38 = vmul.f32 %v3095_v14, %v6527_v31 }
 0x2af   : > { %v3045_v15 = vpop.permute.xlu0 %3044  ;;  %v6768_v49 = vpop.f32.mrb[1].mxu1  ;;  %v1619_v53 = vmax.f32 %v6764_v13, 0.0  ;;  %v2625_v41 = vsel %vm2569_vm6, %v2617_v55, %v2489_v25 }
 0x2b0   : > { %v3074_v37 = vadd.f32 %v3045_v15, %v6720_v26  ;;  %v1618_v24 = vmax.f32 %v6768_v49, 0.0  ;;  %v2604_v45 = vpop.permute.xlu1 %2603  ;;  %v2753_v4 = vadd.f32 %v6660_v2, %v2625_v41 }
 0x2b1   : > { %v2621_v19 = vadd.f32 %v2604_v45, %v2493_v9  ;;  %3059 = vperm.xlu1 %5129, %v2989_v52   ;;  %v3109_v52 = vadd.s32 1049600, %v6429_v39 }
 0x2b2   : > { %v6779_v7 = vpop.f32.mrb[2].mxu1  ;;  %4641 = vmatprep.mubr.msk.f32.mxu0 %vm1635_vm1, %v1618_v24  ;;  %v2761_v20 = vsel %vm2705_vm14, %v2753_v4, %v2625_v41 }
 0x2b3   : > { %v2839_v29 = vpop.permute.xlu0 %2838  ;;  %v6782_v8 = vpop.f32.mrb[3].mxu1  ;;  %4642 = vmatmul.mubr.msk.f32.vlgmr.msra.gmra.mrb[8].mxu0 %vm1635_vm1, %v1619_v53  ;;  %v1621_v48 = vmax.f32 %v6779_v7, 0.0  ;;  %v2857_v6 = vadd.f32 %v6716_v62, %v2761_v20  ;;  %v3205_v53 = vmul.f32 %v3093_v27, %v6507_v54 }
 0x2b4   : > { %v2860_v28 = vadd.f32 %v2839_v29, %v6731_v10  ;;  %v1620_v32 = vmax.f32 %v6782_v8, 0.0  ;;  %v2795_v22 = vpop.permute.xlu1 %2794 }
 0x2b5   : > { %vm2811_vm10 = vcmp.eq.s32.totalorder %v2795_v22, %v6615_v1  ;;  %3226 = vperm.xlu1 %5129, %v3211_v42   ;;  %v2865_v46 = vsel %vm2809_vm8, %v2857_v6, %v2761_v20 }
 0x2b6   : > { %4644 = vmatprep.mubr.msk.f32.mxu0 %vm1635_vm1, %v1620_v32  ;;  %v6794_v30 = vsel %vm2811_vm10, %v2859_v59, %v2763_v0  ;;  %v3213_v0 = vadd.s32 1049601, %v6429_v39  ;;  %v3215_v32 = vadd.s32 1049601, %v6450_v33 }
 0x2b7   : > { %v3008_v34 = vpop.permute.xlu0 %3007  ;;  %4645 = vmatmul.mubr.msk.f32.gmra.mrb[10].mxu0 %vm1635_vm1, %v1621_v48 }
 0x2b8   : > { %vm3026_vm4 = vcmp.eq.s32.totalorder %v3008_v34, %v6615_v1  ;;  %v2561_v51 = vpop.permute.xlu1 %2560 }
 0x2b9   : > { %vm2573_vm12 = vcmp.eq.s32.totalorder %v2561_v51, %v6615_v1  ;;  %3016 = vperm.xlu1 %5129, %v2997_v61   ;;  %v6805_v12 = vsel %vm3026_vm4, %v3074_v37, %v6720_v26  ;;  %v3103_v37 = vmul.f32 %v3095_v14, %v6484_v36 }
 0x2ba   : > { %v2629_v56 = vsel %vm2573_vm12, %v2621_v19, %v2493_v9 }
 0x2bb   : > { %v2798_v44 = vpop.permute.xlu0 %2797 }
 0x2bc   : > { %vm2812_vm7 = vcmp.eq.s32.totalorder %v2798_v44, %v6615_v1  ;;  %v2614_v26 = vpop.permute.xlu1 %2613 }
 0x2bd   : > { %v2623_v17 = vadd.f32 %v2614_v26, %v2495_v63  ;;  %3069 = vperm.xlu1 %5129, %v2991_v3   ;;  %v6819_v2 = vsel %vm2812_vm7, %v2860_v28, %v6731_v10 }
 0x2bf   : > { %v2849_v40 = vpop.permute.xlu0 %2848 }
 0x2c0   : > { %v2862_v11 = vadd.f32 %v2849_v40, %v6747_v18  ;;  %v2936_v35 = vpop.permute.xlu1 %2935 }
 0x2c1   : > { %v2969_v50 = vadd.f32 %v2936_v35, %v2865_v46  ;;  %3022 = vperm.xlu1 %5129, %v2999_v23  }
 0x2c3   : > { %v6827_v15 = vpop.permute.xlu0 %3146 }
 0x2c4   : > { %v2567_v10 = vpop.permute.xlu1 %2566 }
 0x2c5   : > { %vm2575_vm13 = vcmp.eq.s32.totalorder %v2567_v10, %v6615_v1  ;;  %3171 = vperm.xlu1 %5129, %v3101_v5  }
 0x2c6   : > { %v2631_v62 = vsel %vm2575_vm13, %v2623_v17, %v2495_v63 }
 0x2c7   : > { %v2804_v21 = vpop.permute.xlu0 %2803 }
 0x2c8   : > { %vm2814_vm5 = vcmp.eq.s32.totalorder %v2804_v21, %v6615_v1  ;;  %v2901_v16 = vpop.permute.xlu1 %2900 }
 0x2c9   : > { %vm2921_vm9 = vcmp.eq.s32.totalorder %v2901_v16, %v6615_v1  ;;  %3128 = vperm.xlu1 %5129, %v3109_v52   ;;  %v6836_v47 = vsel %vm2814_vm5, %v2862_v11, %v6747_v18  ;;  %v1773_v52 = vld [vmem:[%s7269_s10] sm:$0xff]  ;;  %v1774_v16 = vld [vmem:[%s7269_s10 + $0x8] sm:$0xff] }
 0x2ca   : > { %v2977_v9 = vsel %vm2921_vm9, %v2969_v50, %v2865_v46 }
 0x2cb   : > { %v6845_v36 = vpop.permute.xlu0 %3113 }
 0x2cc   : > { %v2946_v24 = vpop.permute.xlu1 %2945  ;;  %vm3136_vm12 = vcmp.eq.s32.totalorder %v6845_v36, %v6615_v1 }
 0x2cd   : > { %v2971_v45 = vadd.f32 %v2946_v24, %v6794_v30  ;;  %3181 = vperm.xlu1 %5129, %v3103_v37   ;;  %v4893_v24 = vpack.c.bf16 %v1774_v16, %v1773_v52 }
 0x2cf   : > { %v6849_v54 = vpop.permute.xlu0 %3156  ;;  %4894 = vmatprep.subr.bf16.mxu0 %v4893_v24 }
 0x2d0   : > { %v2740_v57 = vpop.permute.xlu1 %2739  ;;  %4896 = vmatpush3.bf16.msra.mxu0 %v4893_v24 }
 0x2d1   : > { %v2757_v60 = vadd.f32 %v2740_v57, %v2629_v56  ;;  %3134 = vperm.xlu1 %5129, %v3111_v43  }
 0x2d3   : > { %v6852_v39 = vpop.permute.xlu0 %2950 }
 0x2d4   : > { %v2907_v19 = vpop.permute.xlu1 %2906 }
 0x2d5   : > { %vm2923_vm11 = vcmp.eq.s32.totalorder %v2907_v19, %v6615_v1  ;;  %3275 = vperm.xlu1 %5129, %v3205_v53   ;;  %v1912_v53 = vld [vmem:[%s7271_s12 + $0x8] sm:$0xff] }
 0x2d6   : > { %v2979_v18 = vsel %vm2923_vm11, %v2971_v45, %v6794_v30 }
 0x2d7   : > { %v6856_v31 = vpop.permute.xlu0 %3119 }
 0x2d8   : > { %v2697_v29 = vpop.permute.xlu1 %2696  ;;  %vm3138_vm8 = vcmp.eq.s32.totalorder %v6856_v31, %v6615_v1 }
 0x2d9   : > { %vm2709_vm0 = vcmp.eq.s32.totalorder %v2697_v29, %v6615_v1  ;;  %3232 = vperm.xlu1 %5129, %v3213_v0  }
 0x2da   : > { %v2765_v42 = vsel %vm2709_vm0, %v2757_v60, %v2629_v56  ;;  %v1911_v60 = vld [vmem:[%s7271_s12] sm:$0xff] }
 0x2db   : > { %v6860_v41 = vpop.permute.xlu0 %2909  ;;  %v6903_v19 = vpack.c.bf16 %v1912_v53, %v1911_v60 }
 0x2dc   : > { %v2750_v59 = vpop.permute.xlu1 %2749  ;;  %vm2924_vm11 = vcmp.eq.s32.totalorder %v6860_v41, %v6615_v1 }
 0x2dd   : > { %v2759_v28 = vadd.f32 %v2750_v59, %v2631_v62  ;;  %3285 = vperm.xlu1 %5129, %v3207_v38   ;;  %4898 = vmatprep.subr.bf16.mxu0 %v6903_v19 }
 0x2df   : > { %v6863_v44 = vpop.permute.xlu0 %2960 }
 0x2e0   : > { %v3040_v22 = vpop.permute.xlu1 %3039 }
 0x2e1   : > { %v3073_v48 = vadd.f32 %v3040_v22, %v2977_v9  ;;  %3238 = vperm.xlu1 %5129, %v3215_v32   ;;  %v3184_v22 = vadd.f32 %v6827_v15, %v6762_v58 }
 0x2e3   : > { %v3251_v20 = vpop.permute.xlu0 %3250 }
 0x2e4   : > { %v2703_v30 = vpop.permute.xlu1 %2702 }
 0x2e5   : > { %vm2711_vm3 = vcmp.eq.s32.totalorder %v2703_v30, %v6615_v1 }
 0x2e6   : > { %v2767_v25 = vsel %vm2711_vm3, %v2759_v28, %v2631_v62 }
 0x2e7   : > { %v6874_v11 = vpop.permute.xlu0 %2915 }
 0x2e8   : > { %v3005_v34 = vpop.permute.xlu1 %3004 }
 0x2e9   : > { %vm3025_vm10 = vcmp.eq.s32.totalorder %v3005_v34, %v6615_v1 }
 0x2ea   : > { %v6858_v61 = vsel %vm3025_vm10, %v3073_v48, %v2977_v9 }
 0x2eb   : > { %v3218_v9 = vpop.permute.xlu0 %3217 }
 0x2ec   : > { %v3050_v55 = vpop.permute.xlu1 %3049  ;;  %vm3240_vm15 = vcmp.eq.s32.totalorder %v3218_v9, %v6615_v1 }
 0x2ed   : > { %v3075_v51 = vadd.f32 %v3050_v55, %v2979_v18 }
 0x2ef   : > { %v3261_v43 = vpop.permute.xlu0 %3260 }
 0x2f0   : > { %v2844_v33 = vpop.permute.xlu1 %2843 }
 0x2f1   : > { %v2861_v56 = vadd.f32 %v2844_v33, %v2765_v42 }
 0x2f4   : > { %v3011_v4 = vpop.permute.xlu1 %3010 }
 0x2f5   : > { %vm3027_vm2 = vcmp.eq.s32.totalorder %v3011_v4, %v6615_v1 }
 0x2f6   : > { %v6865_v3 = vsel %vm3027_vm2, %v3075_v51, %v2979_v18  ;;  %v6905_v18 = vpop.permute.xlu0 %3054 }
 0x2f8   : > { %v2801_v63 = vpop.permute.xlu1 %2800 }
 0x2f9   : > { %vm2813_vm6 = vcmp.eq.s32.totalorder %v2801_v63, %v6615_v1 }
 0x2fa   : > { %v6868_v26 = vsel %vm2813_vm6, %v2861_v56, %v2765_v42  ;;  %v3224_v42 = vpop.permute.xlu0 %3223 }
 0x2fb   : > { %vm3242_vm5 = vcmp.eq.s32.totalorder %v3224_v42, %v6615_v1 }
 0x2fc   : > { %v2854_v17 = vpop.permute.xlu1 %2853 }
 0x2fd   : > { %v2863_v6 = vadd.f32 %v2854_v17, %v2767_v25 }
 0x2fe   : > { %v3014_v59 = vpop.permute.xlu0 %3013 }
 0x2ff   : > { %vm3028_vm3 = vcmp.eq.s32.totalorder %v3014_v59, %v6615_v1 }
 0x300   : > { %v3152_v27 = vpop.permute.xlu1 %3151  ;;  %v6870_v40 = vpop.f32.mrb[4].mxu1 }
 0x301   : > { %v6872_v23 = vpop.f32.mrb[5].mxu1  ;;  %v1623_v35 = vmax.f32 %v6870_v40, 0.0  ;;  %v3185_v48 = vadd.f32 %v3152_v27, %v6858_v61 }
 0x302   : > { %v1622_v46 = vmax.f32 %v6872_v23, 0.0  ;;  %v6918_v30 = vpop.permute.xlu0 %3064 }
 0x304   : > { %v2807_v50 = vpop.permute.xlu1 %2806  ;;  %v6878_v5 = vpop.f32.mrb[6].mxu1  ;;  %4647 = vmatprep.mubr.msk.f32.mxu0 %vm1635_vm1, %v1622_v46 }
 0x305   : > { %vm2815_vm4 = vcmp.eq.s32.totalorder %v2807_v50, %v6615_v1  ;;  %v6882_v10 = vpop.f32.mrb[7].mxu1  ;;  %4648 = vmatmul.mubr.msk.f32.gmra.mrb[12].mxu0 %vm1635_vm1, %v1623_v35  ;;  %v1625_v21 = vmax.f32 %v6878_v5, 0.0 }
 0x306   : > { %v1624_v62 = vmax.f32 %v6882_v10, 0.0  ;;  %v6886_v14 = vsel %vm2815_vm4, %v2863_v6, %v2767_v25  ;;  %v3192_v25 = vsel %vm3136_vm12, %v3184_v22, %v6762_v58  ;;  %v6924_v63 = vpop.permute.xlu0 %3019  ;;  %vm2926_vm4 = vcmp.eq.s32.totalorder %v6874_v11, %v6615_v1 }
 0x307   : > { %v3288_v55 = vadd.f32 %v3251_v20, %v3192_v25 }
 0x308   : > { %v3117_v37 = vpop.permute.xlu1 %3116  ;;  %4650 = vmatprep.mubr.msk.f32.mxu0 %vm1635_vm1, %v1624_v62 }
 0x309   : > { %4651 = vmatmul.mubr.msk.f32.gmra.mrb[14].mxu0 %vm1635_vm1, %v1625_v21  ;;  %vm3137_vm14 = vcmp.eq.s32.totalorder %v3117_v37, %v6615_v1  ;;  %v3296_v33 = vsel %vm3240_vm15, %v3288_v55, %v3192_v25  ;;  %vm3030_vm15 = vcmp.eq.s32.totalorder %v6924_v63, %v6615_v1 }
 0x30a   : > { %v3193_v34 = vsel %vm3137_vm14, %v3185_v48, %v6858_v61  ;;  %v3186_v61 = vadd.f32 %v6849_v54, %v6805_v12  ;;  %v3167_v17 = vpop.permute.xlu0 %3166 }
 0x30c   : > { %v3162_v45 = vpop.permute.xlu1 %3161  ;;  %v3194_v6 = vsel %vm3138_vm8, %v3186_v61, %v6805_v12 }
 0x30d   : > { %v3187_v20 = vadd.f32 %v3162_v45, %v6865_v3  ;;  %v3290_v46 = vadd.f32 %v3261_v43, %v3194_v6 }
 0x30e   : > { %v3126_v52 = vpop.permute.xlu0 %3125 }
 0x30f   : > { %v3298_v31 = vsel %vm3242_vm5, %v3290_v46, %v3194_v6  ;;  %vm3140_vm2 = vcmp.eq.s32.totalorder %v3126_v52, %v6615_v1 }
 0x310   : > { %v2956_v57 = vpop.permute.xlu1 %2955 }
 0x311   : > { %v2973_v43 = vadd.f32 %v2956_v57, %v6868_v26 }
 0x312   : > { %v3177_v9 = vpop.permute.xlu0 %3176 }
 0x314   : > { %v3123_v0 = vpop.permute.xlu1 %3122 }
 0x315   : > { %vm3139_vm13 = vcmp.eq.s32.totalorder %v3123_v0, %v6615_v1 }
 0x316   : > { %v3195_v27 = vsel %vm3139_vm13, %v3187_v20, %v6865_v3  ;;  %v3132_v24 = vpop.permute.xlu0 %3131  ;;  %v2972_v3 = vadd.f32 %v6852_v39, %v6819_v2 }
 0x317   : > { %vm3142_vm13 = vcmp.eq.s32.totalorder %v3132_v24, %v6615_v1 }
 0x318   : > { %v2913_v29 = vpop.permute.xlu1 %2912 }
 0x319   : > { %vm2925_vm0 = vcmp.eq.s32.totalorder %v2913_v29, %v6615_v1 }
 0x31a   : > { %v3271_v60 = vpop.permute.xlu0 %3270  ;;  %v2981_v22 = vsel %vm2925_vm0, %v2973_v43, %v6868_v26  ;;  %v2974_v26 = vadd.f32 %v6863_v44, %v6836_v47  ;;  %vm5174_vm0 = vmmov 1  }
 0x31c   : > { %v6908_v38 = vpop.permute.xlu1 %2965 }
 0x31e   : > { %v3230_v0 = vpop.permute.xlu0 %3229 }
 0x31f   : > { %vm3244_vm14 = vcmp.eq.s32.totalorder %v3230_v0, %v6615_v1 }
 0x320   : > { %v3256_v28 = vpop.permute.xlu1 %3255 }
 0x321   : > { %v3289_v51 = vadd.f32 %v3256_v28, %v3193_v34  ;;  %v2980_v28 = vsel %vm2924_vm11, %v2972_v3, %v6819_v2 }
 0x322   : > { %v3076_v48 = vadd.f32 %v6905_v18, %v2980_v28  ;;  %v3281_v59 = vpop.permute.xlu0 %3280 }
 0x324   : > { %v6913_v32 = vpop.permute.xlu1 %2918  ;;  %v3084_v25 = vsel %vm3028_vm3, %v3076_v48, %v2980_v28 }
 0x325   : > { %v3188_v2 = vadd.f32 %v3167_v17, %v3084_v25  ;;  %vm2927_vm12 = vcmp.eq.s32.totalorder %v6913_v32, %v6615_v1 }
 0x327   : > { %v3196_v18 = vsel %vm3140_vm2, %v3188_v2, %v3084_v25  ;;  %vm3742_vm2 = vcmask 236544  }
 0x328   : > { %v3221_v36 = vpop.permute.xlu1 %3220 }
 0x329   : > { %vm3241_vm7 = vcmp.eq.s32.totalorder %v3221_v36, %v6615_v1  ;;  %v3292_v36 = vadd.f32 %v3271_v60, %v3196_v18 }
 0x32a   : > { %v3297_v56 = vsel %vm3241_vm7, %v3289_v51, %v3193_v34  ;;  %v2975_v34 = vadd.f32 %v6908_v38, %v6886_v14  ;;  %v2982_v51 = vsel %vm2926_vm4, %v2974_v26, %v6836_v47  ;;  %v3236_v47 = vpop.permute.xlu0 %3235 }
 0x32b   : > { %v3304_v4 = vpack.c.bf16 %v3297_v56, %v3296_v33  ;;  %v3078_v32 = vadd.f32 %v6918_v30, %v2982_v51  ;;  %v3300_v56 = vsel %vm3244_vm14, %v3292_v36, %v3196_v18  ;;  %v3460_v18 = vld [vmem:[%s7273_s14 + $0x18] sm:$0xff] }
 0x32c   : > { %v3266_v15 = vpop.permute.xlu1 %3265  ;;  %v2983_v44 = vsel %vm2927_vm12, %v2975_v34, %v6886_v14 }
 0x32d   : > { %4701 = vmatprep.mubr.bf16.mxu1 %v3304_v4  ;;  %v3291_v35 = vadd.f32 %v3266_v15, %v3195_v27 }
 0x330   : > { %v3060_v58 = vpop.permute.xlu1 %3059 }
 0x331   : > { %v3077_v41 = vadd.f32 %v3060_v58, %v2981_v22  ;;  %v3086_v58 = vsel %vm3030_vm15, %v3078_v32, %v2982_v51  ;;  %v3462_v51 = vld [vmem:[%s7273_s14 + $0x28] sm:$0xff] }
 0x332   : > { %v3190_v20 = vadd.f32 %v3177_v9, %v3086_v58  ;;  %v3457_v9 = vld [vmem:[%s7273_s14] sm:$0xff]  ;;  %v3470_v32 = vld [vmem:[%s7273_s14 + $0x68] sm:$0xff] }
 0x334   : > { %v3227_v50 = vpop.permute.xlu1 %3226  ;;  %v3198_v17 = vsel %vm3142_vm13, %v3190_v20, %v3086_v58  ;;  %v3446_v58 = vld [vmem:[%s7272_s13 + $0x8] sm:$0xff]  ;;  %v3447_v20 = vld [vmem:[%s7272_s13 + $0x10] sm:$0xff] }
 0x335   : > { %vm3243_vm9 = vcmp.eq.s32.totalorder %v3227_v50, %v6615_v1  ;;  %v3294_v30 = vadd.f32 %v3281_v59, %v3198_v17  ;;  %v3459_v59 = vld [vmem:[%s7273_s14 + $0x10] sm:$0xff] }
 0x336   : > { %v3299_v62 = vsel %vm3243_vm9, %v3291_v35, %v3195_v27  ;;  %vm3246_vm9 = vcmp.eq.s32.totalorder %v3236_v47, %v6615_v1  ;;  %v4905_v34 = vpack.c.bf16 %v3460_v18, %v3459_v59 }
 0x337   : > { %v3305_v21 = vpack.c.bf16 %v3299_v62, %v3298_v31  ;;  %v3302_v35 = vsel %vm3246_vm9, %v3294_v30, %v3198_v17  ;;  %v4350_v62 = vld [vmem:[%s7268_s9] ss:$0 sm:$0xff] }
 0x338   : > { %v3017_v16 = vpop.permute.xlu1 %3016 }
 0x339   : > { %4702 = vmatmul.mubr.bf16.vlgmr.msra.gmra.mrb[8].mxu1 %v3305_v21  ;;  %vm3029_vm10 = vcmp.eq.s32.totalorder %v3017_v16, %v6615_v1 }
 0x33a   : > { %v3085_v29 = vsel %vm3029_vm10, %v3077_v41, %v2981_v22  ;;  %vm3578_vm10 = vcmask 261120  }
 0x33c   : > { %v3070_v54 = vpop.permute.xlu1 %3069 }
 0x33d   : > { %v3079_v4 = vadd.f32 %v3070_v54, %v2983_v44 }
 0x340   : > { %v3023_v37 = vpop.permute.xlu1 %3022 }
 0x341   : > { %vm3031_vm7 = vcmp.eq.s32.totalorder %v3023_v37, %v6615_v1 }
 0x342   : > { %v3087_v61 = vsel %vm3031_vm7, %v3079_v4, %v2983_v44  ;;  %v3468_v44 = vld [vmem:[%s7273_s14 + $0x58] sm:$0xff]  ;;  %v3471_v4 = vld [vmem:[%s7273_s14 + $0x70] sm:$0xff] }
 0x344   : > { %v3172_v12 = vpop.permute.xlu1 %3171 }
 0x345   : > { %v3189_v57 = vadd.f32 %v3172_v12, %v3085_v29 }
 0x348   : > { %v3129_v45 = vpop.permute.xlu1 %3128 }
 0x349   : > { %vm3141_vm6 = vcmp.eq.s32.totalorder %v3129_v45, %v6615_v1 }
 0x34a   : > { %v3197_v55 = vsel %vm3141_vm6, %v3189_v57, %v3085_v29 }
 0x34c   : > { %v3182_v53 = vpop.permute.xlu1 %3181 }
 0x34d   : > { %v3191_v14 = vadd.f32 %v3182_v53, %v3087_v61 }
 0x350   : > { %v3135_v42 = vpop.permute.xlu1 %3134 }
 0x351   : > { %vm3143_vm5 = vcmp.eq.s32.totalorder %v3135_v42, %v6615_v1 }
 0x352   : > { %v3199_v6 = vsel %vm3143_vm5, %v3191_v14, %v3087_v61  ;;  %v3448_v14 = vld [vmem:[%s7272_s13 + $0x18] sm:$0xff] }
 0x354   : > { %v3276_v39 = vpop.permute.xlu1 %3275 }
 0x355   : > { %v3293_v11 = vadd.f32 %v3276_v39, %v3197_v55 }
 0x358   : > { %v3233_v33 = vpop.permute.xlu1 %3232 }
 0x359   : > { %vm3245_vm8 = vcmp.eq.s32.totalorder %v3233_v33, %v6615_v1  ;;  %v3466_v33 = vld [vmem:[%s7273_s14 + $0x48] sm:$0xff] }
 0x35a   : > { %v3301_v38 = vsel %vm3245_vm8, %v3293_v11, %v3197_v55  ;;  %v3461_v55 = vld [vmem:[%s7273_s14 + $0x20] sm:$0xff]  ;;  %v3464_v11 = vld [vmem:[%s7273_s14 + $0x38] sm:$0xff] }
 0x35b   : > { %v3306_v15 = vpack.c.bf16 %v3301_v38, %v3300_v56  ;;  %v4909_v36 = vpack.c.bf16 %v3462_v51, %v3461_v55 }
 0x35c   : > { %v3286_v63 = vpop.permute.xlu1 %3285 }
 0x35d   : > { %4705 = vmatprep.mubr.bf16.mxu1 %v3306_v15  ;;  %v3295_v27 = vadd.f32 %v3286_v63, %v3199_v6  ;;  %v3445_v15 = vld [vmem:[%s7272_s13] sm:$0xff] }
 0x35e   : > { %v4933_v47 = vpack.c.bf16 %v3446_v58, %v3445_v15 }
 0x360   : > { %v3239_v46 = vpop.permute.xlu1 %3238 }
 0x361   : > { %vm3247_vm11 = vcmp.eq.s32.totalorder %v3239_v46, %v6615_v1  ;;  %v3458_v1 = vld [vmem:[%s7273_s14 + $0x8] sm:$0xff]  ;;  %v4937_v46 = vpack.c.bf16 %v3448_v14, %v3447_v20  ;;  %v3882_v20 = vld [vmem:[%s7278_s19 + $0x10] sm:$0xff]  ;;  %v3883_v14 = vld [vmem:[%s7278_s19 + $0x18] sm:$0xff] }
 0x362   : > { %v3303_v50 = vsel %vm3247_vm11, %v3295_v27, %v3199_v6  ;;  %v4901_v53 = vpack.c.bf16 %v3458_v1, %v3457_v9 }
 0x363   : > { %v3307_v31 = vpack.c.bf16 %v3303_v50, %v3302_v35 }
 0x365   : > { %4706 = vmatmul.mubr.bf16.gmra.mrb[12].mxu1 %v3307_v31 }
 0x386   : > { %v4643_v21 = vpop.f32.mrb[8].mxu0 }
 0x387   : > { %v1732_v52 = vadd.f32 %v4643_v21, %v4350_v62  ;;  %v1726_v16 = vpop.f32.mrb[9].mxu0 }
 0x388   : > { %v1727_v54 = vadd.f32 %v4350_v62, %v1726_v16 }
 0x389   : > { %v1766_v12 = vmax.f32 %v1732_v52, 0.0 }
 0x38a   : > { %v1765_v37 = vmax.f32 %v1727_v54, 0.0  ;;  %v4646_v24 = vpop.f32.mrb[10].mxu0 }
 0x38b   : > { %v1742_v45 = vadd.f32 %v4646_v24, %v4350_v62  ;;  %v1736_v60 = vpop.f32.mrb[11].mxu0  ;;  %v3877_v24 = vld [vmem:[%s7277_s18 + $0x8] sm:$0xff] }
 0x38c   : > { %v1737_v3 = vadd.f32 %v4350_v62, %v1736_v60  ;;  %4657 = vmatprep.mubr.msk.f32.mxu0 %vm1635_vm1, %v1765_v37  ;;  %v3876_v37 = vld [vmem:[%s7277_s18] sm:$0xff]  ;;  %v3732_v60 = vld [vmem:[%s7275_s16 + $0x8] sm:$0xff] }
 0x38d   : > { %4658 = vmatmul.mubr.msk.f32.vlgmr.msra.gmra.mrb[16].mxu0 %vm1635_vm1, %v1766_v12  ;;  %v1768_v0 = vmax.f32 %v1742_v45, 0.0  ;;  %v7087_v12 = vpack.c.bf16 %v3877_v24, %v3876_v37  ;;  %v3731_v45 = vld [vmem:[%s7275_s16] sm:$0xff] }
 0x38e   : > { %v1767_v43 = vmax.f32 %v1737_v3, 0.0  ;;  %4900 = vmatpush3.bf16.msra.mxu0 %v6903_v19  ;;  %v4941_v3 = vpack.c.bf16 %v3732_v60, %v3731_v45 }
 0x38f   : > { %4902 = vmatprep.subr.bf16.mxu0 %v4901_v53 }
 0x390   : > { %4660 = vmatprep.mubr.msk.f32.mxu0 %vm1635_vm1, %v1767_v43  ;;  %v3734_v43 = vld [vmem:[%s7275_s16 + $0x18] sm:$0x1f]  ;;  %4942 = vmatprep.subr.bf16.mxu1 %v4941_v3 }
 0x391   : > { %4661 = vmatmul.mubr.msk.f32.gmra.mrb[18].mxu0 %vm1635_vm1, %v1768_v0  ;;  %4944 = vmatpush3.bf16.msra.mxu1 %v4941_v3 }
 0x3d8   : > { %v4649_v42 = vpop.f32.mrb[12].mxu0 }
 0x3d9   : > { %v1752_v28 = vadd.f32 %v4649_v42, %v4350_v62  ;;  %v1746_v22 = vpop.f32.mrb[13].mxu0  ;;  %v4359_v42 = vld [vmem:[%s7270_s11] ss:$0 sm:$0xff] }
 0x3da   : > { %v1747_v48 = vadd.f32 %v4350_v62, %v1746_v22 }
 0x3db   : > { %v1770_v29 = vmax.f32 %v1752_v28, 0.0 }
 0x3dc   : > { %v1769_v41 = vmax.f32 %v1747_v48, 0.0  ;;  %v4652_v25 = vpop.f32.mrb[14].mxu0 }
 0x3dd   : > { %v1762_v39 = vadd.f32 %v4652_v25, %v4350_v62  ;;  %v1756_v2 = vpop.f32.mrb[15].mxu0  ;;  %v3878_v25 = vld [vmem:[%s7277_s18 + $0x10] sm:$0xff] }
 0x3de   : > { %v1757_v57 = vadd.f32 %v4350_v62, %v1756_v2  ;;  %4663 = vmatprep.mubr.msk.f32.mxu0 %vm1635_vm1, %v1769_v41 }
 0x3df   : > { %4664 = vmatmul.mubr.msk.f32.gmra.mrb[20].mxu0 %vm1635_vm1, %v1770_v29  ;;  %v1772_v26 = vmax.f32 %v1762_v39, 0.0  ;;  %v3879_v29 = vld [vmem:[%s7277_s18 + $0x18] sm:$0xff] }
 0x3e0   : > { %v1771_v19 = vmax.f32 %v1757_v57, 0.0  ;;  %v7111_v59 = vpack.c.bf16 %v3879_v29, %v3878_v25 }
 0x3e2   : > { %4666 = vmatprep.mubr.msk.f32.mxu0 %vm1635_vm1, %v1771_v19 }
 0x3e3   : > { %4667 = vmatmul.mubr.msk.f32.gmra.mrb[22].mxu0 %vm1635_vm1, %v1772_v26 }
 0x3e4   : > { %4673 = vmatprep.mubr.msk.f32.mxu0 %vm1635_vm1, %v6768_v49  ;;  %v3463_v49 = vld [vmem:[%s7273_s14 + $0x30] sm:$0xff] }
 0x3e7   : > { %4674 = vmatmul.mubr.msk.f32.vlgmr.msra.gmra.mrb[16].mxu0 %vm1635_vm1, %v6764_v13  ;;  %v4913_v13 = vpack.c.bf16 %v3464_v11, %v3463_v49 }
 0x3e8   : > { %4676 = vmatprep.mubr.msk.f32.mxu0 %vm1635_vm1, %v6782_v8  ;;  %4904 = vmatpush3.bf16.msra.mxu0 %v4901_v53  ;;  %v3465_v8 = vld [vmem:[%s7273_s14 + $0x40] sm:$0xff]  ;;  %v3733_v53 = vld [vmem:[%s7275_s16 + $0x10] sm:$0xff] }
 0x3e9   : > { %4906 = vmatprep.subr.bf16.mxu0 %v4905_v34  ;;  %v4945_v0 = vpack.c.bf16 %v3734_v43, %v3733_v53 }
 0x3eb   : > { %4677 = vmatmul.mubr.msk.f32.gmra.mrb[18].mxu0 %vm1635_vm1, %v6779_v7  ;;  %v4917_v7 = vpack.c.bf16 %v3466_v33, %v3465_v8 }
 0x3ec   : > { %4679 = vmatprep.mubr.msk.f32.mxu0 %vm1635_vm1, %v6872_v23  ;;  %4908 = vmatpush3.bf16.msra.mxu0 %v4905_v34  ;;  %v3467_v23 = vld [vmem:[%s7273_s14 + $0x50] sm:$0xff] }
 0x3ed   : > { %4910 = vmatprep.subr.bf16.mxu0 %v4909_v36 }
 0x3ef   : > { %4680 = vmatmul.mubr.msk.f32.gmra.mrb[20].mxu0 %vm1635_vm1, %v6870_v40  ;;  %v4921_v40 = vpack.c.bf16 %v3468_v44, %v3467_v23 }
 0x3f0   : > { %4682 = vmatprep.mubr.msk.f32.mxu0 %vm1635_vm1, %v6882_v10  ;;  %4912 = vmatpush3.bf16.msra.mxu0 %v4909_v36  ;;  %v3469_v10 = vld [vmem:[%s7273_s14 + $0x60] sm:$0xff] }
 0x3f1   : > { %4914 = vmatprep.subr.bf16.mxu0 %v4913_v13  ;;  %v4925_v56 = vpack.c.bf16 %v3470_v32, %v3469_v10  ;;  %v3880_v32 = vld [vmem:[%s7278_s19] sm:$0xff] }
 0x3f3   : > { %4683 = vmatmul.mubr.msk.f32.gmra.mrb[22].mxu0 %vm1635_vm1, %v6878_v5  ;;  %v3472_v5 = vld [vmem:[%s7273_s14 + $0x78] sm:$0xff]  ;;  %vm3767_vm1 = vcmask 1044480  }
 0x3f4   : > { %4916 = vmatpush3.bf16.msra.mxu0 %v4913_v13  ;;  %v4929_v38 = vpack.c.bf16 %v3472_v5, %v3471_v4  ;;  %vm4946_vm3 = vmpackc.low %vm3767_vm1, %vm5174_vm0  ;;  %v4393_v5 = vld [vmem:[%s7274_s15] ss:$0 sm:$0xff] }
 0x3f5   : > { %4918 = vmatprep.subr.bf16.mxu0 %v4917_v7  ;;  %4947 = vmatprep.subr.msk.bf16.mxu1 %vm4946_vm3, %v4945_v0 }
 0x3f6   : > { %4950 = vmatpush3.bf16.msk.msra.mxu1 %vm4946_vm3, %v4945_v0  ;;  %v3886_v0 = vld [vmem:[%s7278_s19 + $0x30] sm:$0xff] }
 0x3f8   : > { %4920 = vmatpush3.bf16.msra.mxu0 %v4917_v7 }
 0x3f9   : > { %4922 = vmatprep.subr.bf16.mxu0 %v4921_v40 }
 0x3fc   : > { %4924 = vmatpush3.bf16.msra.mxu0 %v4921_v40 }
 0x3fd   : > { %4926 = vmatprep.subr.bf16.mxu0 %v4925_v56 }
 0x400   : > { %4928 = vmatpush3.bf16.msra.mxu0 %v4925_v56  ;;  %v3881_v56 = vld [vmem:[%s7278_s19 + $0x8] sm:$0xff] }
 0x401   : > { %4930 = vmatprep.subr.bf16.mxu0 %v4929_v38  ;;  %v4951_v4 = vpack.c.bf16 %v3881_v56, %v3880_v32  ;;  %v3894_v32 = vld [vmem:[%s7278_s19 + $0x70] sm:$0xff] }
 0x403   : > { %4952 = vmatprep.subr.bf16.mxu1 %v4951_v4 }
 0x404   : > { %4932 = vmatpush3.bf16.msra.mxu0 %v4929_v38 }
 0x405   : > { %4934 = vmatprep.subr.bf16.mxu0 %v4933_v47 }
 0x40c   : > { %v7051_v61 = vpop.f32.mrb[8].mxu1 }
 0x40d   : > { %v7053_v63 = vpop.f32.mrb[9].mxu1  ;;  %v3451_v35 = vmax.f32 %v7051_v61, 0.0 }
 0x40e   : > { %v3449_v17 = vmax.f32 %v7053_v63, 0.0  ;;  %v7062_v6 = vpop.f32.mrb[10].mxu1 }
 0x40f   : > { %v7064_v30 = vpop.f32.mrb[11].mxu1  ;;  %v3452_v50 = vmax.f32 %v7062_v6, 0.0 }
 0x410   : > { %v3450_v27 = vmax.f32 %v7064_v30, 0.0  ;;  %4741 = vmatprep.mubr.f32.mxu0 %v3449_v17 }
 0x412   : > { %4742 = vmatmul.mubr.f32.vlgmr.msra.gmra.mrb[24].mxu0 %v3450_v27 }
 0x413   : > { %4744 = vmatprep.mubr.f32.mxu0 %v3451_v35  ;;  %4936 = vmatpush3.bf16.msra.mxu0 %v4933_v47 }
 0x414   : > { %4938 = vmatprep.subr.bf16.mxu0 %v4937_v46 }
 0x416   : > { %4745 = vmatmul.mubr.f32.gmra.mrb[26].mxu0 %v3452_v50 }
 0x417   : > { %4940 = vmatpush3.bf16.msra.mxu0 %v4937_v46 }
 0x418   : > { %4984 = vmatprep.subr.bf16.mxu0 %v7087_v12 }
 0x438   : > { %v7069_v31 = vpop.f32.mrb[12].mxu1 }
 0x439   : > { %v7071_v62 = vpop.f32.mrb[13].mxu1  ;;  %v3455_v9 = vmax.f32 %v7069_v31, 0.0 }
 0x43a   : > { %v3453_v21 = vmax.f32 %v7071_v62, 0.0  ;;  %v7074_v52 = vpop.f32.mrb[14].mxu1 }
 0x43b   : > { %v7076_v16 = vpop.f32.mrb[15].mxu1  ;;  %v3456_v1 = vmax.f32 %v7074_v52, 0.0 }
 0x43c   : > { %v3454_v54 = vmax.f32 %v7076_v16, 0.0  ;;  %4747 = vmatprep.mubr.f32.mxu0 %v3453_v21  ;;  %v4955_v21 = vpack.c.bf16 %v3883_v14, %v3882_v20 }
 0x43e   : > { %4748 = vmatmul.mubr.f32.gmra.mrb[28].mxu0 %v3454_v54 }
 0x43f   : > { %4750 = vmatprep.mubr.f32.mxu0 %v3455_v9  ;;  %v3884_v9 = vld [vmem:[%s7278_s19 + $0x20] sm:$0xff] }
 0x442   : > { %4751 = vmatmul.mubr.f32.gmra.mrb[30].mxu0 %v3456_v1  ;;  %v3885_v1 = vld [vmem:[%s7278_s19 + $0x28] sm:$0xff] }
 0x443   : > { %v4959_v3 = vpack.c.bf16 %v3885_v1, %v3884_v9 }
 0x4ba   : > { %v4675_v28 = vpop.f32.mrb[16].mxu0 }
 0x4bb   : > { %v4995_v22 = vadd.f32 %v4675_v28, %v4359_v42  ;;  %v2003_v48 = vpop.f32.mrb[17].mxu0 }
 0x4bc   : > { %v4996_v41 = vadd.f32 %v4359_v42, %v2003_v48 }
 0x4bd   : > { %v3438_v57 = vmax.f32 %v4995_v22, 0.0 }
 0x4be   : > { %v3437_v39 = vmax.f32 %v4996_v41, 0.0  ;;  %v4678_v2 = vpop.f32.mrb[18].mxu0 }
 0x4bf   : > { %v4997_v19 = vadd.f32 %v4678_v2, %v4359_v42  ;;  %v2013_v26 = vpop.f32.mrb[19].mxu0  ;;  %v3888_v2 = vld [vmem:[%s7278_s19 + $0x40] sm:$0xff] }
 0x4c0   : > { %v4998_v18 = vadd.f32 %v4359_v42, %v2013_v26  ;;  %4761 = vmatprep.mubr.msk.f32.mxu0 %vm3578_vm10, %v3437_v39 }
 0x4c1   : > { %4762 = vmatmul.mubr.msk.f32.vlgmr.msra.gmra.mrb[24].mxu0 %vm3578_vm10, %v3438_v57  ;;  %v3440_v51 = vmax.f32 %v4997_v19, 0.0  ;;  %v3889_v57 = vld [vmem:[%s7278_s19 + $0x48] sm:$0xff] }
 0x4c2   : > { %v3439_v34 = vmax.f32 %v4998_v18, 0.0  ;;  %v4681_v55 = vpop.f32.mrb[20].mxu0  ;;  %4986 = vmatpush3.bf16.msra.mxu0 %v7087_v12 }
 0x4c3   : > { %v7116_v36 = vadd.f32 %v4681_v55, %v4359_v42  ;;  %v2023_v49 = vpop.f32.mrb[21].mxu0  ;;  %4988 = vmatprep.subr.bf16.mxu0 %v7111_v59  ;;  %v4967_v55 = vpack.c.bf16 %v3889_v57, %v3888_v2 }
 0x4c4   : > { %v7119_v11 = vadd.f32 %v4359_v42, %v2023_v49  ;;  %4764 = vmatprep.mubr.msk.f32.mxu0 %vm3578_vm10, %v3439_v34  ;;  %v3891_v49 = vld [vmem:[%s7278_s19 + $0x58] sm:$0xff] }
 0x4c5   : > { %4765 = vmatmul.mubr.msk.f32.gmra.mrb[26].mxu0 %vm3578_vm10, %v3440_v51  ;;  %v3442_v33 = vmax.f32 %v7116_v36, 0.0  ;;  %v3890_v51 = vld [vmem:[%s7278_s19 + $0x50] sm:$0xff] }
 0x4c6   : > { %v3441_v13 = vmax.f32 %v7119_v11, 0.0  ;;  %v4684_v8 = vpop.f32.mrb[22].mxu0  ;;  %4990 = vmatpush3.bf16.msra.mxu0 %v7111_v59 }
 0x4c7   : > { %v7126_v7 = vadd.f32 %v4684_v8, %v4359_v42  ;;  %v2033_v23 = vpop.f32.mrb[23].mxu0 }
 0x4c8   : > { %v7128_v44 = vadd.f32 %v4359_v42, %v2033_v23  ;;  %4767 = vmatprep.mubr.msk.f32.mxu0 %vm3578_vm10, %v3441_v13  ;;  %v3887_v42 = vld [vmem:[%s7278_s19 + $0x38] sm:$0xff]  ;;  %v3892_v23 = vld [vmem:[%s7278_s19 + $0x60] sm:$0xff] }
 0x4c9   : > { %4768 = vmatmul.mubr.msk.f32.gmra.mrb[28].mxu0 %vm3578_vm10, %v3442_v33  ;;  %v3444_v10 = vmax.f32 %v7126_v7, 0.0  ;;  %v4963_v29 = vpack.c.bf16 %v3887_v42, %v3886_v0  ;;  %v4971_v33 = vpack.c.bf16 %v3891_v49, %v3890_v51 }
 0x4ca   : > { %v3443_v40 = vmax.f32 %v7128_v44, 0.0 }
 0x4cc   : > { %4770 = vmatprep.mubr.msk.f32.mxu0 %vm3578_vm10, %v3443_v40  ;;  %v3893_v40 = vld [vmem:[%s7278_s19 + $0x68] sm:$0xff] }
 0x4cd   : > { %4771 = vmatmul.mubr.msk.f32.gmra.mrb[30].mxu0 %vm3578_vm10, %v3444_v10  ;;  %v4975_v10 = vpack.c.bf16 %v3893_v40, %v3892_v23 }
 0x4ce   : > { %4845 = vmatprep.mubr.msk.f32.mxu0 %vm3578_vm10, %v4996_v41 }
 0x4d1   : > { %4846 = vmatmul.mubr.msk.f32.vlgmr.msra.gmra.mrb[32].mxu0 %vm3578_vm10, %v4995_v22 }
 0x4d2   : > { %4848 = vmatprep.mubr.msk.f32.mxu0 %vm3578_vm10, %v4998_v18 }
 0x4d5   : > { %4849 = vmatmul.mubr.msk.f32.gmra.mrb[34].mxu0 %vm3578_vm10, %v4997_v19 }
 0x594   : > { %v4763_v38 = vpop.f32.mrb[24].mxu0 }
 0x595   : > { %v3716_v15 = vadd.f32 %v4763_v38, %v4393_v5  ;;  %v3669_v58 = vpop.f32.mrb[25].mxu0 }
 0x596   : > { %v3715_v47 = vadd.f32 %v4393_v5, %v3669_v58  ;;  %v4132_v58 = vld [vmem:[%s7226_s28 + $0x10] sm:$0xff] }
 0x597   : > { %v3724_v46 = vmax.f32 %v3716_v15, 0.0 }
 0x598   : > { %v3723_v17 = vmax.f32 %v3715_v47, 0.0  ;;  %v4766_v27 = vpop.f32.mrb[26].mxu0 }
 0x599   : > { %v3718_v35 = vadd.f32 %v4766_v27, %v4393_v5  ;;  %v3679_v50 = vpop.f32.mrb[27].mxu0  ;;  %v4135_v27 = vld [vmem:[%s7226_s28 + $0x28] sm:$0xff] }
 0x59a   : > { %v3717_v54 = vadd.f32 %v4393_v5, %v3679_v50  ;;  %4781 = vmatprep.mubr.msk.f32.mxu1 %vm3742_vm2, %v3723_v17  ;;  %v4134_v50 = vld [vmem:[%s7226_s28 + $0x20] sm:$0xff] }
 0x59b   : > { %4782 = vmatmul.mubr.msk.f32.vlgmr.msra.gmra.mrb[16].mxu1 %vm3742_vm2, %v3724_v46  ;;  %v3726_v45 = vmax.f32 %v3718_v35, 0.0 }
 0x59c   : > { %v3725_v37 = vmax.f32 %v3717_v54, 0.0  ;;  %4954 = vmatpush3.bf16.msra.mxu1 %v4951_v4  ;;  %v4769_v24 = vpop.f32.mrb[28].mxu0 }
 0x59d   : > { %v3720_v60 = vadd.f32 %v4769_v24, %v4393_v5  ;;  %v3689_v53 = vpop.f32.mrb[29].mxu0  ;;  %4956 = vmatprep.subr.bf16.mxu1 %v4955_v21 }
 0x59e   : > { %v3719_v43 = vadd.f32 %v4393_v5, %v3689_v53  ;;  %4784 = vmatprep.mubr.msk.f32.mxu1 %vm3742_vm2, %v3725_v37  ;;  %v4137_v37 = vld [vmem:[%s7226_s28 + $0x38] sm:$0xff] }
 0x59f   : > { %4785 = vmatmul.mubr.msk.f32.gmra.mrb[18].mxu1 %vm3742_vm2, %v3726_v45  ;;  %v3728_v48 = vmax.f32 %v3720_v60, 0.0  ;;  %v4136_v60 = vld [vmem:[%s7226_s28 + $0x30] sm:$0xff] }
 0x5a0   : > { %v3727_v28 = vmax.f32 %v3719_v43, 0.0  ;;  %4958 = vmatpush3.bf16.msra.mxu1 %v4955_v21  ;;  %v4772_v22 = vpop.f32.mrb[30].mxu0 }
 0x5a1   : > { %v3722_v41 = vadd.f32 %v4772_v22, %v4393_v5  ;;  %v3699_v25 = vpop.f32.mrb[31].mxu0  ;;  %4960 = vmatprep.subr.bf16.mxu1 %v4959_v3 }
 0x5a2   : > { %v3721_v39 = vadd.f32 %v4393_v5, %v3699_v25  ;;  %4787 = vmatprep.mubr.msk.f32.mxu1 %vm3742_vm2, %v3727_v28  ;;  %v4133_v5 = vld [vmem:[%s7226_s28 + $0x18] sm:$0xff] }
 0x5a3   : > { %4788 = vmatmul.mubr.msk.f32.gmra.mrb[20].mxu1 %vm3742_vm2, %v3728_v48  ;;  %v3730_v18 = vmax.f32 %v3722_v41, 0.0 }
 0x5a4   : > { %v3729_v19 = vmax.f32 %v3721_v39, 0.0  ;;  %4962 = vmatpush3.bf16.msra.mxu1 %v4959_v3  ;;  %v4847_v26 = vpop.f32.mrb[32].mxu0 }
 0x5a5   : > { %v4091_v34 = vpop.f32.mrb[33].mxu0  ;;  %4964 = vmatprep.subr.bf16.mxu1 %v4963_v29 }
 0x5a6   : > { %4790 = vmatprep.mubr.msk.f32.mxu1 %vm3742_vm2, %v3729_v19 }
 0x5a7   : > { %4791 = vmatmul.mubr.msk.f32.gmra.mrb[22].mxu1 %vm3742_vm2, %v3730_v18 }
 0x5a8   : > { %4966 = vmatpush3.bf16.msra.mxu1 %v4963_v29  ;;  %4825 = vmatprep.mubr.f32.mxu1 %v7053_v63  ;;  %v4850_v13 = vpop.f32.mrb[34].mxu0  ;;  %v3895_v63 = vld [vmem:[%s7278_s19 + $0x78] sm:$0xff] }
 0x5a9   : > { %v4101_v8 = vpop.f32.mrb[35].mxu0  ;;  %4968 = vmatprep.subr.bf16.mxu1 %v4967_v55  ;;  %v4979_v56 = vpack.c.bf16 %v3895_v63, %v3894_v32 }
 0x5ac   : > { %4970 = vmatpush3.bf16.msra.mxu1 %v4967_v55 }
 0x5ad   : > { %4972 = vmatprep.subr.bf16.mxu1 %v4971_v33 }
 0x5b0   : > { %4974 = vmatpush3.bf16.msra.mxu1 %v4971_v33 }
 0x5b1   : > { %4976 = vmatprep.subr.bf16.mxu1 %v4975_v10 }
 0x5b4   : > { %4978 = vmatpush3.bf16.msra.mxu1 %v4975_v10 }
 0x5b5   : > { %4980 = vmatprep.subr.bf16.mxu1 %v4979_v56 }
 0x5b8   : > { %4982 = vmatpush3.bf16.msra.mxu1 %v4979_v56 }
 0x5b9   : > { %4991 = vmatprep.subr.bf16.mxu1 %v7087_v12 }
 0x5bb   : > { %4826 = vmatmul.mubr.f32.vlgmr.msra.gmra.mrb[16].mxu1 %v7064_v30 }
 0x5bc   : > { %4828 = vmatprep.mubr.f32.mxu1 %v7051_v61  ;;  %4993 = vmatpush3.bf16.msra.mxu1 %v7087_v12  ;;  %v4394_v61 = vld [vmem:[%s7276_s17] ss:$0 sm:$0xff] }
 0x5bd   : > { %4992 = vmatprep.subr.bf16.mxu1 %v7111_v59  ;;  %v4130_v12 = vld [vmem:[%s7226_s28] sm:$0xff] }
 0x5bf   : > { %4829 = vmatmul.mubr.f32.gmra.mrb[18].mxu1 %v7062_v6 }
 0x5c0   : > { %4831 = vmatprep.mubr.f32.mxu1 %v7071_v62  ;;  %4994 = vmatpush3.bf16.msra.mxu1 %v7111_v59  ;;  %v4131_v62 = vld [vmem:[%s7226_s28 + $0x8] sm:$0xff] }
 0x5c3   : > { %4832 = vmatmul.mubr.f32.gmra.mrb[20].mxu1 %v7076_v16 }
 0x5c4   : > { %4834 = vmatprep.mubr.f32.mxu1 %v7069_v31 }
 0x5c7   : > { %4835 = vmatmul.mubr.f32.gmra.mrb[22].mxu1 %v7074_v52 }
 0x5c8   : > { %4851 = vmatprep.mubr.msk.f32.mxu1 %vm3578_vm10, %v7119_v11 }
 0x5cb   : > { %4852 = vmatmul.mubr.msk.f32.vlgmr.msra.gmra.mrb[20].mxu1 %vm3578_vm10, %v7116_v36 }
 0x5cc   : > { %4854 = vmatprep.mubr.msk.f32.mxu1 %vm3578_vm10, %v7128_v44 }
 0x5cf   : > { %4855 = vmatmul.mubr.msk.f32.gmra.mrb[22].mxu1 %vm3578_vm10, %v7126_v7 }
 0x68e   : > { %v4827_v6 = vpop.f32.mrb[16].mxu1 }
 0x68f   : > { %v5003_v30 = vadd.f32 %v4827_v6, %v4394_v61  ;;  %v3962_v31 = vpop.f32.mrb[17].mxu1 }
 0x690   : > { %v5006_v52 = vadd.f32 %v4394_v61, %v3962_v31 }
 0x691   : > { %v5004_v16 = vadd.f32 %v5003_v30, %v4847_v26 }
 0x692   : > { %v5007_v59 = vadd.f32 %v5006_v52, %v4091_v34  ;;  %v4830_v36 = vpop.f32.mrb[18].mxu1 }
 0x693   : > { %v5005_v11 = vadd.f32 %v5004_v16, %v4131_v62  ;;  %v5009_v7 = vadd.f32 %v4830_v36, %v4394_v61  ;;  %v3972_v44 = vpop.f32.mrb[19].mxu1 }
 0x694   : > { %v5008_v4 = vadd.f32 %v5007_v59, %v4130_v12  ;;  %v5012_v38 = vadd.f32 %v4394_v61, %v3972_v44 }
 0x695   : > { %4155 = vst [vmem:[%s7234_s1 + $0x8] sm:$0xff] %v5005_v11  ;;  %v5010_v15 = vadd.f32 %v5009_v7, %v4850_v13 }
 0x696   : > { %4154 = vst [vmem:[%s7234_s1] sm:$0xff] %v5008_v4  ;;  %v5013_v47 = vadd.f32 %v5012_v38, %v4101_v8 }
 0x697   : > { %v5011_v20 = vadd.f32 %v5010_v15, %v4133_v5 }
 0x698   : > { %v5014_v14 = vadd.f32 %v5013_v47, %v4132_v58 }
 0x699   : > { %4157 = vst [vmem:[%s7234_s1 + $0x18] sm:$0xff] %v5011_v20 }
 0x69a   : > { %4156 = vst [vmem:[%s7234_s1 + $0x10] sm:$0xff] %v5014_v14 }
 0x69e   : > { %v4853_v17 = vpop.f32.mrb[20].mxu1 }
 0x69f   : > { %v5015_v46 = vadd.f32 %v4853_v17, %v4394_v61  ;;  %v4111_v35 = vpop.f32.mrb[21].mxu1 }
 0x6a0   : > { %v5017_v21 = vadd.f32 %v4394_v61, %v4111_v35 }
 0x6a1   : > { %v5016_v54 = vadd.f32 %v5015_v46, %v4135_v27 }
 0x6a2   : > { %v5018_v9 = vadd.f32 %v5017_v21, %v4134_v50  ;;  %v4856_v1 = vpop.f32.mrb[22].mxu1 }
 0x6a3   : > { %4159 = vst [vmem:[%s7234_s1 + $0x28] sm:$0xff] %v5016_v54  ;;  %v5019_v24 = vadd.f32 %v4856_v1, %v4394_v61  ;;  %v4121_v45 = vpop.f32.mrb[23].mxu1 }
 0x6a4   : > { %4158 = vst [vmem:[%s7234_s1 + $0x20] sm:$0xff] %v5018_v9  ;;  %v5021_v53 = vadd.f32 %v4394_v61, %v4121_v45 }
 0x6a5   : > { %v5020_v3 = vadd.f32 %v5019_v24, %v4137_v37 }
 0x6a6   : > { %v5022_v43 = vadd.f32 %v5021_v53, %v4136_v60 }
 0x6a7   : > { %4161 = vst [vmem:[%s7234_s1 + $0x38] sm:$0xff] %v5020_v3 }
 0x6a8   : > { %4160 = vst [vmem:[%s7234_s1 + $0x30] sm:$0xff] %v5022_v43 }
 0x6a9 PF: > { %s30_s23 = sadd.s32 1, %s5167_s23   ;;  %s7394_s1 = smov %s5163_s22 }
 0x6aa   : > { %p27_p5 = scmp.ge.s32.totalorder %s30_s23, 4   ;;  %s7395_s22 = smov %s7397_s24 }
 0x6ac   :  { %29 = sbr.rel (!%p27_p5) target bundleno = 6 (0x6), region = 142 }

</bundles_post_ra>
